<compile_context>
chip_gen: v6e
topology: v6e:2x2x1
jax: 0.10.0
libtpu: 0.0.40
codegen_flags: <defaults>
</compile_context>

<pallas_src>
import jax
import jax.numpy as jnp
from jax.experimental import pallas as pl
from jax.experimental.pallas import tpu as pltpu


# ----------------------------------------------------------------------------
# Pallas kernels (one fused kernel per layer; whole batch resident in VMEM)
# ----------------------------------------------------------------------------
def _convt_bn_relu_kernel(w_ref, p_ref, g_ref, b_ref, o_ref, *, eps=1e-5):
    """w: (4, C_out, K) bf16, p: (K, N) bf16, g/b: (C_out, 1) f32 -> o: (4, C_out, N) bf16.

    Leading axis = output parity p = (oy % 2) * 2 + (ox % 2); N = batch*H_in*W_in.
    The per-channel reduction over the (parity, lane) axes is exactly
    BatchNorm2d's training-mode (batch + spatial) statistics of the 2x-upsampled
    output.
    """
    patches = p_ref[...]
    inv_n = 1.0 / (4.0 * patches.shape[1])
    ys = [jnp.dot(w_ref[par], patches, preferred_element_type=jnp.float32)
          for par in range(4)]                                        # MXU, f32 acc
    # Two-pass BN statistics (mean, then centred sum of squares): avoids the
    # catastrophic cancellation of the E[x^2] - E[x]^2 form.
    mean = sum(jnp.sum(y, axis=1, keepdims=True) for y in ys) * inv_n      # (C, 1)
    var = sum(jnp.sum((y - mean) * (y - mean), axis=1, keepdims=True)
              for y in ys) * inv_n                                         # (C, 1)
    # Fold normalisation + affine into ONE per-channel scale/shift.
    scale = g_ref[...] * jax.lax.rsqrt(var + eps)                          # (C, 1)
    shift = b_ref[...] - mean * scale
    for par in range(4):
        o_ref[par] = jnp.maximum(ys[par] * scale + shift, 0.0).astype(o_ref.dtype)


def _convt_bias_tanh_kernel(w_ref, p_ref, b_ref, o_ref):
    """Final layer: w: (4, C_out, K) bf16, p: (K, N) bf16, b: (C_out, 1) f32
    -> o = tanh(conv_transpose + bias): (4, C_out, N) f32."""
    patches = p_ref[...]
    for par in range(4):
        y = jnp.dot(w_ref[par], patches, preferred_element_type=jnp.float32)
        o_ref[par] = jnp.tanh(y + b_ref[...]).astype(o_ref.dtype)


_COMPILER_PARAMS = pltpu.CompilerParams(vmem_limit_bytes=32 * 1024 * 1024)


def _whole_array_call(kernel, out_shape, *args):
    # Gridless call: every per-layer operand (<= ~150 KiB of patches at the
    # largest layer) fits comfortably in VMEM, so one launch per layer and the
    # BatchNorm reduction over (parity, batch, spatial) stays entirely in-kernel.
    return pl.pallas_call(
        kernel,
        out_shape=out_shape,
        in_specs=[pl.BlockSpec(memory_space=pltpu.MemorySpace.VMEM)] * len(args),
        out_specs=pl.BlockSpec(memory_space=pltpu.MemorySpace.VMEM),
        compiler_params=_COMPILER_PARAMS,
    )(*args)


def convt_bn_relu_pallas(w_sub, patches, gamma, beta):
    c_out, n = w_sub.shape[1], patches.shape[1]
    return _whole_array_call(
        _convt_bn_relu_kernel,
        jax.ShapeDtypeStruct((4, c_out, n), jnp.bfloat16),
        w_sub, patches, gamma, beta)


def convt_bias_tanh_pallas(w_sub, patches, bias):
    c_out, n = w_sub.shape[1], patches.shape[1]
    return _whole_array_call(
        _convt_bias_tanh_kernel,
        jax.ShapeDtypeStruct((4, c_out, n), jnp.float32),
        w_sub, patches, bias)


# ----------------------------------------------------------------------------
# Sub-pixel decomposition of ConvTranspose2d(k=4, s=2, p=1)
#
#   out[co, 2m+ey, 2n+ex] = sum_{ci, dy, dx in {0,1}}
#       x[ci, m+ey+dy-1, n+ex+dx-1] * W[ci, co, 3-ey-2dy, 3-ex-2dx]
#
# i.e. each output parity (ey, ex) is a stride-1 2x2 conv over the un-dilated,
# zero-padded input; all four parities read from the same 9 unit-shifted copies
# ("taps") of the padded activation, so one shared patch matrix feeds them all.
# ----------------------------------------------------------------------------
def build_subpixel_weight(w_ct):
    """PyTorch ConvTranspose2d weight (C_in, C_out, 4, 4) -> (4, C_out, 9*C_in).
    Parity p = ey*2+ex; columns ordered tap-major ((ty*3+tx)*C_in + ci) to match
    `subpixel_patches`."""
    c_in, c_out = w_ct.shape[0], w_ct.shape[1]
    w = jnp.zeros((2, 2, c_out, 3, 3, c_in), w_ct.dtype)
    for ey in range(2):
        for ex in range(2):
            for dy in range(2):
                for dx in range(2):
                    sub = jnp.transpose(w_ct[:, :, 3 - ey - 2 * dy, 3 - ex - 2 * dx])
                    w = w.at[ey, ex, :, ey + dy, ex + dx, :].set(sub)
    return w.reshape(4, c_out, 9 * c_in)


def build_subpixel_weight_1x1(w_ct):
    """Layer-0 special case (1x1 spatial input): (C_in, C_out, 4, 4) ->
    (4, C_out, C_in). Output pixel (ey, ex) only sees kernel tap (1+ey, 1+ex)."""
    return jnp.stack([jnp.transpose(w_ct[:, :, 1 + ey, 1 + ex])
                      for ey in range(2) for ex in range(2)], axis=0)


def subpixel_patches(a):
    """a: (C, B, H, W) -> (9*C, B*H*W): the 9 unit-shifted copies of the
    zero-padded activation that the four output parities draw their 2x2 taps
    from. No zero-dilation, no structurally-zero rows from the stride."""
    C, B, H, W = a.shape
    xp = jnp.pad(a, ((0, 0), (0, 0), (1, 1), (1, 1)))
    taps = [xp[:, :, ty:ty + H, tx:tx + W] for ty in range(3) for tx in range(3)]
    return jnp.stack(taps, axis=0).reshape(9 * C, B * H * W)


# ----------------------------------------------------------------------------
# Parameters (deterministic, synthetic): raw PyTorch-layout weights plus the
# packed/preprocessed form actually consumed by the forward pass (hoisted).
# ----------------------------------------------------------------------------
def init_generator_params(key, latent_dim, mid_channels, out_channels):
    chs = [latent_dim, mid_channels * 16, mid_channels * 8, mid_channels * 4,
           mid_channels * 2, mid_channels, out_channels]
    raw, packed = [], []
    for li in range(6):
        cin, cout = chs[li], chs[li + 1]
        key, wk, bk = jax.random.split(key, 3)
        # PyTorch ConvTranspose2d weight layout: (C_in, C_out, k, k)
        w = 0.05 * jax.random.normal(wk, (cin, cout, 4, 4), jnp.float32)
        b = 0.01 * jax.random.normal(bk, (cout,), jnp.float32)
        gamma = jnp.ones((cout,), jnp.float32)
        beta = jnp.zeros((cout,), jnp.float32)
        raw.append(dict(w=w, b=b, gamma=gamma, beta=beta, batchnorm=(li < 5)))
        # Weight preprocessing hoisted out of the forward (sub-kernel extraction + bf16).
        w_sub = build_subpixel_weight_1x1(w) if li == 0 else build_subpixel_weight(w)
        packed.append(dict(
            w_sub=w_sub.astype(jnp.bfloat16),
            gamma=gamma.reshape(cout, 1),
            beta=beta.reshape(cout, 1),
            bias=b.reshape(cout, 1),
            batchnorm=(li < 5),
            spatial_1x1=(li == 0)))
    return raw, packed


# ----------------------------------------------------------------------------
# Forward pass
# ----------------------------------------------------------------------------
def generator_forward(x, packed_params):
    """x: (B, latent_dim, 1, 1) f32 -> (B, out_channels, 64, 64) f32."""
    B = x.shape[0]
    a = jnp.transpose(x, (1, 0, 2, 3)).astype(jnp.bfloat16)   # channel-major (C, B, H, W)
    for layer in packed_params:
        C, _, H, W = a.shape
        c_out = layer["w_sub"].shape[1]
        if layer["spatial_1x1"]:
            patches = a.reshape(C, B)                          # direct matmul, no im2col
        else:
            patches = subpixel_patches(a)                      # (9*C, B*H*W), already bf16
        if layer["batchnorm"]:
            # conv bias dropped: cancelled by training-mode BN mean subtraction
            o = convt_bn_relu_pallas(layer["w_sub"], patches,
                                     layer["gamma"], layer["beta"])
        else:
            o = convt_bias_tanh_pallas(layer["w_sub"], patches, layer["bias"])
        # pixel-shuffle the four output parities back to (C_out, B, 2H, 2W)
        a = (o.reshape(2, 2, c_out, B, H, W)
               .transpose(2, 3, 4, 0, 5, 1)
               .reshape(c_out, B, 2 * H, 2 * W))
    return jnp.transpose(a, (1, 0, 2, 3)).astype(jnp.float32)  # back to NCHW


# ----------------------------------------------------------------------------
# Pure-JAX/XLA reference (original dilated-conv formulation) for validation;
# bf16 rounding points match the Pallas path so tolerances stay tight.
# ----------------------------------------------------------------------------
def reference_forward(x, raw_params):
    a = x
    for layer in raw_params:
        w = layer["w"]                                               # (C_in, C_out, 4, 4)
        k = jnp.transpose(jnp.flip(w, (2, 3)), (1, 0, 2, 3))          # OIHW, rot180
        y = jax.lax.conv_general_dilated(
            a.astype(jnp.bfloat16), k.astype(jnp.bfloat16),
            window_strides=(1, 1), padding=[(2, 2), (2, 2)],
            lhs_dilation=(2, 2),
            dimension_numbers=("NCHW", "OIHW", "NCHW"),
            preferred_element_type=jnp.float32)
        y = y + layer["b"].reshape(1, -1, 1, 1)
        if layer["batchnorm"]:
            mean = jnp.mean(y, axis=(0, 2, 3), keepdims=True)
            var = jnp.mean((y - mean) ** 2, axis=(0, 2, 3), keepdims=True)
            y = (y - mean) * jax.lax.rsqrt(var + 1e-5)
            y = (y * layer["gamma"].reshape(1, -1, 1, 1)
                 + layer["beta"].reshape(1, -1, 1, 1))
            a = jnp.maximum(y, 0.0)
        else:
            a = jnp.tanh(y)
    return a.astype(jnp.float32)


if __name__ == "__main__":
    key = jax.random.PRNGKey(0)
    key, xk = jax.random.split(key)

    batch = 2
    latent_dim = 32
    mid_channels = 4
    out_channels = 3

    x = jax.random.normal(xk, (batch, latent_dim, 1, 1), jnp.float32)
    raw_params, packed_params = init_generator_params(
        key, latent_dim, mid_channels, out_channels)

    fwd = jax.jit(lambda inp: generator_forward(inp, packed_params))
    out = jax.block_until_ready(fwd(x))

    assert out.shape == (batch, out_channels, 64, 64), out.shape
    assert out.dtype == jnp.float32

    ref = jax.block_until_ready(
        jax.jit(lambda inp: reference_forward(inp, raw_params))(x))
    max_err = float(jnp.max(jnp.abs(out - ref)))
    assert max_err < 5e-2, f"mismatch vs reference: max abs err = {max_err}"

    print("KERNEL_OK")
</pallas_src>

<mosaic_0001>
module attributes {stable_mosaic.version = 11 : i64} {
  func.func @_convt_bn_relu_kernel(%arg0: memref<4x64x32xbf16, #tpu.memory_space<vmem>>, %arg1: memref<32x2xbf16, #tpu.memory_space<vmem>>, %arg2: memref<64x1xf32, #tpu.memory_space<vmem>>, %arg3: memref<64x1xf32, #tpu.memory_space<vmem>>, %arg4: memref<4x64x2xbf16, #tpu.memory_space<vmem>>) attributes {dimension_semantics = [], scalar_prefetch = 0 : i64, scratch_operands = 0 : i64, tpu.core_type = #tpu.core_type<tc>} {
    %c0 = arith.constant 0 : index
    %c0_0 = arith.constant 0 : index
    %0 = vector.load %arg1[%c0, %c0_0] : memref<32x2xbf16, #tpu.memory_space<vmem>>, vector<32x2xbf16>
    %c0_1 = arith.constant 0 : index
    %c0_2 = arith.constant 0 : index
    %c0_3 = arith.constant 0 : index
    %1 = vector.load %arg0[%c0_1, %c0_2, %c0_3] : memref<4x64x32xbf16, #tpu.memory_space<vmem>>, vector<1x64x32xbf16>
    %2 = vector.shape_cast %1 : vector<1x64x32xbf16> to vector<64x32xbf16>
    %cst = arith.constant dense<0.000000e+00> : vector<64x2xf32>
    %3 = tpu.matmul %2, %0, %cst {dimension_numbers = #tpu.dot_dimension_numbers<[1], [0], [0], [1], [0, 0, 1, 1], [], []>} : vector<64x32xbf16>, vector<32x2xbf16>, vector<64x2xf32> -> vector<64x2xf32>
    %c1 = arith.constant 1 : index
    %c0_4 = arith.constant 0 : index
    %c0_5 = arith.constant 0 : index
    %4 = vector.load %arg0[%c1, %c0_4, %c0_5] : memref<4x64x32xbf16, #tpu.memory_space<vmem>>, vector<1x64x32xbf16>
    %5 = vector.shape_cast %4 : vector<1x64x32xbf16> to vector<64x32xbf16>
    %cst_6 = arith.constant dense<0.000000e+00> : vector<64x2xf32>
    %6 = tpu.matmul %5, %0, %cst_6 {dimension_numbers = #tpu.dot_dimension_numbers<[1], [0], [0], [1], [0, 0, 1, 1], [], []>} : vector<64x32xbf16>, vector<32x2xbf16>, vector<64x2xf32> -> vector<64x2xf32>
    %c2 = arith.constant 2 : index
    %c0_7 = arith.constant 0 : index
    %c0_8 = arith.constant 0 : index
    %7 = vector.load %arg0[%c2, %c0_7, %c0_8] : memref<4x64x32xbf16, #tpu.memory_space<vmem>>, vector<1x64x32xbf16>
    %8 = vector.shape_cast %7 : vector<1x64x32xbf16> to vector<64x32xbf16>
    %cst_9 = arith.constant dense<0.000000e+00> : vector<64x2xf32>
    %9 = tpu.matmul %8, %0, %cst_9 {dimension_numbers = #tpu.dot_dimension_numbers<[1], [0], [0], [1], [0, 0, 1, 1], [], []>} : vector<64x32xbf16>, vector<32x2xbf16>, vector<64x2xf32> -> vector<64x2xf32>
    %c3 = arith.constant 3 : index
    %c0_10 = arith.constant 0 : index
    %c0_11 = arith.constant 0 : index
    %10 = vector.load %arg0[%c3, %c0_10, %c0_11] : memref<4x64x32xbf16, #tpu.memory_space<vmem>>, vector<1x64x32xbf16>
    %11 = vector.shape_cast %10 : vector<1x64x32xbf16> to vector<64x32xbf16>
    %cst_12 = arith.constant dense<0.000000e+00> : vector<64x2xf32>
    %12 = tpu.matmul %11, %0, %cst_12 {dimension_numbers = #tpu.dot_dimension_numbers<[1], [0], [0], [1], [0, 0, 1, 1], [], []>} : vector<64x32xbf16>, vector<32x2xbf16>, vector<64x2xf32> -> vector<64x2xf32>
    %cst_13 = arith.constant dense<0.000000e+00> : vector<64xf32>
    %13 = vector.multi_reduction <add>, %3, %cst_13 [1] : vector<64x2xf32> to vector<64xf32>
    %14 = vector.shape_cast %13 : vector<64xf32> to vector<64x1xf32>
    %cst_14 = arith.constant 0.000000e+00 : f32
    %15 = vector.broadcast %cst_14 : f32 to vector<64x1xf32>
    %16 = arith.addf %15, %14 : vector<64x1xf32>
    %cst_15 = arith.constant dense<0.000000e+00> : vector<64xf32>
    %17 = vector.multi_reduction <add>, %6, %cst_15 [1] : vector<64x2xf32> to vector<64xf32>
    %18 = vector.shape_cast %17 : vector<64xf32> to vector<64x1xf32>
    %19 = arith.addf %16, %18 : vector<64x1xf32>
    %cst_16 = arith.constant dense<0.000000e+00> : vector<64xf32>
    %20 = vector.multi_reduction <add>, %9, %cst_16 [1] : vector<64x2xf32> to vector<64xf32>
    %21 = vector.shape_cast %20 : vector<64xf32> to vector<64x1xf32>
    %22 = arith.addf %19, %21 : vector<64x1xf32>
    %cst_17 = arith.constant dense<0.000000e+00> : vector<64xf32>
    %23 = vector.multi_reduction <add>, %12, %cst_17 [1] : vector<64x2xf32> to vector<64xf32>
    %24 = vector.shape_cast %23 : vector<64xf32> to vector<64x1xf32>
    %25 = arith.addf %22, %24 : vector<64x1xf32>
    %cst_18 = arith.constant 1.250000e-01 : f32
    %26 = vector.broadcast %cst_18 : f32 to vector<64x1xf32>
    %27 = arith.mulf %25, %26 : vector<64x1xf32>
    %28 = vector.broadcast %27 : vector<64x1xf32> to vector<64x2xf32>
    %29 = arith.subf %3, %28 : vector<64x2xf32>
    %30 = vector.broadcast %27 : vector<64x1xf32> to vector<64x2xf32>
    %31 = arith.subf %3, %30 : vector<64x2xf32>
    %32 = arith.mulf %29, %31 : vector<64x2xf32>
    %cst_19 = arith.constant dense<0.000000e+00> : vector<64xf32>
    %33 = vector.multi_reduction <add>, %32, %cst_19 [1] : vector<64x2xf32> to vector<64xf32>
    %34 = vector.shape_cast %33 : vector<64xf32> to vector<64x1xf32>
    %cst_20 = arith.constant 0.000000e+00 : f32
    %35 = vector.broadcast %cst_20 : f32 to vector<64x1xf32>
    %36 = arith.addf %35, %34 : vector<64x1xf32>
    %37 = vector.broadcast %27 : vector<64x1xf32> to vector<64x2xf32>
    %38 = arith.subf %6, %37 : vector<64x2xf32>
    %39 = vector.broadcast %27 : vector<64x1xf32> to vector<64x2xf32>
    %40 = arith.subf %6, %39 : vector<64x2xf32>
    %41 = arith.mulf %38, %40 : vector<64x2xf32>
    %cst_21 = arith.constant dense<0.000000e+00> : vector<64xf32>
    %42 = vector.multi_reduction <add>, %41, %cst_21 [1] : vector<64x2xf32> to vector<64xf32>
    %43 = vector.shape_cast %42 : vector<64xf32> to vector<64x1xf32>
    %44 = arith.addf %36, %43 : vector<64x1xf32>
    %45 = vector.broadcast %27 : vector<64x1xf32> to vector<64x2xf32>
    %46 = arith.subf %9, %45 : vector<64x2xf32>
    %47 = vector.broadcast %27 : vector<64x1xf32> to vector<64x2xf32>
    %48 = arith.subf %9, %47 : vector<64x2xf32>
    %49 = arith.mulf %46, %48 : vector<64x2xf32>
    %cst_22 = arith.constant dense<0.000000e+00> : vector<64xf32>
    %50 = vector.multi_reduction <add>, %49, %cst_22 [1] : vector<64x2xf32> to vector<64xf32>
    %51 = vector.shape_cast %50 : vector<64xf32> to vector<64x1xf32>
    %52 = arith.addf %44, %51 : vector<64x1xf32>
    %53 = vector.broadcast %27 : vector<64x1xf32> to vector<64x2xf32>
    %54 = arith.subf %12, %53 : vector<64x2xf32>
    %55 = vector.broadcast %27 : vector<64x1xf32> to vector<64x2xf32>
    %56 = arith.subf %12, %55 : vector<64x2xf32>
    %57 = arith.mulf %54, %56 : vector<64x2xf32>
    %cst_23 = arith.constant dense<0.000000e+00> : vector<64xf32>
    %58 = vector.multi_reduction <add>, %57, %cst_23 [1] : vector<64x2xf32> to vector<64xf32>
    %59 = vector.shape_cast %58 : vector<64xf32> to vector<64x1xf32>
    %60 = arith.addf %52, %59 : vector<64x1xf32>
    %cst_24 = arith.constant 1.250000e-01 : f32
    %61 = vector.broadcast %cst_24 : f32 to vector<64x1xf32>
    %62 = arith.mulf %60, %61 : vector<64x1xf32>
    %c0_25 = arith.constant 0 : index
    %c0_26 = arith.constant 0 : index
    %63 = vector.load %arg2[%c0_25, %c0_26] : memref<64x1xf32, #tpu.memory_space<vmem>>, vector<64x1xf32>
    %cst_27 = arith.constant 9.99999974E-6 : f32
    %64 = vector.broadcast %cst_27 : f32 to vector<64x1xf32>
    %65 = arith.addf %62, %64 : vector<64x1xf32>
    %66 = math.rsqrt %65 : vector<64x1xf32>
    %67 = arith.mulf %63, %66 : vector<64x1xf32>
    %c0_28 = arith.constant 0 : index
    %c0_29 = arith.constant 0 : index
    %68 = vector.load %arg3[%c0_28, %c0_29] : memref<64x1xf32, #tpu.memory_space<vmem>>, vector<64x1xf32>
    %69 = arith.mulf %27, %67 : vector<64x1xf32>
    %70 = arith.subf %68, %69 : vector<64x1xf32>
    %71 = vector.broadcast %67 : vector<64x1xf32> to vector<64x2xf32>
    %72 = arith.mulf %3, %71 : vector<64x2xf32>
    %73 = vector.broadcast %70 : vector<64x1xf32> to vector<64x2xf32>
    %74 = arith.addf %72, %73 : vector<64x2xf32>
    %cst_30 = arith.constant 0.000000e+00 : f32
    %75 = vector.broadcast %cst_30 : f32 to vector<64x2xf32>
    %76 = arith.maximumf %74, %75 : vector<64x2xf32>
    %77 = arith.truncf %76 : vector<64x2xf32> to vector<64x2xbf16>
    %c0_31 = arith.constant 0 : index
    %c0_32 = arith.constant 0 : index
    %c0_33 = arith.constant 0 : index
    %78 = vector.load %arg4[%c0_31, %c0_32, %c0_33] : memref<4x64x2xbf16, #tpu.memory_space<vmem>>, vector<1x64x2xbf16>
    %79 = vector.shape_cast %78 : vector<1x64x2xbf16> to vector<64x2xbf16>
    %80 = vector.shape_cast %77 : vector<64x2xbf16> to vector<1x64x2xbf16>
    tpu.vector_store %arg4[%c0_31, %c0_32, %c0_33], %80 {strides = array<i32>} : memref<4x64x2xbf16, #tpu.memory_space<vmem>>, vector<1x64x2xbf16>,
    %81 = vector.broadcast %67 : vector<64x1xf32> to vector<64x2xf32>
    %82 = arith.mulf %6, %81 : vector<64x2xf32>
    %83 = vector.broadcast %70 : vector<64x1xf32> to vector<64x2xf32>
    %84 = arith.addf %82, %83 : vector<64x2xf32>
    %cst_34 = arith.constant 0.000000e+00 : f32
    %85 = vector.broadcast %cst_34 : f32 to vector<64x2xf32>
    %86 = arith.maximumf %84, %85 : vector<64x2xf32>
    %87 = arith.truncf %86 : vector<64x2xf32> to vector<64x2xbf16>
    %c1_35 = arith.constant 1 : index
    %c0_36 = arith.constant 0 : index
    %c0_37 = arith.constant 0 : index
    %88 = vector.load %arg4[%c1_35, %c0_36, %c0_37] : memref<4x64x2xbf16, #tpu.memory_space<vmem>>, vector<1x64x2xbf16>
    %89 = vector.shape_cast %88 : vector<1x64x2xbf16> to vector<64x2xbf16>
    %90 = vector.shape_cast %87 : vector<64x2xbf16> to vector<1x64x2xbf16>
    tpu.vector_store %arg4[%c1_35, %c0_36, %c0_37], %90 {strides = array<i32>} : memref<4x64x2xbf16, #tpu.memory_space<vmem>>, vector<1x64x2xbf16>,
    %91 = vector.broadcast %67 : vector<64x1xf32> to vector<64x2xf32>
    %92 = arith.mulf %9, %91 : vector<64x2xf32>
    %93 = vector.broadcast %70 : vector<64x1xf32> to vector<64x2xf32>
    %94 = arith.addf %92, %93 : vector<64x2xf32>
    %cst_38 = arith.constant 0.000000e+00 : f32
    %95 = vector.broadcast %cst_38 : f32 to vector<64x2xf32>
    %96 = arith.maximumf %94, %95 : vector<64x2xf32>
    %97 = arith.truncf %96 : vector<64x2xf32> to vector<64x2xbf16>
    %c2_39 = arith.constant 2 : index
    %c0_40 = arith.constant 0 : index
    %c0_41 = arith.constant 0 : index
    %98 = vector.load %arg4[%c2_39, %c0_40, %c0_41] : memref<4x64x2xbf16, #tpu.memory_space<vmem>>, vector<1x64x2xbf16>
    %99 = vector.shape_cast %98 : vector<1x64x2xbf16> to vector<64x2xbf16>
    %100 = vector.shape_cast %97 : vector<64x2xbf16> to vector<1x64x2xbf16>
    tpu.vector_store %arg4[%c2_39, %c0_40, %c0_41], %100 {strides = array<i32>} : memref<4x64x2xbf16, #tpu.memory_space<vmem>>, vector<1x64x2xbf16>,
    %101 = vector.broadcast %67 : vector<64x1xf32> to vector<64x2xf32>
    %102 = arith.mulf %12, %101 : vector<64x2xf32>
    %103 = vector.broadcast %70 : vector<64x1xf32> to vector<64x2xf32>
    %104 = arith.addf %102, %103 : vector<64x2xf32>
    %cst_42 = arith.constant 0.000000e+00 : f32
    %105 = vector.broadcast %cst_42 : f32 to vector<64x2xf32>
    %106 = arith.maximumf %104, %105 : vector<64x2xf32>
    %107 = arith.truncf %106 : vector<64x2xf32> to vector<64x2xbf16>
    %c3_43 = arith.constant 3 : index
    %c0_44 = arith.constant 0 : index
    %c0_45 = arith.constant 0 : index
    %108 = vector.load %arg4[%c3_43, %c0_44, %c0_45] : memref<4x64x2xbf16, #tpu.memory_space<vmem>>, vector<1x64x2xbf16>
    %109 = vector.shape_cast %108 : vector<1x64x2xbf16> to vector<64x2xbf16>
    %110 = vector.shape_cast %107 : vector<64x2xbf16> to vector<1x64x2xbf16>
    tpu.vector_store %arg4[%c3_43, %c0_44, %c0_45], %110 {strides = array<i32>} : memref<4x64x2xbf16, #tpu.memory_space<vmem>>, vector<1x64x2xbf16>,
    return
  }
}

module attributes {stable_mosaic.version = 11 : i64} {
  func.func @_convt_bn_relu_kernel(%arg0: memref<4x32x576xbf16, #tpu.memory_space<vmem>>, %arg1: memref<576x8xbf16, #tpu.memory_space<vmem>>, %arg2: memref<32x1xf32, #tpu.memory_space<vmem>>, %arg3: memref<32x1xf32, #tpu.memory_space<vmem>>, %arg4: memref<4x32x8xbf16, #tpu.memory_space<vmem>>) attributes {dimension_semantics = [], scalar_prefetch = 0 : i64, scratch_operands = 0 : i64, tpu.core_type = #tpu.core_type<tc>} {
    %c0 = arith.constant 0 : index
    %c0_0 = arith.constant 0 : index
    %0 = vector.load %arg1[%c0, %c0_0] : memref<576x8xbf16, #tpu.memory_space<vmem>>, vector<576x8xbf16>
    %c0_1 = arith.constant 0 : index
    %c0_2 = arith.constant 0 : index
    %c0_3 = arith.constant 0 : index
    %1 = vector.load %arg0[%c0_1, %c0_2, %c0_3] : memref<4x32x576xbf16, #tpu.memory_space<vmem>>, vector<1x32x576xbf16>
    %2 = vector.shape_cast %1 : vector<1x32x576xbf16> to vector<32x576xbf16>
    %cst = arith.constant dense<0.000000e+00> : vector<32x8xf32>
    %3 = tpu.matmul %2, %0, %cst {dimension_numbers = #tpu.dot_dimension_numbers<[1], [0], [0], [1], [0, 0, 1, 1], [], []>} : vector<32x576xbf16>, vector<576x8xbf16>, vector<32x8xf32> -> vector<32x8xf32>
    %c1 = arith.constant 1 : index
    %c0_4 = arith.constant 0 : index
    %c0_5 = arith.constant 0 : index
    %4 = vector.load %arg0[%c1, %c0_4, %c0_5] : memref<4x32x576xbf16, #tpu.memory_space<vmem>>, vector<1x32x576xbf16>
    %5 = vector.shape_cast %4 : vector<1x32x576xbf16> to vector<32x576xbf16>
    %cst_6 = arith.constant dense<0.000000e+00> : vector<32x8xf32>
    %6 = tpu.matmul %5, %0, %cst_6 {dimension_numbers = #tpu.dot_dimension_numbers<[1], [0], [0], [1], [0, 0, 1, 1], [], []>} : vector<32x576xbf16>, vector<576x8xbf16>, vector<32x8xf32> -> vector<32x8xf32>
    %c2 = arith.constant 2 : index
    %c0_7 = arith.constant 0 : index
    %c0_8 = arith.constant 0 : index
    %7 = vector.load %arg0[%c2, %c0_7, %c0_8] : memref<4x32x576xbf16, #tpu.memory_space<vmem>>, vector<1x32x576xbf16>
    %8 = vector.shape_cast %7 : vector<1x32x576xbf16> to vector<32x576xbf16>
    %cst_9 = arith.constant dense<0.000000e+00> : vector<32x8xf32>
    %9 = tpu.matmul %8, %0, %cst_9 {dimension_numbers = #tpu.dot_dimension_numbers<[1], [0], [0], [1], [0, 0, 1, 1], [], []>} : vector<32x576xbf16>, vector<576x8xbf16>, vector<32x8xf32> -> vector<32x8xf32>
    %c3 = arith.constant 3 : index
    %c0_10 = arith.constant 0 : index
    %c0_11 = arith.constant 0 : index
    %10 = vector.load %arg0[%c3, %c0_10, %c0_11] : memref<4x32x576xbf16, #tpu.memory_space<vmem>>, vector<1x32x576xbf16>
    %11 = vector.shape_cast %10 : vector<1x32x576xbf16> to vector<32x576xbf16>
    %cst_12 = arith.constant dense<0.000000e+00> : vector<32x8xf32>
    %12 = tpu.matmul %11, %0, %cst_12 {dimension_numbers = #tpu.dot_dimension_numbers<[1], [0], [0], [1], [0, 0, 1, 1], [], []>} : vector<32x576xbf16>, vector<576x8xbf16>, vector<32x8xf32> -> vector<32x8xf32>
    %cst_13 = arith.constant dense<0.000000e+00> : vector<32xf32>
    %13 = vector.multi_reduction <add>, %3, %cst_13 [1] : vector<32x8xf32> to vector<32xf32>
    %14 = vector.shape_cast %13 : vector<32xf32> to vector<32x1xf32>
    %cst_14 = arith.constant 0.000000e+00 : f32
    %15 = vector.broadcast %cst_14 : f32 to vector<32x1xf32>
    %16 = arith.addf %15, %14 : vector<32x1xf32>
    %cst_15 = arith.constant dense<0.000000e+00> : vector<32xf32>
    %17 = vector.multi_reduction <add>, %6, %cst_15 [1] : vector<32x8xf32> to vector<32xf32>
    %18 = vector.shape_cast %17 : vector<32xf32> to vector<32x1xf32>
    %19 = arith.addf %16, %18 : vector<32x1xf32>
    %cst_16 = arith.constant dense<0.000000e+00> : vector<32xf32>
    %20 = vector.multi_reduction <add>, %9, %cst_16 [1] : vector<32x8xf32> to vector<32xf32>
    %21 = vector.shape_cast %20 : vector<32xf32> to vector<32x1xf32>
    %22 = arith.addf %19, %21 : vector<32x1xf32>
    %cst_17 = arith.constant dense<0.000000e+00> : vector<32xf32>
    %23 = vector.multi_reduction <add>, %12, %cst_17 [1] : vector<32x8xf32> to vector<32xf32>
    %24 = vector.shape_cast %23 : vector<32xf32> to vector<32x1xf32>
    %25 = arith.addf %22, %24 : vector<32x1xf32>
    %cst_18 = arith.constant 3.125000e-02 : f32
    %26 = vector.broadcast %cst_18 : f32 to vector<32x1xf32>
    %27 = arith.mulf %25, %26 : vector<32x1xf32>
    %28 = vector.broadcast %27 : vector<32x1xf32> to vector<32x8xf32>
    %29 = arith.subf %3, %28 : vector<32x8xf32>
    %30 = vector.broadcast %27 : vector<32x1xf32> to vector<32x8xf32>
    %31 = arith.subf %3, %30 : vector<32x8xf32>
    %32 = arith.mulf %29, %31 : vector<32x8xf32>
    %cst_19 = arith.constant dense<0.000000e+00> : vector<32xf32>
    %33 = vector.multi_reduction <add>, %32, %cst_19 [1] : vector<32x8xf32> to vector<32xf32>
    %34 = vector.shape_cast %33 : vector<32xf32> to vector<32x1xf32>
    %cst_20 = arith.constant 0.000000e+00 : f32
    %35 = vector.broadcast %cst_20 : f32 to vector<32x1xf32>
    %36 = arith.addf %35, %34 : vector<32x1xf32>
    %37 = vector.broadcast %27 : vector<32x1xf32> to vector<32x8xf32>
    %38 = arith.subf %6, %37 : vector<32x8xf32>
    %39 = vector.broadcast %27 : vector<32x1xf32> to vector<32x8xf32>
    %40 = arith.subf %6, %39 : vector<32x8xf32>
    %41 = arith.mulf %38, %40 : vector<32x8xf32>
    %cst_21 = arith.constant dense<0.000000e+00> : vector<32xf32>
    %42 = vector.multi_reduction <add>, %41, %cst_21 [1] : vector<32x8xf32> to vector<32xf32>
    %43 = vector.shape_cast %42 : vector<32xf32> to vector<32x1xf32>
    %44 = arith.addf %36, %43 : vector<32x1xf32>
    %45 = vector.broadcast %27 : vector<32x1xf32> to vector<32x8xf32>
    %46 = arith.subf %9, %45 : vector<32x8xf32>
    %47 = vector.broadcast %27 : vector<32x1xf32> to vector<32x8xf32>
    %48 = arith.subf %9, %47 : vector<32x8xf32>
    %49 = arith.mulf %46, %48 : vector<32x8xf32>
    %cst_22 = arith.constant dense<0.000000e+00> : vector<32xf32>
    %50 = vector.multi_reduction <add>, %49, %cst_22 [1] : vector<32x8xf32> to vector<32xf32>
    %51 = vector.shape_cast %50 : vector<32xf32> to vector<32x1xf32>
    %52 = arith.addf %44, %51 : vector<32x1xf32>
    %53 = vector.broadcast %27 : vector<32x1xf32> to vector<32x8xf32>
    %54 = arith.subf %12, %53 : vector<32x8xf32>
    %55 = vector.broadcast %27 : vector<32x1xf32> to vector<32x8xf32>
    %56 = arith.subf %12, %55 : vector<32x8xf32>
    %57 = arith.mulf %54, %56 : vector<32x8xf32>
    %cst_23 = arith.constant dense<0.000000e+00> : vector<32xf32>
    %58 = vector.multi_reduction <add>, %57, %cst_23 [1] : vector<32x8xf32> to vector<32xf32>
    %59 = vector.shape_cast %58 : vector<32xf32> to vector<32x1xf32>
    %60 = arith.addf %52, %59 : vector<32x1xf32>
    %cst_24 = arith.constant 3.125000e-02 : f32
    %61 = vector.broadcast %cst_24 : f32 to vector<32x1xf32>
    %62 = arith.mulf %60, %61 : vector<32x1xf32>
    %c0_25 = arith.constant 0 : index
    %c0_26 = arith.constant 0 : index
    %63 = vector.load %arg2[%c0_25, %c0_26] : memref<32x1xf32, #tpu.memory_space<vmem>>, vector<32x1xf32>
    %cst_27 = arith.constant 9.99999974E-6 : f32
    %64 = vector.broadcast %cst_27 : f32 to vector<32x1xf32>
    %65 = arith.addf %62, %64 : vector<32x1xf32>
    %66 = math.rsqrt %65 : vector<32x1xf32>
    %67 = arith.mulf %63, %66 : vector<32x1xf32>
    %c0_28 = arith.constant 0 : index
    %c0_29 = arith.constant 0 : index
    %68 = vector.load %arg3[%c0_28, %c0_29] : memref<32x1xf32, #tpu.memory_space<vmem>>, vector<32x1xf32>
    %69 = arith.mulf %27, %67 : vector<32x1xf32>
    %70 = arith.subf %68, %69 : vector<32x1xf32>
    %71 = vector.broadcast %67 : vector<32x1xf32> to vector<32x8xf32>
    %72 = arith.mulf %3, %71 : vector<32x8xf32>
    %73 = vector.broadcast %70 : vector<32x1xf32> to vector<32x8xf32>
    %74 = arith.addf %72, %73 : vector<32x8xf32>
    %cst_30 = arith.constant 0.000000e+00 : f32
    %75 = vector.broadcast %cst_30 : f32 to vector<32x8xf32>
    %76 = arith.maximumf %74, %75 : vector<32x8xf32>
    %77 = arith.truncf %76 : vector<32x8xf32> to vector<32x8xbf16>
    %c0_31 = arith.constant 0 : index
    %c0_32 = arith.constant 0 : index
    %c0_33 = arith.constant 0 : index
    %78 = vector.load %arg4[%c0_31, %c0_32, %c0_33] : memref<4x32x8xbf16, #tpu.memory_space<vmem>>, vector<1x32x8xbf16>
    %79 = vector.shape_cast %78 : vector<1x32x8xbf16> to vector<32x8xbf16>
    %80 = vector.shape_cast %77 : vector<32x8xbf16> to vector<1x32x8xbf16>
    tpu.vector_store %arg4[%c0_31, %c0_32, %c0_33], %80 {strides = array<i32>} : memref<4x32x8xbf16, #tpu.memory_space<vmem>>, vector<1x32x8xbf16>,
    %81 = vector.broadcast %67 : vector<32x1xf32> to vector<32x8xf32>
    %82 = arith.mulf %6, %81 : vector<32x8xf32>
    %83 = vector.broadcast %70 : vector<32x1xf32> to vector<32x8xf32>
    %84 = arith.addf %82, %83 : vector<32x8xf32>
    %cst_34 = arith.constant 0.000000e+00 : f32
    %85 = vector.broadcast %cst_34 : f32 to vector<32x8xf32>
    %86 = arith.maximumf %84, %85 : vector<32x8xf32>
    %87 = arith.truncf %86 : vector<32x8xf32> to vector<32x8xbf16>
    %c1_35 = arith.constant 1 : index
    %c0_36 = arith.constant 0 : index
    %c0_37 = arith.constant 0 : index
    %88 = vector.load %arg4[%c1_35, %c0_36, %c0_37] : memref<4x32x8xbf16, #tpu.memory_space<vmem>>, vector<1x32x8xbf16>
    %89 = vector.shape_cast %88 : vector<1x32x8xbf16> to vector<32x8xbf16>
    %90 = vector.shape_cast %87 : vector<32x8xbf16> to vector<1x32x8xbf16>
    tpu.vector_store %arg4[%c1_35, %c0_36, %c0_37], %90 {strides = array<i32>} : memref<4x32x8xbf16, #tpu.memory_space<vmem>>, vector<1x32x8xbf16>,
    %91 = vector.broadcast %67 : vector<32x1xf32> to vector<32x8xf32>
    %92 = arith.mulf %9, %91 : vector<32x8xf32>
    %93 = vector.broadcast %70 : vector<32x1xf32> to vector<32x8xf32>
    %94 = arith.addf %92, %93 : vector<32x8xf32>
    %cst_38 = arith.constant 0.000000e+00 : f32
    %95 = vector.broadcast %cst_38 : f32 to vector<32x8xf32>
    %96 = arith.maximumf %94, %95 : vector<32x8xf32>
    %97 = arith.truncf %96 : vector<32x8xf32> to vector<32x8xbf16>
    %c2_39 = arith.constant 2 : index
    %c0_40 = arith.constant 0 : index
    %c0_41 = arith.constant 0 : index
    %98 = vector.load %arg4[%c2_39, %c0_40, %c0_41] : memref<4x32x8xbf16, #tpu.memory_space<vmem>>, vector<1x32x8xbf16>
    %99 = vector.shape_cast %98 : vector<1x32x8xbf16> to vector<32x8xbf16>
    %100 = vector.shape_cast %97 : vector<32x8xbf16> to vector<1x32x8xbf16>
    tpu.vector_store %arg4[%c2_39, %c0_40, %c0_41], %100 {strides = array<i32>} : memref<4x32x8xbf16, #tpu.memory_space<vmem>>, vector<1x32x8xbf16>,
    %101 = vector.broadcast %67 : vector<32x1xf32> to vector<32x8xf32>
    %102 = arith.mulf %12, %101 : vector<32x8xf32>
    %103 = vector.broadcast %70 : vector<32x1xf32> to vector<32x8xf32>
    %104 = arith.addf %102, %103 : vector<32x8xf32>
    %cst_42 = arith.constant 0.000000e+00 : f32
    %105 = vector.broadcast %cst_42 : f32 to vector<32x8xf32>
    %106 = arith.maximumf %104, %105 : vector<32x8xf32>
    %107 = arith.truncf %106 : vector<32x8xf32> to vector<32x8xbf16>
    %c3_43 = arith.constant 3 : index
    %c0_44 = arith.constant 0 : index
    %c0_45 = arith.constant 0 : index
    %108 = vector.load %arg4[%c3_43, %c0_44, %c0_45] : memref<4x32x8xbf16, #tpu.memory_space<vmem>>, vector<1x32x8xbf16>
    %109 = vector.shape_cast %108 : vector<1x32x8xbf16> to vector<32x8xbf16>
    %110 = vector.shape_cast %107 : vector<32x8xbf16> to vector<1x32x8xbf16>
    tpu.vector_store %arg4[%c3_43, %c0_44, %c0_45], %110 {strides = array<i32>} : memref<4x32x8xbf16, #tpu.memory_space<vmem>>, vector<1x32x8xbf16>,
    return
  }
}

module attributes {stable_mosaic.version = 11 : i64} {
  func.func @_convt_bn_relu_kernel(%arg0: memref<4x16x288xbf16, #tpu.memory_space<vmem>>, %arg1: memref<288x32xbf16, #tpu.memory_space<vmem>>, %arg2: memref<16x1xf32, #tpu.memory_space<vmem>>, %arg3: memref<16x1xf32, #tpu.memory_space<vmem>>, %arg4: memref<4x16x32xbf16, #tpu.memory_space<vmem>>) attributes {dimension_semantics = [], scalar_prefetch = 0 : i64, scratch_operands = 0 : i64, tpu.core_type = #tpu.core_type<tc>} {
    %c0 = arith.constant 0 : index
    %c0_0 = arith.constant 0 : index
    %0 = vector.load %arg1[%c0, %c0_0] : memref<288x32xbf16, #tpu.memory_space<vmem>>, vector<288x32xbf16>
    %c0_1 = arith.constant 0 : index
    %c0_2 = arith.constant 0 : index
    %c0_3 = arith.constant 0 : index
    %1 = vector.load %arg0[%c0_1, %c0_2, %c0_3] : memref<4x16x288xbf16, #tpu.memory_space<vmem>>, vector<1x16x288xbf16>
    %2 = vector.shape_cast %1 : vector<1x16x288xbf16> to vector<16x288xbf16>
    %cst = arith.constant dense<0.000000e+00> : vector<16x32xf32>
    %3 = tpu.matmul %2, %0, %cst {dimension_numbers = #tpu.dot_dimension_numbers<[1], [0], [0], [1], [0, 0, 1, 1], [], []>} : vector<16x288xbf16>, vector<288x32xbf16>, vector<16x32xf32> -> vector<16x32xf32>
    %c1 = arith.constant 1 : index
    %c0_4 = arith.constant 0 : index
    %c0_5 = arith.constant 0 : index
    %4 = vector.load %arg0[%c1, %c0_4, %c0_5] : memref<4x16x288xbf16, #tpu.memory_space<vmem>>, vector<1x16x288xbf16>
    %5 = vector.shape_cast %4 : vector<1x16x288xbf16> to vector<16x288xbf16>
    %cst_6 = arith.constant dense<0.000000e+00> : vector<16x32xf32>
    %6 = tpu.matmul %5, %0, %cst_6 {dimension_numbers = #tpu.dot_dimension_numbers<[1], [0], [0], [1], [0, 0, 1, 1], [], []>} : vector<16x288xbf16>, vector<288x32xbf16>, vector<16x32xf32> -> vector<16x32xf32>
    %c2 = arith.constant 2 : index
    %c0_7 = arith.constant 0 : index
    %c0_8 = arith.constant 0 : index
    %7 = vector.load %arg0[%c2, %c0_7, %c0_8] : memref<4x16x288xbf16, #tpu.memory_space<vmem>>, vector<1x16x288xbf16>
    %8 = vector.shape_cast %7 : vector<1x16x288xbf16> to vector<16x288xbf16>
    %cst_9 = arith.constant dense<0.000000e+00> : vector<16x32xf32>
    %9 = tpu.matmul %8, %0, %cst_9 {dimension_numbers = #tpu.dot_dimension_numbers<[1], [0], [0], [1], [0, 0, 1, 1], [], []>} : vector<16x288xbf16>, vector<288x32xbf16>, vector<16x32xf32> -> vector<16x32xf32>
    %c3 = arith.constant 3 : index
    %c0_10 = arith.constant 0 : index
    %c0_11 = arith.constant 0 : index
    %10 = vector.load %arg0[%c3, %c0_10, %c0_11] : memref<4x16x288xbf16, #tpu.memory_space<vmem>>, vector<1x16x288xbf16>
    %11 = vector.shape_cast %10 : vector<1x16x288xbf16> to vector<16x288xbf16>
    %cst_12 = arith.constant dense<0.000000e+00> : vector<16x32xf32>
    %12 = tpu.matmul %11, %0, %cst_12 {dimension_numbers = #tpu.dot_dimension_numbers<[1], [0], [0], [1], [0, 0, 1, 1], [], []>} : vector<16x288xbf16>, vector<288x32xbf16>, vector<16x32xf32> -> vector<16x32xf32>
    %cst_13 = arith.constant dense<0.000000e+00> : vector<16xf32>
    %13 = vector.multi_reduction <add>, %3, %cst_13 [1] : vector<16x32xf32> to vector<16xf32>
    %14 = vector.shape_cast %13 : vector<16xf32> to vector<16x1xf32>
    %cst_14 = arith.constant 0.000000e+00 : f32
    %15 = vector.broadcast %cst_14 : f32 to vector<16x1xf32>
    %16 = arith.addf %15, %14 : vector<16x1xf32>
    %cst_15 = arith.constant dense<0.000000e+00> : vector<16xf32>
    %17 = vector.multi_reduction <add>, %6, %cst_15 [1] : vector<16x32xf32> to vector<16xf32>
    %18 = vector.shape_cast %17 : vector<16xf32> to vector<16x1xf32>
    %19 = arith.addf %16, %18 : vector<16x1xf32>
    %cst_16 = arith.constant dense<0.000000e+00> : vector<16xf32>
    %20 = vector.multi_reduction <add>, %9, %cst_16 [1] : vector<16x32xf32> to vector<16xf32>
    %21 = vector.shape_cast %20 : vector<16xf32> to vector<16x1xf32>
    %22 = arith.addf %19, %21 : vector<16x1xf32>
    %cst_17 = arith.constant dense<0.000000e+00> : vector<16xf32>
    %23 = vector.multi_reduction <add>, %12, %cst_17 [1] : vector<16x32xf32> to vector<16xf32>
    %24 = vector.shape_cast %23 : vector<16xf32> to vector<16x1xf32>
    %25 = arith.addf %22, %24 : vector<16x1xf32>
    %cst_18 = arith.constant 7.812500e-03 : f32
    %26 = vector.broadcast %cst_18 : f32 to vector<16x1xf32>
    %27 = arith.mulf %25, %26 : vector<16x1xf32>
    %28 = vector.broadcast %27 : vector<16x1xf32> to vector<16x32xf32>
    %29 = arith.subf %3, %28 : vector<16x32xf32>
    %30 = vector.broadcast %27 : vector<16x1xf32> to vector<16x32xf32>
    %31 = arith.subf %3, %30 : vector<16x32xf32>
    %32 = arith.mulf %29, %31 : vector<16x32xf32>
    %cst_19 = arith.constant dense<0.000000e+00> : vector<16xf32>
    %33 = vector.multi_reduction <add>, %32, %cst_19 [1] : vector<16x32xf32> to vector<16xf32>
    %34 = vector.shape_cast %33 : vector<16xf32> to vector<16x1xf32>
    %cst_20 = arith.constant 0.000000e+00 : f32
    %35 = vector.broadcast %cst_20 : f32 to vector<16x1xf32>
    %36 = arith.addf %35, %34 : vector<16x1xf32>
    %37 = vector.broadcast %27 : vector<16x1xf32> to vector<16x32xf32>
    %38 = arith.subf %6, %37 : vector<16x32xf32>
    %39 = vector.broadcast %27 : vector<16x1xf32> to vector<16x32xf32>
    %40 = arith.subf %6, %39 : vector<16x32xf32>
    %41 = arith.mulf %38, %40 : vector<16x32xf32>
    %cst_21 = arith.constant dense<0.000000e+00> : vector<16xf32>
    %42 = vector.multi_reduction <add>, %41, %cst_21 [1] : vector<16x32xf32> to vector<16xf32>
    %43 = vector.shape_cast %42 : vector<16xf32> to vector<16x1xf32>
    %44 = arith.addf %36, %43 : vector<16x1xf32>
    %45 = vector.broadcast %27 : vector<16x1xf32> to vector<16x32xf32>
    %46 = arith.subf %9, %45 : vector<16x32xf32>
    %47 = vector.broadcast %27 : vector<16x1xf32> to vector<16x32xf32>
    %48 = arith.subf %9, %47 : vector<16x32xf32>
    %49 = arith.mulf %46, %48 : vector<16x32xf32>
    %cst_22 = arith.constant dense<0.000000e+00> : vector<16xf32>
    %50 = vector.multi_reduction <add>, %49, %cst_22 [1] : vector<16x32xf32> to vector<16xf32>
    %51 = vector.shape_cast %50 : vector<16xf32> to vector<16x1xf32>
    %52 = arith.addf %44, %51 : vector<16x1xf32>
    %53 = vector.broadcast %27 : vector<16x1xf32> to vector<16x32xf32>
    %54 = arith.subf %12, %53 : vector<16x32xf32>
    %55 = vector.broadcast %27 : vector<16x1xf32> to vector<16x32xf32>
    %56 = arith.subf %12, %55 : vector<16x32xf32>
    %57 = arith.mulf %54, %56 : vector<16x32xf32>
    %cst_23 = arith.constant dense<0.000000e+00> : vector<16xf32>
    %58 = vector.multi_reduction <add>, %57, %cst_23 [1] : vector<16x32xf32> to vector<16xf32>
    %59 = vector.shape_cast %58 : vector<16xf32> to vector<16x1xf32>
    %60 = arith.addf %52, %59 : vector<16x1xf32>
    %cst_24 = arith.constant 7.812500e-03 : f32
    %61 = vector.broadcast %cst_24 : f32 to vector<16x1xf32>
    %62 = arith.mulf %60, %61 : vector<16x1xf32>
    %c0_25 = arith.constant 0 : index
    %c0_26 = arith.constant 0 : index
    %63 = vector.load %arg2[%c0_25, %c0_26] : memref<16x1xf32, #tpu.memory_space<vmem>>, vector<16x1xf32>
    %cst_27 = arith.constant 9.99999974E-6 : f32
    %64 = vector.broadcast %cst_27 : f32 to vector<16x1xf32>
    %65 = arith.addf %62, %64 : vector<16x1xf32>
    %66 = math.rsqrt %65 : vector<16x1xf32>
    %67 = arith.mulf %63, %66 : vector<16x1xf32>
    %c0_28 = arith.constant 0 : index
    %c0_29 = arith.constant 0 : index
    %68 = vector.load %arg3[%c0_28, %c0_29] : memref<16x1xf32, #tpu.memory_space<vmem>>, vector<16x1xf32>
    %69 = arith.mulf %27, %67 : vector<16x1xf32>
    %70 = arith.subf %68, %69 : vector<16x1xf32>
    %71 = vector.broadcast %67 : vector<16x1xf32> to vector<16x32xf32>
    %72 = arith.mulf %3, %71 : vector<16x32xf32>
    %73 = vector.broadcast %70 : vector<16x1xf32> to vector<16x32xf32>
    %74 = arith.addf %72, %73 : vector<16x32xf32>
    %cst_30 = arith.constant 0.000000e+00 : f32
    %75 = vector.broadcast %cst_30 : f32 to vector<16x32xf32>
    %76 = arith.maximumf %74, %75 : vector<16x32xf32>
    %77 = arith.truncf %76 : vector<16x32xf32> to vector<16x32xbf16>
    %c0_31 = arith.constant 0 : index
    %c0_32 = arith.constant 0 : index
    %c0_33 = arith.constant 0 : index
    %78 = vector.load %arg4[%c0_31, %c0_32, %c0_33] : memref<4x16x32xbf16, #tpu.memory_space<vmem>>, vector<1x16x32xbf16>
    %79 = vector.shape_cast %78 : vector<1x16x32xbf16> to vector<16x32xbf16>
    %80 = vector.shape_cast %77 : vector<16x32xbf16> to vector<1x16x32xbf16>
    tpu.vector_store %arg4[%c0_31, %c0_32, %c0_33], %80 {strides = array<i32>} : memref<4x16x32xbf16, #tpu.memory_space<vmem>>, vector<1x16x32xbf16>,
    %81 = vector.broadcast %67 : vector<16x1xf32> to vector<16x32xf32>
    %82 = arith.mulf %6, %81 : vector<16x32xf32>
    %83 = vector.broadcast %70 : vector<16x1xf32> to vector<16x32xf32>
    %84 = arith.addf %82, %83 : vector<16x32xf32>
    %cst_34 = arith.constant 0.000000e+00 : f32
    %85 = vector.broadcast %cst_34 : f32 to vector<16x32xf32>
    %86 = arith.maximumf %84, %85 : vector<16x32xf32>
    %87 = arith.truncf %86 : vector<16x32xf32> to vector<16x32xbf16>
    %c1_35 = arith.constant 1 : index
    %c0_36 = arith.constant 0 : index
    %c0_37 = arith.constant 0 : index
    %88 = vector.load %arg4[%c1_35, %c0_36, %c0_37] : memref<4x16x32xbf16, #tpu.memory_space<vmem>>, vector<1x16x32xbf16>
    %89 = vector.shape_cast %88 : vector<1x16x32xbf16> to vector<16x32xbf16>
    %90 = vector.shape_cast %87 : vector<16x32xbf16> to vector<1x16x32xbf16>
    tpu.vector_store %arg4[%c1_35, %c0_36, %c0_37], %90 {strides = array<i32>} : memref<4x16x32xbf16, #tpu.memory_space<vmem>>, vector<1x16x32xbf16>,
    %91 = vector.broadcast %67 : vector<16x1xf32> to vector<16x32xf32>
    %92 = arith.mulf %9, %91 : vector<16x32xf32>
    %93 = vector.broadcast %70 : vector<16x1xf32> to vector<16x32xf32>
    %94 = arith.addf %92, %93 : vector<16x32xf32>
    %cst_38 = arith.constant 0.000000e+00 : f32
    %95 = vector.broadcast %cst_38 : f32 to vector<16x32xf32>
    %96 = arith.maximumf %94, %95 : vector<16x32xf32>
    %97 = arith.truncf %96 : vector<16x32xf32> to vector<16x32xbf16>
    %c2_39 = arith.constant 2 : index
    %c0_40 = arith.constant 0 : index
    %c0_41 = arith.constant 0 : index
    %98 = vector.load %arg4[%c2_39, %c0_40, %c0_41] : memref<4x16x32xbf16, #tpu.memory_space<vmem>>, vector<1x16x32xbf16>
    %99 = vector.shape_cast %98 : vector<1x16x32xbf16> to vector<16x32xbf16>
    %100 = vector.shape_cast %97 : vector<16x32xbf16> to vector<1x16x32xbf16>
    tpu.vector_store %arg4[%c2_39, %c0_40, %c0_41], %100 {strides = array<i32>} : memref<4x16x32xbf16, #tpu.memory_space<vmem>>, vector<1x16x32xbf16>,
    %101 = vector.broadcast %67 : vector<16x1xf32> to vector<16x32xf32>
    %102 = arith.mulf %12, %101 : vector<16x32xf32>
    %103 = vector.broadcast %70 : vector<16x1xf32> to vector<16x32xf32>
    %104 = arith.addf %102, %103 : vector<16x32xf32>
    %cst_42 = arith.constant 0.000000e+00 : f32
    %105 = vector.broadcast %cst_42 : f32 to vector<16x32xf32>
    %106 = arith.maximumf %104, %105 : vector<16x32xf32>
    %107 = arith.truncf %106 : vector<16x32xf32> to vector<16x32xbf16>
    %c3_43 = arith.constant 3 : index
    %c0_44 = arith.constant 0 : index
    %c0_45 = arith.constant 0 : index
    %108 = vector.load %arg4[%c3_43, %c0_44, %c0_45] : memref<4x16x32xbf16, #tpu.memory_space<vmem>>, vector<1x16x32xbf16>
    %109 = vector.shape_cast %108 : vector<1x16x32xbf16> to vector<16x32xbf16>
    %110 = vector.shape_cast %107 : vector<16x32xbf16> to vector<1x16x32xbf16>
    tpu.vector_store %arg4[%c3_43, %c0_44, %c0_45], %110 {strides = array<i32>} : memref<4x16x32xbf16, #tpu.memory_space<vmem>>, vector<1x16x32xbf16>,
    return
  }
}

module attributes {stable_mosaic.version = 11 : i64} {
  func.func @_convt_bn_relu_kernel(%arg0: memref<4x8x144xbf16, #tpu.memory_space<vmem>>, %arg1: memref<144x128xbf16, #tpu.memory_space<vmem>>, %arg2: memref<8x1xf32, #tpu.memory_space<vmem>>, %arg3: memref<8x1xf32, #tpu.memory_space<vmem>>, %arg4: memref<4x8x128xbf16, #tpu.memory_space<vmem>>) attributes {dimension_semantics = [], scalar_prefetch = 0 : i64, scratch_operands = 0 : i64, tpu.core_type = #tpu.core_type<tc>} {
    %c0 = arith.constant 0 : index
    %c0_0 = arith.constant 0 : index
    %0 = vector.load %arg1[%c0, %c0_0] : memref<144x128xbf16, #tpu.memory_space<vmem>>, vector<144x128xbf16>
    %c0_1 = arith.constant 0 : index
    %c0_2 = arith.constant 0 : index
    %c0_3 = arith.constant 0 : index
    %1 = vector.load %arg0[%c0_1, %c0_2, %c0_3] : memref<4x8x144xbf16, #tpu.memory_space<vmem>>, vector<1x8x144xbf16>
    %2 = vector.shape_cast %1 : vector<1x8x144xbf16> to vector<8x144xbf16>
    %cst = arith.constant dense<0.000000e+00> : vector<8x128xf32>
    %3 = tpu.matmul %2, %0, %cst {dimension_numbers = #tpu.dot_dimension_numbers<[1], [0], [0], [1], [0, 0, 1, 1], [], []>} : vector<8x144xbf16>, vector<144x128xbf16>, vector<8x128xf32> -> vector<8x128xf32>
    %c1 = arith.constant 1 : index
    %c0_4 = arith.constant 0 : index
    %c0_5 = arith.constant 0 : index
    %4 = vector.load %arg0[%c1, %c0_4, %c0_5] : memref<4x8x144xbf16, #tpu.memory_space<vmem>>, vector<1x8x144xbf16>
    %5 = vector.shape_cast %4 : vector<1x8x144xbf16> to vector<8x144xbf16>
    %cst_6 = arith.constant dense<0.000000e+00> : vector<8x128xf32>
    %6 = tpu.matmul %5, %0, %cst_6 {dimension_numbers = #tpu.dot_dimension_numbers<[1], [0], [0], [1], [0, 0, 1, 1], [], []>} : vector<8x144xbf16>, vector<144x128xbf16>, vector<8x128xf32> -> vector<8x128xf32>
    %c2 = arith.constant 2 : index
    %c0_7 = arith.constant 0 : index
    %c0_8 = arith.constant 0 : index
    %7 = vector.load %arg0[%c2, %c0_7, %c0_8] : memref<4x8x144xbf16, #tpu.memory_space<vmem>>, vector<1x8x144xbf16>
    %8 = vector.shape_cast %7 : vector<1x8x144xbf16> to vector<8x144xbf16>
    %cst_9 = arith.constant dense<0.000000e+00> : vector<8x128xf32>
    %9 = tpu.matmul %8, %0, %cst_9 {dimension_numbers = #tpu.dot_dimension_numbers<[1], [0], [0], [1], [0, 0, 1, 1], [], []>} : vector<8x144xbf16>, vector<144x128xbf16>, vector<8x128xf32> -> vector<8x128xf32>
    %c3 = arith.constant 3 : index
    %c0_10 = arith.constant 0 : index
    %c0_11 = arith.constant 0 : index
    %10 = vector.load %arg0[%c3, %c0_10, %c0_11] : memref<4x8x144xbf16, #tpu.memory_space<vmem>>, vector<1x8x144xbf16>
    %11 = vector.shape_cast %10 : vector<1x8x144xbf16> to vector<8x144xbf16>
    %cst_12 = arith.constant dense<0.000000e+00> : vector<8x128xf32>
    %12 = tpu.matmul %11, %0, %cst_12 {dimension_numbers = #tpu.dot_dimension_numbers<[1], [0], [0], [1], [0, 0, 1, 1], [], []>} : vector<8x144xbf16>, vector<144x128xbf16>, vector<8x128xf32> -> vector<8x128xf32>
    %cst_13 = arith.constant dense<0.000000e+00> : vector<8xf32>
    %13 = vector.multi_reduction <add>, %3, %cst_13 [1] : vector<8x128xf32> to vector<8xf32>
    %14 = vector.shape_cast %13 : vector<8xf32> to vector<8x1xf32>
    %cst_14 = arith.constant 0.000000e+00 : f32
    %15 = vector.broadcast %cst_14 : f32 to vector<8x1xf32>
    %16 = arith.addf %15, %14 : vector<8x1xf32>
    %cst_15 = arith.constant dense<0.000000e+00> : vector<8xf32>
    %17 = vector.multi_reduction <add>, %6, %cst_15 [1] : vector<8x128xf32> to vector<8xf32>
    %18 = vector.shape_cast %17 : vector<8xf32> to vector<8x1xf32>
    %19 = arith.addf %16, %18 : vector<8x1xf32>
    %cst_16 = arith.constant dense<0.000000e+00> : vector<8xf32>
    %20 = vector.multi_reduction <add>, %9, %cst_16 [1] : vector<8x128xf32> to vector<8xf32>
    %21 = vector.shape_cast %20 : vector<8xf32> to vector<8x1xf32>
    %22 = arith.addf %19, %21 : vector<8x1xf32>
    %cst_17 = arith.constant dense<0.000000e+00> : vector<8xf32>
    %23 = vector.multi_reduction <add>, %12, %cst_17 [1] : vector<8x128xf32> to vector<8xf32>
    %24 = vector.shape_cast %23 : vector<8xf32> to vector<8x1xf32>
    %25 = arith.addf %22, %24 : vector<8x1xf32>
    %cst_18 = arith.constant 0.001953125 : f32
    %26 = vector.broadcast %cst_18 : f32 to vector<8x1xf32>
    %27 = arith.mulf %25, %26 : vector<8x1xf32>
    %28 = vector.broadcast %27 : vector<8x1xf32> to vector<8x128xf32>
    %29 = arith.subf %3, %28 : vector<8x128xf32>
    %30 = vector.broadcast %27 : vector<8x1xf32> to vector<8x128xf32>
    %31 = arith.subf %3, %30 : vector<8x128xf32>
    %32 = arith.mulf %29, %31 : vector<8x128xf32>
    %cst_19 = arith.constant dense<0.000000e+00> : vector<8xf32>
    %33 = vector.multi_reduction <add>, %32, %cst_19 [1] : vector<8x128xf32> to vector<8xf32>
    %34 = vector.shape_cast %33 : vector<8xf32> to vector<8x1xf32>
    %cst_20 = arith.constant 0.000000e+00 : f32
    %35 = vector.broadcast %cst_20 : f32 to vector<8x1xf32>
    %36 = arith.addf %35, %34 : vector<8x1xf32>
    %37 = vector.broadcast %27 : vector<8x1xf32> to vector<8x128xf32>
    %38 = arith.subf %6, %37 : vector<8x128xf32>
    %39 = vector.broadcast %27 : vector<8x1xf32> to vector<8x128xf32>
    %40 = arith.subf %6, %39 : vector<8x128xf32>
    %41 = arith.mulf %38, %40 : vector<8x128xf32>
    %cst_21 = arith.constant dense<0.000000e+00> : vector<8xf32>
    %42 = vector.multi_reduction <add>, %41, %cst_21 [1] : vector<8x128xf32> to vector<8xf32>
    %43 = vector.shape_cast %42 : vector<8xf32> to vector<8x1xf32>
    %44 = arith.addf %36, %43 : vector<8x1xf32>
    %45 = vector.broadcast %27 : vector<8x1xf32> to vector<8x128xf32>
    %46 = arith.subf %9, %45 : vector<8x128xf32>
    %47 = vector.broadcast %27 : vector<8x1xf32> to vector<8x128xf32>
    %48 = arith.subf %9, %47 : vector<8x128xf32>
    %49 = arith.mulf %46, %48 : vector<8x128xf32>
    %cst_22 = arith.constant dense<0.000000e+00> : vector<8xf32>
    %50 = vector.multi_reduction <add>, %49, %cst_22 [1] : vector<8x128xf32> to vector<8xf32>
    %51 = vector.shape_cast %50 : vector<8xf32> to vector<8x1xf32>
    %52 = arith.addf %44, %51 : vector<8x1xf32>
    %53 = vector.broadcast %27 : vector<8x1xf32> to vector<8x128xf32>
    %54 = arith.subf %12, %53 : vector<8x128xf32>
    %55 = vector.broadcast %27 : vector<8x1xf32> to vector<8x128xf32>
    %56 = arith.subf %12, %55 : vector<8x128xf32>
    %57 = arith.mulf %54, %56 : vector<8x128xf32>
    %cst_23 = arith.constant dense<0.000000e+00> : vector<8xf32>
    %58 = vector.multi_reduction <add>, %57, %cst_23 [1] : vector<8x128xf32> to vector<8xf32>
    %59 = vector.shape_cast %58 : vector<8xf32> to vector<8x1xf32>
    %60 = arith.addf %52, %59 : vector<8x1xf32>
    %cst_24 = arith.constant 0.001953125 : f32
    %61 = vector.broadcast %cst_24 : f32 to vector<8x1xf32>
    %62 = arith.mulf %60, %61 : vector<8x1xf32>
    %c0_25 = arith.constant 0 : index
    %c0_26 = arith.constant 0 : index
    %63 = vector.load %arg2[%c0_25, %c0_26] : memref<8x1xf32, #tpu.memory_space<vmem>>, vector<8x1xf32>
    %cst_27 = arith.constant 9.99999974E-6 : f32
    %64 = vector.broadcast %cst_27 : f32 to vector<8x1xf32>
    %65 = arith.addf %62, %64 : vector<8x1xf32>
    %66 = math.rsqrt %65 : vector<8x1xf32>
    %67 = arith.mulf %63, %66 : vector<8x1xf32>
    %c0_28 = arith.constant 0 : index
    %c0_29 = arith.constant 0 : index
    %68 = vector.load %arg3[%c0_28, %c0_29] : memref<8x1xf32, #tpu.memory_space<vmem>>, vector<8x1xf32>
    %69 = arith.mulf %27, %67 : vector<8x1xf32>
    %70 = arith.subf %68, %69 : vector<8x1xf32>
    %71 = vector.broadcast %67 : vector<8x1xf32> to vector<8x128xf32>
    %72 = arith.mulf %3, %71 : vector<8x128xf32>
    %73 = vector.broadcast %70 : vector<8x1xf32> to vector<8x128xf32>
    %74 = arith.addf %72, %73 : vector<8x128xf32>
    %cst_30 = arith.constant 0.000000e+00 : f32
    %75 = vector.broadcast %cst_30 : f32 to vector<8x128xf32>
    %76 = arith.maximumf %74, %75 : vector<8x128xf32>
    %77 = arith.truncf %76 : vector<8x128xf32> to vector<8x128xbf16>
    %c0_31 = arith.constant 0 : index
    %c0_32 = arith.constant 0 : index
    %c0_33 = arith.constant 0 : index
    %78 = vector.load %arg4[%c0_31, %c0_32, %c0_33] : memref<4x8x128xbf16, #tpu.memory_space<vmem>>, vector<1x8x128xbf16>
    %79 = vector.shape_cast %78 : vector<1x8x128xbf16> to vector<8x128xbf16>
    %80 = vector.shape_cast %77 : vector<8x128xbf16> to vector<1x8x128xbf16>
    tpu.vector_store %arg4[%c0_31, %c0_32, %c0_33], %80 {strides = array<i32>} : memref<4x8x128xbf16, #tpu.memory_space<vmem>>, vector<1x8x128xbf16>,
    %81 = vector.broadcast %67 : vector<8x1xf32> to vector<8x128xf32>
    %82 = arith.mulf %6, %81 : vector<8x128xf32>
    %83 = vector.broadcast %70 : vector<8x1xf32> to vector<8x128xf32>
    %84 = arith.addf %82, %83 : vector<8x128xf32>
    %cst_34 = arith.constant 0.000000e+00 : f32
    %85 = vector.broadcast %cst_34 : f32 to vector<8x128xf32>
    %86 = arith.maximumf %84, %85 : vector<8x128xf32>
    %87 = arith.truncf %86 : vector<8x128xf32> to vector<8x128xbf16>
    %c1_35 = arith.constant 1 : index
    %c0_36 = arith.constant 0 : index
    %c0_37 = arith.constant 0 : index
    %88 = vector.load %arg4[%c1_35, %c0_36, %c0_37] : memref<4x8x128xbf16, #tpu.memory_space<vmem>>, vector<1x8x128xbf16>
    %89 = vector.shape_cast %88 : vector<1x8x128xbf16> to vector<8x128xbf16>
    %90 = vector.shape_cast %87 : vector<8x128xbf16> to vector<1x8x128xbf16>
    tpu.vector_store %arg4[%c1_35, %c0_36, %c0_37], %90 {strides = array<i32>} : memref<4x8x128xbf16, #tpu.memory_space<vmem>>, vector<1x8x128xbf16>,
    %91 = vector.broadcast %67 : vector<8x1xf32> to vector<8x128xf32>
    %92 = arith.mulf %9, %91 : vector<8x128xf32>
    %93 = vector.broadcast %70 : vector<8x1xf32> to vector<8x128xf32>
    %94 = arith.addf %92, %93 : vector<8x128xf32>
    %cst_38 = arith.constant 0.000000e+00 : f32
    %95 = vector.broadcast %cst_38 : f32 to vector<8x128xf32>
    %96 = arith.maximumf %94, %95 : vector<8x128xf32>
    %97 = arith.truncf %96 : vector<8x128xf32> to vector<8x128xbf16>
    %c2_39 = arith.constant 2 : index
    %c0_40 = arith.constant 0 : index
    %c0_41 = arith.constant 0 : index
    %98 = vector.load %arg4[%c2_39, %c0_40, %c0_41] : memref<4x8x128xbf16, #tpu.memory_space<vmem>>, vector<1x8x128xbf16>
    %99 = vector.shape_cast %98 : vector<1x8x128xbf16> to vector<8x128xbf16>
    %100 = vector.shape_cast %97 : vector<8x128xbf16> to vector<1x8x128xbf16>
    tpu.vector_store %arg4[%c2_39, %c0_40, %c0_41], %100 {strides = array<i32>} : memref<4x8x128xbf16, #tpu.memory_space<vmem>>, vector<1x8x128xbf16>,
    %101 = vector.broadcast %67 : vector<8x1xf32> to vector<8x128xf32>
    %102 = arith.mulf %12, %101 : vector<8x128xf32>
    %103 = vector.broadcast %70 : vector<8x1xf32> to vector<8x128xf32>
    %104 = arith.addf %102, %103 : vector<8x128xf32>
    %cst_42 = arith.constant 0.000000e+00 : f32
    %105 = vector.broadcast %cst_42 : f32 to vector<8x128xf32>
    %106 = arith.maximumf %104, %105 : vector<8x128xf32>
    %107 = arith.truncf %106 : vector<8x128xf32> to vector<8x128xbf16>
    %c3_43 = arith.constant 3 : index
    %c0_44 = arith.constant 0 : index
    %c0_45 = arith.constant 0 : index
    %108 = vector.load %arg4[%c3_43, %c0_44, %c0_45] : memref<4x8x128xbf16, #tpu.memory_space<vmem>>, vector<1x8x128xbf16>
    %109 = vector.shape_cast %108 : vector<1x8x128xbf16> to vector<8x128xbf16>
    %110 = vector.shape_cast %107 : vector<8x128xbf16> to vector<1x8x128xbf16>
    tpu.vector_store %arg4[%c3_43, %c0_44, %c0_45], %110 {strides = array<i32>} : memref<4x8x128xbf16, #tpu.memory_space<vmem>>, vector<1x8x128xbf16>,
    return
  }
}

module attributes {stable_mosaic.version = 11 : i64} {
  func.func @_convt_bn_relu_kernel(%arg0: memref<4x4x72xbf16, #tpu.memory_space<vmem>>, %arg1: memref<72x512xbf16, #tpu.memory_space<vmem>>, %arg2: memref<4x1xf32, #tpu.memory_space<vmem>>, %arg3: memref<4x1xf32, #tpu.memory_space<vmem>>, %arg4: memref<4x4x512xbf16, #tpu.memory_space<vmem>>) attributes {dimension_semantics = [], scalar_prefetch = 0 : i64, scratch_operands = 0 : i64, tpu.core_type = #tpu.core_type<tc>} {
    %c0 = arith.constant 0 : index
    %c0_0 = arith.constant 0 : index
    %0 = vector.load %arg1[%c0, %c0_0] : memref<72x512xbf16, #tpu.memory_space<vmem>>, vector<72x512xbf16>
    %c0_1 = arith.constant 0 : index
    %c0_2 = arith.constant 0 : index
    %c0_3 = arith.constant 0 : index
    %1 = vector.load %arg0[%c0_1, %c0_2, %c0_3] : memref<4x4x72xbf16, #tpu.memory_space<vmem>>, vector<1x4x72xbf16>
    %2 = vector.shape_cast %1 : vector<1x4x72xbf16> to vector<4x72xbf16>
    %cst = arith.constant dense<0.000000e+00> : vector<4x512xf32>
    %3 = tpu.matmul %2, %0, %cst {dimension_numbers = #tpu.dot_dimension_numbers<[1], [0], [0], [1], [0, 0, 1, 1], [], []>} : vector<4x72xbf16>, vector<72x512xbf16>, vector<4x512xf32> -> vector<4x512xf32>
    %c1 = arith.constant 1 : index
    %c0_4 = arith.constant 0 : index
    %c0_5 = arith.constant 0 : index
    %4 = vector.load %arg0[%c1, %c0_4, %c0_5] : memref<4x4x72xbf16, #tpu.memory_space<vmem>>, vector<1x4x72xbf16>
    %5 = vector.shape_cast %4 : vector<1x4x72xbf16> to vector<4x72xbf16>
    %cst_6 = arith.constant dense<0.000000e+00> : vector<4x512xf32>
    %6 = tpu.matmul %5, %0, %cst_6 {dimension_numbers = #tpu.dot_dimension_numbers<[1], [0], [0], [1], [0, 0, 1, 1], [], []>} : vector<4x72xbf16>, vector<72x512xbf16>, vector<4x512xf32> -> vector<4x512xf32>
    %c2 = arith.constant 2 : index
    %c0_7 = arith.constant 0 : index
    %c0_8 = arith.constant 0 : index
    %7 = vector.load %arg0[%c2, %c0_7, %c0_8] : memref<4x4x72xbf16, #tpu.memory_space<vmem>>, vector<1x4x72xbf16>
    %8 = vector.shape_cast %7 : vector<1x4x72xbf16> to vector<4x72xbf16>
    %cst_9 = arith.constant dense<0.000000e+00> : vector<4x512xf32>
    %9 = tpu.matmul %8, %0, %cst_9 {dimension_numbers = #tpu.dot_dimension_numbers<[1], [0], [0], [1], [0, 0, 1, 1], [], []>} : vector<4x72xbf16>, vector<72x512xbf16>, vector<4x512xf32> -> vector<4x512xf32>
    %c3 = arith.constant 3 : index
    %c0_10 = arith.constant 0 : index
    %c0_11 = arith.constant 0 : index
    %10 = vector.load %arg0[%c3, %c0_10, %c0_11] : memref<4x4x72xbf16, #tpu.memory_space<vmem>>, vector<1x4x72xbf16>
    %11 = vector.shape_cast %10 : vector<1x4x72xbf16> to vector<4x72xbf16>
    %cst_12 = arith.constant dense<0.000000e+00> : vector<4x512xf32>
    %12 = tpu.matmul %11, %0, %cst_12 {dimension_numbers = #tpu.dot_dimension_numbers<[1], [0], [0], [1], [0, 0, 1, 1], [], []>} : vector<4x72xbf16>, vector<72x512xbf16>, vector<4x512xf32> -> vector<4x512xf32>
    %cst_13 = arith.constant dense<0.000000e+00> : vector<4xf32>
    %13 = vector.multi_reduction <add>, %3, %cst_13 [1] : vector<4x512xf32> to vector<4xf32>
    %14 = vector.shape_cast %13 : vector<4xf32> to vector<4x1xf32>
    %cst_14 = arith.constant 0.000000e+00 : f32
    %15 = vector.broadcast %cst_14 : f32 to vector<4x1xf32>
    %16 = arith.addf %15, %14 : vector<4x1xf32>
    %cst_15 = arith.constant dense<0.000000e+00> : vector<4xf32>
    %17 = vector.multi_reduction <add>, %6, %cst_15 [1] : vector<4x512xf32> to vector<4xf32>
    %18 = vector.shape_cast %17 : vector<4xf32> to vector<4x1xf32>
    %19 = arith.addf %16, %18 : vector<4x1xf32>
    %cst_16 = arith.constant dense<0.000000e+00> : vector<4xf32>
    %20 = vector.multi_reduction <add>, %9, %cst_16 [1] : vector<4x512xf32> to vector<4xf32>
    %21 = vector.shape_cast %20 : vector<4xf32> to vector<4x1xf32>
    %22 = arith.addf %19, %21 : vector<4x1xf32>
    %cst_17 = arith.constant dense<0.000000e+00> : vector<4xf32>
    %23 = vector.multi_reduction <add>, %12, %cst_17 [1] : vector<4x512xf32> to vector<4xf32>
    %24 = vector.shape_cast %23 : vector<4xf32> to vector<4x1xf32>
    %25 = arith.addf %22, %24 : vector<4x1xf32>
    %cst_18 = arith.constant 4.8828125E-4 : f32
    %26 = vector.broadcast %cst_18 : f32 to vector<4x1xf32>
    %27 = arith.mulf %25, %26 : vector<4x1xf32>
    %28 = vector.broadcast %27 : vector<4x1xf32> to vector<4x512xf32>
    %29 = arith.subf %3, %28 : vector<4x512xf32>
    %30 = vector.broadcast %27 : vector<4x1xf32> to vector<4x512xf32>
    %31 = arith.subf %3, %30 : vector<4x512xf32>
    %32 = arith.mulf %29, %31 : vector<4x512xf32>
    %cst_19 = arith.constant dense<0.000000e+00> : vector<4xf32>
    %33 = vector.multi_reduction <add>, %32, %cst_19 [1] : vector<4x512xf32> to vector<4xf32>
    %34 = vector.shape_cast %33 : vector<4xf32> to vector<4x1xf32>
    %cst_20 = arith.constant 0.000000e+00 : f32
    %35 = vector.broadcast %cst_20 : f32 to vector<4x1xf32>
    %36 = arith.addf %35, %34 : vector<4x1xf32>
    %37 = vector.broadcast %27 : vector<4x1xf32> to vector<4x512xf32>
    %38 = arith.subf %6, %37 : vector<4x512xf32>
    %39 = vector.broadcast %27 : vector<4x1xf32> to vector<4x512xf32>
    %40 = arith.subf %6, %39 : vector<4x512xf32>
    %41 = arith.mulf %38, %40 : vector<4x512xf32>
    %cst_21 = arith.constant dense<0.000000e+00> : vector<4xf32>
    %42 = vector.multi_reduction <add>, %41, %cst_21 [1] : vector<4x512xf32> to vector<4xf32>
    %43 = vector.shape_cast %42 : vector<4xf32> to vector<4x1xf32>
    %44 = arith.addf %36, %43 : vector<4x1xf32>
    %45 = vector.broadcast %27 : vector<4x1xf32> to vector<4x512xf32>
    %46 = arith.subf %9, %45 : vector<4x512xf32>
    %47 = vector.broadcast %27 : vector<4x1xf32> to vector<4x512xf32>
    %48 = arith.subf %9, %47 : vector<4x512xf32>
    %49 = arith.mulf %46, %48 : vector<4x512xf32>
    %cst_22 = arith.constant dense<0.000000e+00> : vector<4xf32>
    %50 = vector.multi_reduction <add>, %49, %cst_22 [1] : vector<4x512xf32> to vector<4xf32>
    %51 = vector.shape_cast %50 : vector<4xf32> to vector<4x1xf32>
    %52 = arith.addf %44, %51 : vector<4x1xf32>
    %53 = vector.broadcast %27 : vector<4x1xf32> to vector<4x512xf32>
    %54 = arith.subf %12, %53 : vector<4x512xf32>
    %55 = vector.broadcast %27 : vector<4x1xf32> to vector<4x512xf32>
    %56 = arith.subf %12, %55 : vector<4x512xf32>
    %57 = arith.mulf %54, %56 : vector<4x512xf32>
    %cst_23 = arith.constant dense<0.000000e+00> : vector<4xf32>
    %58 = vector.multi_reduction <add>, %57, %cst_23 [1] : vector<4x512xf32> to vector<4xf32>
    %59 = vector.shape_cast %58 : vector<4xf32> to vector<4x1xf32>
    %60 = arith.addf %52, %59 : vector<4x1xf32>
    %cst_24 = arith.constant 4.8828125E-4 : f32
    %61 = vector.broadcast %cst_24 : f32 to vector<4x1xf32>
    %62 = arith.mulf %60, %61 : vector<4x1xf32>
    %c0_25 = arith.constant 0 : index
    %c0_26 = arith.constant 0 : index
    %63 = vector.load %arg2[%c0_25, %c0_26] : memref<4x1xf32, #tpu.memory_space<vmem>>, vector<4x1xf32>
    %cst_27 = arith.constant 9.99999974E-6 : f32
    %64 = vector.broadcast %cst_27 : f32 to vector<4x1xf32>
    %65 = arith.addf %62, %64 : vector<4x1xf32>
    %66 = math.rsqrt %65 : vector<4x1xf32>
    %67 = arith.mulf %63, %66 : vector<4x1xf32>
    %c0_28 = arith.constant 0 : index
    %c0_29 = arith.constant 0 : index
    %68 = vector.load %arg3[%c0_28, %c0_29] : memref<4x1xf32, #tpu.memory_space<vmem>>, vector<4x1xf32>
    %69 = arith.mulf %27, %67 : vector<4x1xf32>
    %70 = arith.subf %68, %69 : vector<4x1xf32>
    %71 = vector.broadcast %67 : vector<4x1xf32> to vector<4x512xf32>
    %72 = arith.mulf %3, %71 : vector<4x512xf32>
    %73 = vector.broadcast %70 : vector<4x1xf32> to vector<4x512xf32>
    %74 = arith.addf %72, %73 : vector<4x512xf32>
    %cst_30 = arith.constant 0.000000e+00 : f32
    %75 = vector.broadcast %cst_30 : f32 to vector<4x512xf32>
    %76 = arith.maximumf %74, %75 : vector<4x512xf32>
    %77 = arith.truncf %76 : vector<4x512xf32> to vector<4x512xbf16>
    %c0_31 = arith.constant 0 : index
    %c0_32 = arith.constant 0 : index
    %c0_33 = arith.constant 0 : index
    %78 = vector.load %arg4[%c0_31, %c0_32, %c0_33] : memref<4x4x512xbf16, #tpu.memory_space<vmem>>, vector<1x4x512xbf16>
    %79 = vector.shape_cast %78 : vector<1x4x512xbf16> to vector<4x512xbf16>
    %80 = vector.shape_cast %77 : vector<4x512xbf16> to vector<1x4x512xbf16>
    tpu.vector_store %arg4[%c0_31, %c0_32, %c0_33], %80 {strides = array<i32>} : memref<4x4x512xbf16, #tpu.memory_space<vmem>>, vector<1x4x512xbf16>,
    %81 = vector.broadcast %67 : vector<4x1xf32> to vector<4x512xf32>
    %82 = arith.mulf %6, %81 : vector<4x512xf32>
    %83 = vector.broadcast %70 : vector<4x1xf32> to vector<4x512xf32>
    %84 = arith.addf %82, %83 : vector<4x512xf32>
    %cst_34 = arith.constant 0.000000e+00 : f32
    %85 = vector.broadcast %cst_34 : f32 to vector<4x512xf32>
    %86 = arith.maximumf %84, %85 : vector<4x512xf32>
    %87 = arith.truncf %86 : vector<4x512xf32> to vector<4x512xbf16>
    %c1_35 = arith.constant 1 : index
    %c0_36 = arith.constant 0 : index
    %c0_37 = arith.constant 0 : index
    %88 = vector.load %arg4[%c1_35, %c0_36, %c0_37] : memref<4x4x512xbf16, #tpu.memory_space<vmem>>, vector<1x4x512xbf16>
    %89 = vector.shape_cast %88 : vector<1x4x512xbf16> to vector<4x512xbf16>
    %90 = vector.shape_cast %87 : vector<4x512xbf16> to vector<1x4x512xbf16>
    tpu.vector_store %arg4[%c1_35, %c0_36, %c0_37], %90 {strides = array<i32>} : memref<4x4x512xbf16, #tpu.memory_space<vmem>>, vector<1x4x512xbf16>,
    %91 = vector.broadcast %67 : vector<4x1xf32> to vector<4x512xf32>
    %92 = arith.mulf %9, %91 : vector<4x512xf32>
    %93 = vector.broadcast %70 : vector<4x1xf32> to vector<4x512xf32>
    %94 = arith.addf %92, %93 : vector<4x512xf32>
    %cst_38 = arith.constant 0.000000e+00 : f32
    %95 = vector.broadcast %cst_38 : f32 to vector<4x512xf32>
    %96 = arith.maximumf %94, %95 : vector<4x512xf32>
    %97 = arith.truncf %96 : vector<4x512xf32> to vector<4x512xbf16>
    %c2_39 = arith.constant 2 : index
    %c0_40 = arith.constant 0 : index
    %c0_41 = arith.constant 0 : index
    %98 = vector.load %arg4[%c2_39, %c0_40, %c0_41] : memref<4x4x512xbf16, #tpu.memory_space<vmem>>, vector<1x4x512xbf16>
    %99 = vector.shape_cast %98 : vector<1x4x512xbf16> to vector<4x512xbf16>
    %100 = vector.shape_cast %97 : vector<4x512xbf16> to vector<1x4x512xbf16>
    tpu.vector_store %arg4[%c2_39, %c0_40, %c0_41], %100 {strides = array<i32>} : memref<4x4x512xbf16, #tpu.memory_space<vmem>>, vector<1x4x512xbf16>,
    %101 = vector.broadcast %67 : vector<4x1xf32> to vector<4x512xf32>
    %102 = arith.mulf %12, %101 : vector<4x512xf32>
    %103 = vector.broadcast %70 : vector<4x1xf32> to vector<4x512xf32>
    %104 = arith.addf %102, %103 : vector<4x512xf32>
    %cst_42 = arith.constant 0.000000e+00 : f32
    %105 = vector.broadcast %cst_42 : f32 to vector<4x512xf32>
    %106 = arith.maximumf %104, %105 : vector<4x512xf32>
    %107 = arith.truncf %106 : vector<4x512xf32> to vector<4x512xbf16>
    %c3_43 = arith.constant 3 : index
    %c0_44 = arith.constant 0 : index
    %c0_45 = arith.constant 0 : index
    %108 = vector.load %arg4[%c3_43, %c0_44, %c0_45] : memref<4x4x512xbf16, #tpu.memory_space<vmem>>, vector<1x4x512xbf16>
    %109 = vector.shape_cast %108 : vector<1x4x512xbf16> to vector<4x512xbf16>
    %110 = vector.shape_cast %107 : vector<4x512xbf16> to vector<1x4x512xbf16>
    tpu.vector_store %arg4[%c3_43, %c0_44, %c0_45], %110 {strides = array<i32>} : memref<4x4x512xbf16, #tpu.memory_space<vmem>>, vector<1x4x512xbf16>,
    return
  }
}

module attributes {stable_mosaic.version = 11 : i64} {
  func.func @_convt_bias_tanh_kernel(%arg0: memref<4x3x36xbf16, #tpu.memory_space<vmem>>, %arg1: memref<36x2048xbf16, #tpu.memory_space<vmem>>, %arg2: memref<3x1xf32, #tpu.memory_space<vmem>>, %arg3: memref<4x3x2048xf32, #tpu.memory_space<vmem>>) attributes {dimension_semantics = [], scalar_prefetch = 0 : i64, scratch_operands = 0 : i64, tpu.core_type = #tpu.core_type<tc>} {
    %c0 = arith.constant 0 : index
    %c0_0 = arith.constant 0 : index
    %0 = vector.load %arg1[%c0, %c0_0] : memref<36x2048xbf16, #tpu.memory_space<vmem>>, vector<36x2048xbf16>
    %c0_1 = arith.constant 0 : index
    %c0_2 = arith.constant 0 : index
    %c0_3 = arith.constant 0 : index
    %1 = vector.load %arg0[%c0_1, %c0_2, %c0_3] : memref<4x3x36xbf16, #tpu.memory_space<vmem>>, vector<1x3x36xbf16>
    %2 = vector.shape_cast %1 : vector<1x3x36xbf16> to vector<3x36xbf16>
    %cst = arith.constant dense<0.000000e+00> : vector<3x2048xf32>
    %3 = tpu.matmul %2, %0, %cst {dimension_numbers = #tpu.dot_dimension_numbers<[1], [0], [0], [1], [0, 0, 1, 1], [], []>} : vector<3x36xbf16>, vector<36x2048xbf16>, vector<3x2048xf32> -> vector<3x2048xf32>
    %c0_4 = arith.constant 0 : index
    %c0_5 = arith.constant 0 : index
    %4 = vector.load %arg2[%c0_4, %c0_5] : memref<3x1xf32, #tpu.memory_space<vmem>>, vector<3x1xf32>
    %5 = vector.broadcast %4 : vector<3x1xf32> to vector<3x2048xf32>
    %6 = arith.addf %3, %5 : vector<3x2048xf32>
    %7 = math.tanh %6 : vector<3x2048xf32>
    %c0_6 = arith.constant 0 : index
    %c0_7 = arith.constant 0 : index
    %c0_8 = arith.constant 0 : index
    %8 = vector.load %arg3[%c0_6, %c0_7, %c0_8] : memref<4x3x2048xf32, #tpu.memory_space<vmem>>, vector<1x3x2048xf32>
    %9 = vector.shape_cast %8 : vector<1x3x2048xf32> to vector<3x2048xf32>
    %10 = vector.shape_cast %7 : vector<3x2048xf32> to vector<1x3x2048xf32>
    tpu.vector_store %arg3[%c0_6, %c0_7, %c0_8], %10 {strides = array<i32>} : memref<4x3x2048xf32, #tpu.memory_space<vmem>>, vector<1x3x2048xf32>,
    %c1 = arith.constant 1 : index
    %c0_9 = arith.constant 0 : index
    %c0_10 = arith.constant 0 : index
    %11 = vector.load %arg0[%c1, %c0_9, %c0_10] : memref<4x3x36xbf16, #tpu.memory_space<vmem>>, vector<1x3x36xbf16>
    %12 = vector.shape_cast %11 : vector<1x3x36xbf16> to vector<3x36xbf16>
    %cst_11 = arith.constant dense<0.000000e+00> : vector<3x2048xf32>
    %13 = tpu.matmul %12, %0, %cst_11 {dimension_numbers = #tpu.dot_dimension_numbers<[1], [0], [0], [1], [0, 0, 1, 1], [], []>} : vector<3x36xbf16>, vector<36x2048xbf16>, vector<3x2048xf32> -> vector<3x2048xf32>
    %c0_12 = arith.constant 0 : index
    %c0_13 = arith.constant 0 : index
    %14 = vector.load %arg2[%c0_12, %c0_13] : memref<3x1xf32, #tpu.memory_space<vmem>>, vector<3x1xf32>
    %15 = vector.broadcast %14 : vector<3x1xf32> to vector<3x2048xf32>
    %16 = arith.addf %13, %15 : vector<3x2048xf32>
    %17 = math.tanh %16 : vector<3x2048xf32>
    %c1_14 = arith.constant 1 : index
    %c0_15 = arith.constant 0 : index
    %c0_16 = arith.constant 0 : index
    %18 = vector.load %arg3[%c1_14, %c0_15, %c0_16] : memref<4x3x2048xf32, #tpu.memory_space<vmem>>, vector<1x3x2048xf32>
    %19 = vector.shape_cast %18 : vector<1x3x2048xf32> to vector<3x2048xf32>
    %20 = vector.shape_cast %17 : vector<3x2048xf32> to vector<1x3x2048xf32>
    tpu.vector_store %arg3[%c1_14, %c0_15, %c0_16], %20 {strides = array<i32>} : memref<4x3x2048xf32, #tpu.memory_space<vmem>>, vector<1x3x2048xf32>,
    %c2 = arith.constant 2 : index
    %c0_17 = arith.constant 0 : index
    %c0_18 = arith.constant 0 : index
    %21 = vector.load %arg0[%c2, %c0_17, %c0_18] : memref<4x3x36xbf16, #tpu.memory_space<vmem>>, vector<1x3x36xbf16>
    %22 = vector.shape_cast %21 : vector<1x3x36xbf16> to vector<3x36xbf16>
    %cst_19 = arith.constant dense<0.000000e+00> : vector<3x2048xf32>
    %23 = tpu.matmul %22, %0, %cst_19 {dimension_numbers = #tpu.dot_dimension_numbers<[1], [0], [0], [1], [0, 0, 1, 1], [], []>} : vector<3x36xbf16>, vector<36x2048xbf16>, vector<3x2048xf32> -> vector<3x2048xf32>
    %c0_20 = arith.constant 0 : index
    %c0_21 = arith.constant 0 : index
    %24 = vector.load %arg2[%c0_20, %c0_21] : memref<3x1xf32, #tpu.memory_space<vmem>>, vector<3x1xf32>
    %25 = vector.broadcast %24 : vector<3x1xf32> to vector<3x2048xf32>
    %26 = arith.addf %23, %25 : vector<3x2048xf32>
    %27 = math.tanh %26 : vector<3x2048xf32>
    %c2_22 = arith.constant 2 : index
    %c0_23 = arith.constant 0 : index
    %c0_24 = arith.constant 0 : index
    %28 = vector.load %arg3[%c2_22, %c0_23, %c0_24] : memref<4x3x2048xf32, #tpu.memory_space<vmem>>, vector<1x3x2048xf32>
    %29 = vector.shape_cast %28 : vector<1x3x2048xf32> to vector<3x2048xf32>
    %30 = vector.shape_cast %27 : vector<3x2048xf32> to vector<1x3x2048xf32>
    tpu.vector_store %arg3[%c2_22, %c0_23, %c0_24], %30 {strides = array<i32>} : memref<4x3x2048xf32, #tpu.memory_space<vmem>>, vector<1x3x2048xf32>,
    %c3 = arith.constant 3 : index
    %c0_25 = arith.constant 0 : index
    %c0_26 = arith.constant 0 : index
    %31 = vector.load %arg0[%c3, %c0_25, %c0_26] : memref<4x3x36xbf16, #tpu.memory_space<vmem>>, vector<1x3x36xbf16>
    %32 = vector.shape_cast %31 : vector<1x3x36xbf16> to vector<3x36xbf16>
    %cst_27 = arith.constant dense<0.000000e+00> : vector<3x2048xf32>
    %33 = tpu.matmul %32, %0, %cst_27 {dimension_numbers = #tpu.dot_dimension_numbers<[1], [0], [0], [1], [0, 0, 1, 1], [], []>} : vector<3x36xbf16>, vector<36x2048xbf16>, vector<3x2048xf32> -> vector<3x2048xf32>
    %c0_28 = arith.constant 0 : index
    %c0_29 = arith.constant 0 : index
    %34 = vector.load %arg2[%c0_28, %c0_29] : memref<3x1xf32, #tpu.memory_space<vmem>>, vector<3x1xf32>
    %35 = vector.broadcast %34 : vector<3x1xf32> to vector<3x2048xf32>
    %36 = arith.addf %33, %35 : vector<3x2048xf32>
    %37 = math.tanh %36 : vector<3x2048xf32>
    %c3_30 = arith.constant 3 : index
    %c0_31 = arith.constant 0 : index
    %c0_32 = arith.constant 0 : index
    %38 = vector.load %arg3[%c3_30, %c0_31, %c0_32] : memref<4x3x2048xf32, #tpu.memory_space<vmem>>, vector<1x3x2048xf32>
    %39 = vector.shape_cast %38 : vector<1x3x2048xf32> to vector<3x2048xf32>
    %40 = vector.shape_cast %37 : vector<3x2048xf32> to vector<1x3x2048xf32>
    tpu.vector_store %arg3[%c3_30, %c0_31, %c0_32], %40 {strides = array<i32>} : memref<4x3x2048xf32, #tpu.memory_space<vmem>>, vector<1x3x2048xf32>,
    return
  }
}

</mosaic_0001>

<bundles_post_ra>
// kernel: _lambda_.6
= control target key start
LH: loop header
LB: loop body
LE: loop exit
PB: predicated region body
PF: predicated region fallthrough
CT: control target
= control target key end

     0   :  { %9 = vsyncpa [#allocation3], 0  ;;  %s1466_s15 = smov [#allocation2]   ;;  %s2000_s0 = inlined_call_operand.hbm [shape: bf16[4,64,32], index: 0, kind: input, shape index: {}]   ;;  %s2001_s1 = inlined_call_operand.vmem [shape: bf16[32,2], index: 1, kind: input, shape index: {}]   ;;  %s2002_s2 = inlined_call_operand.vmem [shape: f32[64,1], index: 2, kind: input, shape index: {}]   ;;  %s2003_s3 = inlined_call_operand.vmem [shape: f32[64,1], index: 3, kind: input, shape index: {}]   ;;  %s2004_s4 = inlined_call_operand.vmem [shape: bf16[4,64,2], index: 4, kind: output, shape index: {}]  }
   0x1   :  { %s15_s16 = sshll.u32 %s1466_s15, 4  ;;  %s16_s16 = int_to_ptr.vmem [resolvable:$true] %s15_s16 }
   0x2   :  { %s1452_s17 = scalar_lea.vmem %s16_s16, 2048  ;;  %p1457_p1 = scmp.lt.s32.totalorder %s16_s16, %s16_s16 }
   0x3   :  { %p1453_p0 = scmp.ne.s32.totalorder %s16_s16, %s1452_s17  ;;  %p1458_p2 = scmp.lt.s32.totalorder %s1452_s17, %s1452_s17 }
   0x5   :  { %p1459_p3 = por %p1458_p2, %p1457_p1 }
   0x7   :  { %p1460_p4 = pnand %p1459_p3, %p1453_p0 }
   0x9   :  { %1463 = shalt.err (!%p1460_p4)
}
   0xa   :  { %s1467_s18 = smov 64   ;;  %s1468_s19 = smov 4  }
   0xb   :  { %21 = dma.hbm_to_vmem [thread:$0]  %s2000_s0, 2048, %s16_s16, [#allocation3], %s1467_s18, %s1467_s18, %s1468_s19  }
   0xc   :  { %1464 = dma.done.wait [#allocation3], 2048  }
   0xd   :  { %1465 = vsyncadd [#allocation3], 4294965248  ;;  %v1410_v0 = vld [vmem:[%s2001_s1 + $0x8] sm:$0xff]   ;;  %v1411_v1 = vld [vmem:[%s2001_s1] sm:$0xff]   ;;  %vm76_vm0 = vcmask 261120   ;;  %vm472_vm1 = vcmask 15360  }
   0xe   :  { %1356 = vmatprep.subr.bf16.mxu0 %v1410_v0  ;;  %1368 = vmatprep.subr.bf16.mxu1 %v1410_v0  ;;  %v1412_v2 = vld [vmem:[#allocation2] sm:$0xff]   ;;  %v1414_v4 = vld [vmem:[#allocation2 + $0x8] sm:$0xff]   ;;  %v1416_v6 = vld [vmem:[#allocation2 + $0x10] sm:$0xff]   ;;  %vm1001_vm2 = vcmask 11264  }
   0xf   :  { %1357 = vmatpush3.bf16.msra.mxu0 %v1410_v0  ;;  %1369 = vmatpush3.bf16.msra.mxu1 %v1410_v0  ;;  %v1413_v3 = vld [vmem:[#allocation2 + $0x20] sm:$0xff]   ;;  %v1415_v5 = vld [vmem:[#allocation2 + $0x28] sm:$0xff]   ;;  %v1418_v7 = vld [vmem:[#allocation2 + $0x30] sm:$0xff]  }
  0x10   :  { %1358 = vmatprep.subr.bf16.mxu0 %v1411_v1  ;;  %1370 = vmatprep.subr.bf16.mxu1 %v1411_v1  ;;  %v1417_v8 = vld [vmem:[#allocation2 + $0x18] sm:$0xff]   ;;  %v1420_v10 = vld [vmem:[#allocation2 + $0x40] sm:$0xff]   ;;  %v1421_v12 = vld [vmem:[#allocation2 + $0x48] sm:$0xff]  }
  0x11   :  { %1360 = vmatprep.mubr.msk.bf16.mxu0 %vm76_vm0, %v1412_v2  ;;  %1372 = vmatprep.mubr.msk.bf16.mxu1 %vm76_vm0, %v1413_v3  ;;  %v1419_v9 = vld [vmem:[#allocation2 + $0x38] sm:$0xff]   ;;  %v1422_v11 = vld [vmem:[#allocation2 + $0x60] sm:$0xff]   ;;  %v1423_v13 = vld [vmem:[#allocation2 + $0x68] sm:$0xff]  }
  0x12   :  { %v1424_v14 = vld [vmem:[#allocation2 + $0x50] sm:$0xff]   ;;  %v1425_v16 = vld [vmem:[#allocation2 + $0x58] sm:$0xff]  }
  0x13   :  { %1359 = vmatpush3.bf16.msra.mxu0 %v1411_v1  ;;  %1371 = vmatpush3.bf16.msra.mxu1 %v1411_v1  ;;  %v1426_v15 = vld [vmem:[#allocation2 + $0x70] sm:$0xff]   ;;  %v1427_v17 = vld [vmem:[#allocation2 + $0x78] sm:$0xff]  }
  0x14   :  { %1380 = vmatprep.subr.bf16.mxu0 %v1410_v0  ;;  %1392 = vmatprep.subr.bf16.mxu1 %v1410_v0 }
  0x16   :  { %1361 = vmatmul.mubr.msk.bf16.vlgmr.msra.gmra.mxu0 %vm76_vm0, %v1414_v4  ;;  %1373 = vmatmul.mubr.msk.bf16.vlgmr.msra.gmra.mxu1 %vm76_vm0, %v1415_v5 }
  0x17   :  { %1364 = vmatprep.mubr.msk.bf16.mxu0 %vm76_vm0, %v1416_v6  ;;  %1376 = vmatprep.mubr.msk.bf16.mxu1 %vm76_vm0, %v1418_v7 }
  0x18   :  { %1381 = vmatpush3.bf16.msra.mxu0 %v1410_v0  ;;  %1393 = vmatpush3.bf16.msra.mxu1 %v1410_v0 }
  0x19   :  { %1382 = vmatprep.subr.bf16.mxu0 %v1411_v1  ;;  %1394 = vmatprep.subr.bf16.mxu1 %v1411_v1 }
  0x1c   :  { %1383 = vmatpush3.bf16.msra.mxu0 %v1411_v1  ;;  %1395 = vmatpush3.bf16.msra.mxu1 %v1411_v1 }
  0x1e   :  { %1365 = vmatmul.mubr.msk.bf16.gmra.mxu0 %vm76_vm0, %v1417_v8  ;;  %1377 = vmatmul.mubr.msk.bf16.gmra.mxu1 %vm76_vm0, %v1419_v9 }
  0x1f   :  { %1384 = vmatprep.mubr.msk.bf16.mxu0 %vm76_vm0, %v1420_v10  ;;  %1396 = vmatprep.mubr.msk.bf16.mxu1 %vm76_vm0, %v1422_v11 }
  0x26   :  { %1385 = vmatmul.mubr.msk.bf16.vlgmr.msra.gmra.mxu0 %vm76_vm0, %v1421_v12  ;;  %1397 = vmatmul.mubr.msk.bf16.vlgmr.msra.gmra.mxu1 %vm76_vm0, %v1423_v13 }
  0x27   :  { %1388 = vmatprep.mubr.msk.bf16.mxu0 %vm76_vm0, %v1424_v14  ;;  %1400 = vmatprep.mubr.msk.bf16.mxu1 %vm76_vm0, %v1426_v15 }
  0x2e   :  { %1389 = vmatmul.mubr.msk.bf16.gmra.mxu0 %vm76_vm0, %v1425_v16  ;;  %1401 = vmatmul.mubr.msk.bf16.gmra.mxu1 %vm76_vm0, %v1427_v17 }
  0xd6   :  { %v1520_v18 = vpop.f32.mrf.mxu0  ;;  %v1522_v19 = vpop.f32.mrf.mxu1 }
  0xd7   :  { %v511_v20 = vsel %vm472_vm1, %v1522_v19, 0.0  ;;  %v479_v21 = vsel %vm472_vm1, %v1520_v18, 0.0 }
  0xd8   :  { %512 = vadd.xlane.f32.xlu0 %v511_v20  ;;  %v1528_v22 = vpop.f32.mrf.mxu1  ;;  %480 = vadd.xlane.f32.xlu1 %v479_v21  ;;  %v1530_v23 = vpop.f32.mrf.mxu0 }
  0xd9   :  { %v473_v26 = vsel %vm472_vm1, %v1530_v23, 0.0  ;;  %v505_v31 = vsel %vm472_vm1, %v1528_v22, 0.0 }
  0xda   :  { %v1532_v24 = vpop.f32.mrf.mxu0  ;;  %v1534_v25 = vpop.f32.mrf.mxu1 }
  0xdb   :  { %v482_v27 = vsel %vm472_vm1, %v1532_v24, 0.0  ;;  %v514_v32 = vsel %vm472_vm1, %v1534_v25, 0.0 }
  0xdc   :  { %474 = vadd.xlane.f32.xlu0 %v473_v26  ;;  %483 = vadd.xlane.f32.xlu1 %v482_v27  ;;  %v1540_v28 = vpop.f32.mrf.mxu0  ;;  %v1542_v29 = vpop.f32.mrf.mxu1 }
  0xdd   :  { %2011 = vst [vmem:[#allocation5_spill] sm:$0xff] %v1540_v28  ;;  %2012 = vst [vmem:[#allocation6_spill] sm:$0xff] %v1542_v29  ;;  %v508_v35 = vsel %vm472_vm1, %v1542_v29, 0.0  ;;  %v476_v36 = vsel %vm472_vm1, %v1540_v28, 0.0 }
  0xde   :  { %v1544_v30 = vpop.f32.mrf.mxu0  ;;  %v1552_v34 = vpop.f32.mrf.mxu1 }
  0xdf   :  { %v491_v39 = vsel %vm472_vm1, %v1544_v30, 0.0  ;;  %v523_v42 = vsel %vm472_vm1, %v1552_v34, 0.0 }
  0xe0   :  { %506 = vadd.xlane.f32.xlu0 %v505_v31  ;;  %515 = vadd.xlane.f32.xlu1 %v514_v32  ;;  %v1550_v33 = vpop.f32.mrf.mxu0  ;;  %v1560_v38 = vpop.f32.mrf.mxu1 }
  0xe1   :  { %v485_v47 = vsel %vm472_vm1, %v1550_v33, 0.0  ;;  %v517_v51 = vsel %vm472_vm1, %v1560_v38, 0.0 }
  0xe2   :  { %v1558_v37 = vpop.f32.mrf.mxu0  ;;  %v1566_v41 = vpop.f32.mrf.mxu1 }
  0xe3   :  { %v494_v40 = vsel %vm472_vm1, %v1558_v37, 0.0  ;;  %v526_v43 = vsel %vm472_vm1, %v1566_v41, 0.0 }
  0xe4   :  { %509 = vadd.xlane.f32.xlu1 %v508_v35  ;;  %477 = vadd.xlane.f32.xlu0 %v476_v36  ;;  %v1572_v44 = vpop.f32.mrf.mxu0  ;;  %v1576_v46 = vpop.f32.mrf.mxu1 }
  0xe5   :  { %v488_v48 = vsel %vm472_vm1, %v1572_v44, 0.0  ;;  %v520_v52 = vsel %vm472_vm1, %v1576_v46, 0.0 }
  0xe6   :  { %v1574_v45 = vpop.f32.mrf.mxu0  ;;  %v1584_v50 = vpop.f32.mrf.mxu1 }
  0xe7   :  { %v543_v55 = vsel %vm472_vm1, %v1574_v45, 0.0  ;;  %v575_v59 = vsel %vm472_vm1, %v1584_v50, 0.0 }
  0xe8   :  { %492 = vadd.xlane.f32.xlu0 %v491_v39  ;;  %495 = vadd.xlane.f32.xlu1 %v494_v40  ;;  %v1582_v49 = vpop.f32.mrf.mxu0  ;;  %v1592_v54 = vpop.f32.mrf.mxu1 }
  0xe9   :  { %v537_v1 = vsel %vm472_vm1, %v1582_v49, 0.0  ;;  %v569_v5 = vsel %vm472_vm1, %v1592_v54, 0.0 }
  0xea   :  { %v1590_v53 = vpop.f32.mrf.mxu0  ;;  %v1600_v58 = vpop.f32.mrf.mxu1 }
  0xeb   :  { %v546_v56 = vsel %vm472_vm1, %v1590_v53, 0.0  ;;  %v578_v60 = vsel %vm472_vm1, %v1600_v58, 0.0 }
  0xec   :  { %524 = vadd.xlane.f32.xlu0 %v523_v42  ;;  %527 = vadd.xlane.f32.xlu1 %v526_v43  ;;  %v1598_v57 = vpop.f32.mrf.mxu0  ;;  %v1608_v62 = vpop.f32.mrf.mxu1 }
  0xed   :  { %v540_v2 = vsel %vm472_vm1, %v1598_v57, 0.0  ;;  %v572_v6 = vsel %vm472_vm1, %v1608_v62, 0.0 }
  0xee   :  { %v1606_v61 = vpop.f32.mrf.mxu0  ;;  %v1612_v0 = vpop.f32.mrf.mxu1 }
  0xef   :  { %v555_v7 = vsel %vm472_vm1, %v1606_v61, 0.0  ;;  %v587_v16 = vsel %vm472_vm1, %v1612_v0, 0.0 }
  0xf0   :  { %486 = vadd.xlane.f32.xlu0 %v485_v47  ;;  %489 = vadd.xlane.f32.xlu1 %v488_v48  ;;  %v1610_v63 = vpop.f32.mrf.mxu0  ;;  %v1620_v4 = vpop.f32.mrf.mxu1 }
  0xf1   :  { %v549_v11 = vsel %vm472_vm1, %v1610_v63, 0.0  ;;  %v581_v14 = vsel %vm472_vm1, %v1620_v4, 0.0 }
  0xf2   :  { %v1618_v3 = vpop.f32.mrf.mxu0  ;;  %v1632_v10 = vpop.f32.mrf.mxu1 }
  0xf3   :  { %v558_v8 = vsel %vm472_vm1, %v1618_v3, 0.0  ;;  %2014 = vst [vmem:[#allocation8_spill] sm:$0xff] %v1632_v10  ;;  %v590_v17 = vsel %vm472_vm1, %v1632_v10, 0.0 }
  0xf4   :  { %518 = vadd.xlane.f32.xlu0 %v517_v51  ;;  %521 = vadd.xlane.f32.xlu1 %v520_v52  ;;  %v1630_v9 = vpop.f32.mrf.mxu0  ;;  %v1638_v13 = vpop.f32.mrf.mxu1 }
  0xf5   :  { %2013 = vst [vmem:[#allocation7_spill] sm:$0xff] %v1630_v9  ;;  %v552_v12 = vsel %vm472_vm1, %v1630_v9, 0.0  ;;  %2015 = vst [vmem:[#allocation9_spill] sm:$0xff] %v1638_v13  ;;  %v584_v15 = vsel %vm472_vm1, %v1638_v13, 0.0 }
  0xf8   :  { %544 = vadd.xlane.f32.xlu0 %v543_v55  ;;  %547 = vadd.xlane.f32.xlu1 %v546_v56 }
  0xfc   :  { %576 = vadd.xlane.f32.xlu0 %v575_v59  ;;  %579 = vadd.xlane.f32.xlu1 %v578_v60 }
 0x100   :  { %538 = vadd.xlane.f32.xlu0 %v537_v1  ;;  %541 = vadd.xlane.f32.xlu1 %v540_v2 }
 0x104   :  { %570 = vadd.xlane.f32.xlu0 %v569_v5  ;;  %573 = vadd.xlane.f32.xlu1 %v572_v6 }
 0x108   :  { %556 = vadd.xlane.f32.xlu0 %v555_v7  ;;  %559 = vadd.xlane.f32.xlu1 %v558_v8 }
 0x10c   :  { %550 = vadd.xlane.f32.xlu0 %v549_v11  ;;  %553 = vadd.xlane.f32.xlu1 %v552_v12 }
 0x110   :  { %582 = vadd.xlane.f32.xlu0 %v581_v14  ;;  %585 = vadd.xlane.f32.xlu1 %v584_v15 }
 0x114   :  { %588 = vadd.xlane.f32.xlu0 %v587_v16  ;;  %591 = vadd.xlane.f32.xlu1 %v590_v17 }
 0x161   :  { %v513_v20 = vpop.xlane.xlu0 %512  ;;  %v481_v21 = vpop.xlane.xlu1 %480 }
 0x162   :  { %v531_v59 = vadd.f32 %v513_v20, %v481_v21 }
 0x165   :  { %v475_v26 = vpop.xlane.xlu0 %474  ;;  %v484_v27 = vpop.xlane.xlu1 %483 }
 0x169   :  { %v507_v31 = vpop.xlane.xlu0 %506  ;;  %v516_v32 = vpop.xlane.xlu1 %515 }
 0x16a   :  { %v532_v60 = vadd.f32 %v516_v32, %v484_v27  ;;  %v529_v16 = vadd.f32 %v507_v31, %v475_v26 }
 0x16d   :  { %v510_v35 = vpop.xlane.xlu1 %509  ;;  %v478_v36 = vpop.xlane.xlu0 %477 }
 0x16e   :  { %v530_v17 = vadd.f32 %v510_v35, %v478_v36 }
 0x171   :  { %v1648_v39 = vpop.xlane.xlu0 %492  ;;  %v1650_v40 = vpop.xlane.xlu1 %495 }
 0x175   :  { %v1652_v42 = vpop.xlane.xlu0 %524  ;;  %v1654_v43 = vpop.xlane.xlu1 %527 }
 0x179   :  { %v1656_v47 = vpop.xlane.xlu0 %486  ;;  %v1658_v48 = vpop.xlane.xlu1 %489 }
 0x17d   :  { %v1660_v51 = vpop.xlane.xlu0 %518  ;;  %v1662_v52 = vpop.xlane.xlu1 %521 }
 0x181   :  { %v545_v55 = vpop.xlane.xlu0 %544  ;;  %v548_v56 = vpop.xlane.xlu1 %547 }
 0x182   :  { %v563_v1 = vadd.f32 %v545_v55, %v531_v59  ;;  %v564_v2 = vadd.f32 %v548_v56, %v532_v60 }
 0x185   :  { %v577_v5 = vpop.xlane.xlu0 %576  ;;  %v580_v6 = vpop.xlane.xlu1 %579 }
 0x186   :  { %v595_v7 = vadd.f32 %v577_v5, %v563_v1  ;;  %v596_v8 = vadd.f32 %v580_v6, %v564_v2 }
 0x188   :  { %v1664_v11 = vmul.f32 0.125, %v595_v7  ;;  %v1666_v12 = vmul.f32 0.125, %v596_v8 }
 0x189   :  { %v539_v14 = vpop.xlane.xlu0 %538  ;;  %v542_v15 = vpop.xlane.xlu1 %541 }
 0x18a   :  { %v611_v10 = vsub.f32 %v1520_v18, %v1664_v11  ;;  %v612_v20 = vsub.f32 %v1532_v24, %v1666_v12  ;;  %v659_v21 = vsub.f32 %v1522_v19, %v1664_v11  ;;  %v660_v27 = vsub.f32 %v1534_v25, %v1666_v12 }
 0x18b   :  { %v561_v32 = vadd.f32 %v539_v14, %v529_v16  ;;  %v562_v55 = vadd.f32 %v542_v15, %v530_v17  ;;  %v707_v35 = vsub.f32 %v1574_v45, %v1664_v11  ;;  %v708_v36 = vsub.f32 %v1590_v53, %v1666_v12 }
 0x18c   :  { %v619_v56 = vmul.f32 %v611_v10, %v611_v10  ;;  %v620_v59 = vmul.f32 %v612_v20, %v612_v20  ;;  %v667_v26 = vmul.f32 %v659_v21, %v659_v21  ;;  %v668_v31 = vmul.f32 %v660_v27, %v660_v27 }
 0x18d   :  { %v571_v60 = vpop.xlane.xlu0 %570  ;;  %v574_v1 = vpop.xlane.xlu1 %573  ;;  %v715_v14 = vmul.f32 %v707_v35, %v707_v35  ;;  %v716_v15 = vmul.f32 %v708_v36, %v708_v36  ;;  %v755_v16 = vsub.f32 %v1584_v50, %v1664_v11  ;;  %v756_v17 = vsub.f32 %v1600_v58, %v1666_v12 }
 0x18e   :  { %v593_v2 = vadd.f32 %v571_v60, %v561_v32  ;;  %v594_v5 = vadd.f32 %v574_v1, %v562_v55  ;;  %v631_v6 = vsel %vm472_vm1, %v619_v56, 0.0  ;;  %v634_v7 = vsel %vm472_vm1, %v620_v59, 0.0 }
 0x18f   :  { %632 = vadd.xlane.f32.xlu0 %v631_v6  ;;  %635 = vadd.xlane.f32.xlu1 %v634_v7  ;;  %v679_v27 = vsel %vm472_vm1, %v667_v26, 0.0  ;;  %v682_v32 = vsel %vm472_vm1, %v668_v31, 0.0  ;;  %v727_v59 = vsel %vm472_vm1, %v715_v14, 0.0  ;;  %v730_v60 = vsel %vm472_vm1, %v716_v15, 0.0 }
 0x190   :  { %v1686_v20 = vmul.f32 0.125, %v593_v2  ;;  %v1688_v21 = vmul.f32 0.125, %v594_v5  ;;  %v763_v1 = vmul.f32 %v755_v16, %v755_v16  ;;  %v764_v35 = vmul.f32 %v756_v17, %v756_v17 }
 0x191   :  { %v557_v10 = vpop.xlane.xlu0 %556  ;;  %v560_v8 = vpop.xlane.xlu1 %559  ;;  %v535_v26 = vadd.f32 %v1652_v42, %v1648_v39  ;;  %v536_v31 = vadd.f32 %v1654_v43, %v1650_v40 }
 0x192   :  { %v609_v36 = vsub.f32 %v1530_v23, %v1686_v20  ;;  %v610_v2 = vsub.f32 %v1540_v28, %v1688_v21  ;;  %v657_v7 = vsub.f32 %v1528_v22, %v1686_v20  ;;  %v658_v14 = vsub.f32 %v1542_v29, %v1688_v21 }
 0x193   :  { %680 = vadd.xlane.f32.xlu0 %v679_v27  ;;  %683 = vadd.xlane.f32.xlu1 %v682_v32  ;;  %v775_v15 = vsel %vm472_vm1, %v763_v1, 0.0  ;;  %v778_v16 = vsel %vm472_vm1, %v764_v35, 0.0  ;;  %v567_v39 = vadd.f32 %v557_v10, %v535_v26  ;;  %v568_v42 = vadd.f32 %v560_v8, %v536_v31 }
 0x194   :  { %v617_v17 = vmul.f32 %v609_v36, %v609_v36  ;;  %v618_v27 = vmul.f32 %v610_v2, %v610_v2  ;;  %v665_v43 = vmul.f32 %v657_v7, %v657_v7  ;;  %v706_v29 = vsub.f32 %v1598_v57, %v1688_v21 }
 0x195   :  { %v551_v55 = vpop.xlane.xlu0 %550  ;;  %v554_v56 = vpop.xlane.xlu1 %553  ;;  %v753_v2 = vsub.f32 %v1592_v54, %v1686_v20  ;;  %v754_v26 = vsub.f32 %v1608_v62, %v1688_v21 }
 0x196   :  { %v625_v35 = vsel %vm472_vm1, %v617_v17, 0.0  ;;  %v628_v36 = vsel %vm472_vm1, %v618_v27, 0.0  ;;  %v673_v10 = vsel %vm472_vm1, %v665_v43, 0.0  ;;  %v534_v17 = vadd.f32 %v1662_v52, %v1658_v48 }
 0x197   :  { %728 = vadd.xlane.f32.xlu0 %v727_v59  ;;  %731 = vadd.xlane.f32.xlu1 %v730_v60  ;;  %v666_v59 = vmul.f32 %v658_v14, %v658_v14  ;;  %v705_v60 = vsub.f32 %v1582_v49, %v1686_v20  ;;  %v761_v27 = vmul.f32 %v753_v2, %v753_v2 }
 0x198   :  { %v566_v43 = vadd.f32 %v554_v56, %v534_v17 }
 0x199   :  { %v583_v5 = vpop.xlane.xlu0 %582  ;;  %v586_v6 = vpop.xlane.xlu1 %585  ;;  %v713_v8 = vmul.f32 %v705_v60, %v705_v60  ;;  %v676_v14 = vsel %vm472_vm1, %v666_v59, 0.0  ;;  %v769_v48 = vsel %vm472_vm1, %v761_v27, 0.0 }
 0x19b   :  { %776 = vadd.xlane.f32.xlu0 %v775_v15  ;;  %779 = vadd.xlane.f32.xlu1 %v778_v16  ;;  %v714_v15 = vmul.f32 %v706_v29, %v706_v29  ;;  %v533_v16 = vadd.f32 %v1660_v51, %v1656_v47  ;;  %v598_v51 = vadd.f32 %v586_v6, %v566_v43 }
 0x19d   :  { %v589_v32 = vpop.xlane.xlu0 %588  ;;  %v592_v40 = vpop.xlane.xlu1 %591  ;;  %v1742_v56 = vmul.f32 0.125, %v598_v51 }
 0x19e   :  { %v599_v28 = vadd.f32 %v589_v32, %v567_v39  ;;  %v600_v1 = vadd.f32 %v592_v40, %v568_v42  ;;  %v762_v39 = vmul.f32 %v754_v26, %v754_v26  ;;  %v721_v42 = vsel %vm472_vm1, %v713_v8, 0.0 }
 0x19f   :  { %626 = vadd.xlane.f32.xlu0 %v625_v35  ;;  %629 = vadd.xlane.f32.xlu1 %v628_v36  ;;  %v565_v40 = vadd.f32 %v551_v55, %v533_v16 }
 0x1a0   :  { %v1719_v31 = vmul.f32 0.125, %v599_v28  ;;  %v1721_v7 = vmul.f32 0.125, %v600_v1  ;;  %v724_v28 = vsel %vm472_vm1, %v714_v15, 0.0  ;;  %v772_v52 = vsel %vm472_vm1, %v762_v39, 0.0 }
 0x1a1   :  { %v597_v47 = vadd.f32 %v583_v5, %v565_v40 }
 0x1a2   :  { %v615_v32 = vsub.f32 %v1544_v30, %v1719_v31  ;;  %v616_v29 = vsub.f32 %v1558_v37, %v1721_v7  ;;  %v663_v1 = vsub.f32 %v1552_v34, %v1719_v31  ;;  %v664_v35 = vsub.f32 %v1566_v41, %v1721_v7 }
 0x1a3   :  { %674 = vadd.xlane.f32.xlu0 %v673_v10  ;;  %677 = vadd.xlane.f32.xlu1 %v676_v14  ;;  %v1740_v55 = vmul.f32 0.125, %v597_v47  ;;  %v711_v5 = vsub.f32 %v1606_v61, %v1719_v31  ;;  %v712_v6 = vsub.f32 %v1618_v3, %v1721_v7  ;;  %v614_v14 = vsub.f32 %v1572_v44, %v1742_v56 }
 0x1a4   :  { %v623_v59 = vmul.f32 %v615_v32, %v615_v32  ;;  %v624_v60 = vmul.f32 %v616_v29, %v616_v29  ;;  %v671_v8 = vmul.f32 %v663_v1, %v663_v1  ;;  %v672_v2 = vmul.f32 %v664_v35, %v664_v35 }
 0x1a5   :  { %v613_v26 = vsub.f32 %v1550_v33, %v1740_v55  ;;  %v719_v17 = vmul.f32 %v711_v5, %v711_v5  ;;  %v720_v27 = vmul.f32 %v712_v6, %v712_v6  ;;  %v661_v39 = vsub.f32 %v1560_v38, %v1740_v55 }
 0x1a6   :  { %v643_v36 = vsel %vm472_vm1, %v623_v59, 0.0  ;;  %v646_v10 = vsel %vm472_vm1, %v624_v60, 0.0  ;;  %v691_v15 = vsel %vm472_vm1, %v671_v8, 0.0  ;;  %v694_v16 = vsel %vm472_vm1, %v672_v2, 0.0 }
 0x1a7   :  { %722 = vadd.xlane.f32.xlu0 %v721_v42  ;;  %725 = vadd.xlane.f32.xlu1 %v724_v28  ;;  %v662_v42 = vsub.f32 %v1576_v46, %v1742_v56  ;;  %v739_v28 = vsel %vm472_vm1, %v719_v17, 0.0  ;;  %v742_v32 = vsel %vm472_vm1, %v720_v27, 0.0  ;;  %v621_v29 = vmul.f32 %v613_v26, %v613_v26 }
 0x1a8   :  { %v622_v40 = vmul.f32 %v614_v14, %v614_v14  ;;  %v669_v43 = vmul.f32 %v661_v39, %v661_v39  ;;  %v709_v47 = vsub.f32 %v1610_v63, %v1740_v55  ;;  %v710_v59 = vsub.f32 %v1630_v9, %v1742_v56 }
 0x1a9   :  { %v637_v51 = vsel %vm472_vm1, %v621_v29, 0.0  ;;  %v1469_v35 = vmov 0   ;;  %v759_v2 = vsub.f32 %v1612_v0, %v1719_v31 }
 0x1aa   :  { %v685_v60 = vsel %vm472_vm1, %v669_v43, 0.0  ;;  %v717_v1 = vmul.f32 %v709_v47, %v709_v47  ;;  %1408 = vset.pattern.permute.xlu1 %v1469_v35  ;;  %1409 = vset.pattern.permute.xlu0 %v1469_v35  ;;  %v718_v6 = vmul.f32 %v710_v59, %v710_v59 }
 0x1ab   :  { %770 = vadd.xlane.f32.xlu0 %v769_v48  ;;  %773 = vadd.xlane.f32.xlu1 %v772_v52  ;;  %v640_v48 = vsel %vm472_vm1, %v622_v40, 0.0  ;;  %v670_v52 = vmul.f32 %v662_v42, %v662_v42  ;;  %v767_v42 = vmul.f32 %v759_v2, %v759_v2 }
 0x1ac   :  { %v733_v8 = vsel %vm472_vm1, %v717_v1, 0.0  ;;  %v736_v26 = vsel %vm472_vm1, %v718_v6, 0.0 }
 0x1ad   :  { %v688_v5 = vsel %vm472_vm1, %v670_v52, 0.0 }
 0x1af   :  { %644 = vadd.xlane.f32.xlu0 %v643_v36  ;;  %647 = vadd.xlane.f32.xlu1 %v646_v10  ;;  %v757_v36 = vsub.f32 %v1620_v4, %v1740_v55  ;;  %v758_v10 = vsub.f32 %v1638_v13, %v1742_v56 }
 0x1b1   :  { %v765_v14 = vmul.f32 %v757_v36, %v757_v36 }
 0x1b3   :  { %692 = vadd.xlane.f32.xlu0 %v691_v15  ;;  %695 = vadd.xlane.f32.xlu1 %v694_v16  ;;  %v766_v15 = vmul.f32 %v758_v10, %v758_v10  ;;  %v2016_v16 = vld [vmem:[#allocation8_spill] sm:$0xff]  ;;  %v781_v27 = vsel %vm472_vm1, %v765_v14, 0.0 }
 0x1b4   :  { %v760_v17 = vsub.f32 %v2016_v16, %v1721_v7 }
 0x1b5   :  { %v784_v39 = vsel %vm472_vm1, %v766_v15, 0.0 }
 0x1b7   :  { %740 = vadd.xlane.f32.xlu0 %v739_v28  ;;  %743 = vadd.xlane.f32.xlu1 %v742_v32  ;;  %v768_v28 = vmul.f32 %v760_v17, %v760_v17  ;;  %v787_v32 = vsel %vm472_vm1, %v767_v42, 0.0 }
 0x1b9   :  { %v790_v29 = vsel %vm472_vm1, %v768_v28, 0.0 }
 0x1bb   :  { %638 = vadd.xlane.f32.xlu0 %v637_v51  ;;  %641 = vadd.xlane.f32.xlu1 %v640_v48 }
 0x1bf   :  { %686 = vadd.xlane.f32.xlu0 %v685_v60  ;;  %689 = vadd.xlane.f32.xlu1 %v688_v5 }
 0x1c3   :  { %734 = vadd.xlane.f32.xlu0 %v733_v8  ;;  %737 = vadd.xlane.f32.xlu1 %v736_v26 }
 0x1c7   :  { %782 = vadd.xlane.f32.xlu0 %v781_v27  ;;  %785 = vadd.xlane.f32.xlu1 %v784_v39 }
 0x1cb   :  { %788 = vadd.xlane.f32.xlu0 %v787_v32  ;;  %791 = vadd.xlane.f32.xlu1 %v790_v29 }
 0x218   :  { %v633_v40 = vpop.xlane.xlu0 %632  ;;  %v636_v43 = vpop.xlane.xlu1 %635 }
 0x21c   :  { %v681_v47 = vpop.xlane.xlu0 %680  ;;  %v684_v51 = vpop.xlane.xlu1 %683 }
 0x21d   :  { %v699_v59 = vadd.f32 %v681_v47, %v633_v40  ;;  %v700_v60 = vadd.f32 %v684_v51, %v636_v43 }
 0x220   :  { %v729_v48 = vpop.xlane.xlu0 %728  ;;  %v732_v52 = vpop.xlane.xlu1 %731 }
 0x221   :  { %v747_v1 = vadd.f32 %v729_v48, %v699_v59  ;;  %v748_v35 = vadd.f32 %v732_v52, %v700_v60  ;;  %v811_v59 = vld [vmem:[%s2002_s2 + $0x10] sm:$0xff] }
 0x224   :  { %v777_v5 = vpop.xlane.xlu0 %776  ;;  %v780_v6 = vpop.xlane.xlu1 %779 }
 0x225   :  { %v795_v36 = vadd.f32 %v777_v5, %v747_v1  ;;  %v796_v10 = vadd.f32 %v780_v6, %v748_v35 }
 0x227   :  { %v803_v8 = vmul.f32 0.125, %v795_v36  ;;  %v804_v2 = vmul.f32 0.125, %v796_v10 }
 0x228   :  { %v627_v26 = vpop.xlane.xlu0 %626  ;;  %v630_v14 = vpop.xlane.xlu1 %629 }
 0x229   :  { %v819_v15 = vadd.f32 1e-05, %v803_v8  ;;  %v820_v17 = vadd.f32 1e-05, %v804_v2 }
 0x22b   :  { %1428 = vrsqrt.f32 %v819_v15 }
 0x22c   :  { %v675_v27 = vpop.xlane.xlu0 %674  ;;  %v678_v39 = vpop.xlane.xlu1 %677  ;;  %1430 = vrsqrt.f32 %v820_v17 }
 0x22d   :  { %v697_v32 = vadd.f32 %v675_v27, %v627_v26  ;;  %v698_v29 = vadd.f32 %v678_v39, %v630_v14  ;;  %v812_v26 = vld [vmem:[%s2002_s2 + $0x18] sm:$0xff]  ;;  %v843_v39 = vld [vmem:[%s2003_s3 + $0x10] sm:$0xff] }
 0x230   :  { %v723_v42 = vpop.xlane.xlu0 %722  ;;  %v726_v28 = vpop.xlane.xlu1 %725 }
 0x231   :  { %v745_v40 = vadd.f32 %v723_v42, %v697_v32  ;;  %v746_v43 = vadd.f32 %v726_v28, %v698_v29 }
 0x234   :  { %v771_v47 = vpop.xlane.xlu0 %770  ;;  %v774_v51 = vpop.xlane.xlu1 %773 }
 0x235   :  { %v793_v48 = vadd.f32 %v771_v47, %v745_v40  ;;  %v794_v52 = vadd.f32 %v774_v51, %v746_v43  ;;  %v809_v43 = vld [vmem:[%s2002_s2] sm:$0xff]  ;;  %v810_v47 = vld [vmem:[%s2002_s2 + $0x8] sm:$0xff] }
 0x237   :  { %v801_v60 = vmul.f32 0.125, %v793_v48  ;;  %v802_v1 = vmul.f32 0.125, %v794_v52 }
 0x238   :  { %v1429_v35 = vpop.eup %1428  ;;  %v645_v5 = vpop.xlane.xlu0 %644 }
 0x239   :  { %v648_v6 = vpop.xlane.xlu1 %647  ;;  %v817_v36 = vadd.f32 1e-05, %v801_v60  ;;  %v818_v10 = vadd.f32 1e-05, %v802_v1  ;;  %v835_v8 = vmul.f32 %v1429_v35, %v811_v59  ;;  %v1431_v2 = vpop.eup %1430  ;;  %v844_v1 = vld [vmem:[%s2003_s3 + $0x18] sm:$0xff] }
 0x23a   :  { %v836_v17 = vmul.f32 %v1431_v2, %v812_v26 }
 0x23b   :  { %1432 = vrsqrt.f32 %v817_v36  ;;  %877 = vperm.xlu1 %1408, %v835_v8   ;;  %v851_v27 = vmul.f32 %v835_v8, %v1664_v11  ;;  %v841_v36 = vld [vmem:[%s2003_s3] sm:$0xff] }
 0x23c   :  { %1434 = vrsqrt.f32 %v818_v10  ;;  %v693_v14 = vpop.xlane.xlu0 %692  ;;  %v852_v52 = vmul.f32 %v836_v17, %v1666_v12 }
 0x23d   :  { %v696_v15 = vpop.xlane.xlu1 %695  ;;  %v859_v32 = vsub.f32 %v843_v39, %v851_v27 }
 0x23e   :  { %v860_v26 = vsub.f32 %v844_v1, %v852_v52 }
 0x23f   :  { %882 = vperm.xlu1 %1408, %v836_v17  }
 0x240   :  { %v741_v42 = vpop.xlane.xlu0 %740 }
 0x241   :  { %v744_v28 = vpop.xlane.xlu1 %743 }
 0x243   :  { %925 = vperm.xlu1 %1408, %v859_v32   ;;  %v842_v32 = vld [vmem:[%s2003_s3 + $0x8] sm:$0xff] }
 0x244   :  { %v639_v29 = vpop.xlane.xlu0 %638 }
 0x245   :  { %v642_v40 = vpop.xlane.xlu1 %641 }
 0x248   :  { %v1433_v11 = vpop.eup %1432  ;;  %v687_v51 = vpop.xlane.xlu0 %686 }
 0x249   :  { %v690_v48 = vpop.xlane.xlu1 %689  ;;  %v1435_v59 = vpop.eup %1434  ;;  %v833_v60 = vmul.f32 %v1433_v11, %v809_v43  ;;  %v701_v27 = vadd.f32 %v687_v51, %v639_v29  ;;  %v703_v11 = vadd.f32 %v693_v14, %v645_v5 }
 0x24a   :  { %v834_v35 = vmul.f32 %v1435_v59, %v810_v47  ;;  %v702_v12 = vadd.f32 %v690_v48, %v642_v40 }
 0x24b   :  { %867 = vperm.xlu0 %1409, %v833_v60   ;;  %v849_v10 = vmul.f32 %v833_v60, %v1686_v20  ;;  %v704_v60 = vadd.f32 %v696_v15, %v648_v6  ;;  %v751_v29 = vadd.f32 %v741_v42, %v703_v11  ;;  %v846_v42 = vld [vmem:[%s2003_s3 + $0x28] sm:$0xff] }
 0x24c   :  { %872 = vperm.xlu1 %1408, %v834_v35   ;;  %v735_v8 = vpop.xlane.xlu0 %734  ;;  %v850_v39 = vmul.f32 %v834_v35, %v1688_v21 }
 0x24d   :  { %v738_v2 = vpop.xlane.xlu1 %737  ;;  %v857_v17 = vsub.f32 %v841_v36, %v849_v10  ;;  %v749_v43 = vadd.f32 %v735_v8, %v701_v27  ;;  %v752_v40 = vadd.f32 %v744_v28, %v704_v60  ;;  %v816_v28 = vld [vmem:[%s2002_s2 + $0x38] sm:$0xff] }
 0x24e   :  { %v750_v47 = vadd.f32 %v738_v2, %v702_v12  ;;  %v858_v52 = vsub.f32 %v842_v32, %v850_v39 }
 0x24f   :  { %930 = vperm.xlu0 %1409, %v860_v26  }
 0x250   :  { %915 = vperm.xlu1 %1408, %v857_v17   ;;  %v783_v59 = vpop.xlane.xlu0 %782 }
 0x251   :  { %v786_v20 = vpop.xlane.xlu1 %785  ;;  %v797_v13 = vadd.f32 %v783_v59, %v749_v43  ;;  %v848_v59 = vld [vmem:[%s2003_s3 + $0x38] sm:$0xff] }
 0x252   :  { %v798_v9 = vadd.f32 %v786_v20, %v750_v47  ;;  %v813_v47 = vld [vmem:[%s2002_s2 + $0x20] sm:$0xff] }
 0x253   :  { %920 = vperm.xlu0 %1409, %v858_v52   ;;  %v805_v1 = vmul.f32 0.125, %v797_v13  ;;  %v815_v13 = vld [vmem:[%s2002_s2 + $0x30] sm:$0xff] }
 0x254   :  { %v806_v51 = vmul.f32 0.125, %v798_v9  ;;  %v789_v21 = vpop.xlane.xlu0 %788  ;;  %v814_v9 = vld [vmem:[%s2002_s2 + $0x28] sm:$0xff] }
 0x255   :  { %v792_v48 = vpop.xlane.xlu1 %791  ;;  %v799_v36 = vadd.f32 %v789_v21, %v751_v29  ;;  %v821_v5 = vadd.f32 1e-05, %v805_v1  ;;  %v845_v29 = vld [vmem:[%s2003_s3 + $0x20] sm:$0xff]  ;;  %v847_v21 = vld [vmem:[%s2003_s3 + $0x30] sm:$0xff] }
 0x256   :  { %v822_v35 = vadd.f32 1e-05, %v806_v51  ;;  %v800_v10 = vadd.f32 %v792_v48, %v752_v40 }
 0x257   :  { %v807_v8 = vmul.f32 0.125, %v799_v36 }
 0x258   :  { %v808_v2 = vmul.f32 0.125, %v800_v10  ;;  %1436 = vrsqrt.f32 %v822_v35 }
 0x259   :  { %v823_v14 = vadd.f32 1e-05, %v807_v8 }
 0x25a   :  { %v824_v26 = vadd.f32 1e-05, %v808_v2 }
 0x25b   :  { %1438 = vrsqrt.f32 %v823_v14 }
 0x25c   :  { %1440 = vrsqrt.f32 %v824_v26 }
 0x25d   :  { %1442 = vrsqrt.f32 %v821_v5 }
 0x265   :  { %v1437_v6 = vpop.eup %1436 }
 0x266   :  { %v838_v15 = vmul.f32 %v1437_v6, %v814_v9 }
 0x268   :  { %v1439_v27 = vpop.eup %1438  ;;  %v854_v12 = vmul.f32 %v838_v15, %v1742_v56 }
 0x269   :  { %v1441_v17 = vpop.eup %1440  ;;  %v839_v39 = vmul.f32 %v1439_v27, %v815_v13 }
 0x26a   :  { %v1443_v32 = vpop.eup %1442  ;;  %v862_v43 = vsub.f32 %v846_v42, %v854_v12  ;;  %v840_v11 = vmul.f32 %v1441_v17, %v816_v28 }
 0x26b   :  { %897 = vperm.xlu1 %1408, %v839_v39   ;;  %v837_v60 = vmul.f32 %v1443_v32, %v813_v47  ;;  %v855_v51 = vmul.f32 %v839_v39, %v1719_v31 }
 0x26c   :  { %940 = vperm.xlu0 %1409, %v862_v43   ;;  %v856_v20 = vmul.f32 %v840_v11, %v1721_v7 }
 0x26d   :  { %v853_v56 = vmul.f32 %v837_v60, %v1740_v55  ;;  %v863_v7 = vsub.f32 %v847_v21, %v855_v51 }
 0x26e   :  { %v864_v52 = vsub.f32 %v848_v59, %v856_v20  ;;  %v2018_v20 = vld [vmem:[#allocation6_spill] sm:$0xff] }
 0x26f   :  { %887 = vperm.xlu1 %1408, %v837_v60   ;;  %v861_v40 = vsub.f32 %v845_v29, %v853_v56 }
 0x270   :  { %950 = vperm.xlu0 %1409, %v864_v52  }
 0x273   :  { %902 = vperm.xlu1 %1408, %v840_v11   ;;  %v2017_v11 = vld [vmem:[#allocation5_spill] sm:$0xff] }
 0x277   :  { %892 = vperm.xlu1 %1408, %v838_v15  }
 0x27b   :  { %935 = vperm.xlu1 %1408, %v861_v40  }
 0x27f   :  { %945 = vperm.xlu1 %1408, %v863_v7  }
 0x2b6   :  { %v878_v48 = vpop.permute.xlu1 %877 }
 0x2b7   :  { %v907_v35 = vmul.f32 %v1520_v18, %v878_v48  ;;  %v1012_v55 = vmul.f32 %v1522_v19, %v878_v48  ;;  %v1077_v36 = vmul.f32 %v1574_v45, %v878_v48  ;;  %v1142_v10 = vmul.f32 %v1584_v50, %v878_v48 }
 0x2ba   :  { %v883_v1 = vpop.permute.xlu1 %882 }
 0x2bb   :  { %v908_v50 = vmul.f32 %v1532_v24, %v883_v1  ;;  %v1013_v27 = vmul.f32 %v1534_v25, %v883_v1  ;;  %v1078_v12 = vmul.f32 %v1590_v53, %v883_v1  ;;  %v1143_v17 = vmul.f32 %v1600_v58, %v883_v1 }
 0x2be   :  { %v926_v8 = vpop.permute.xlu1 %925 }
 0x2bf   :  { %v955_v2 = vadd.f32 %v926_v8, %v907_v35  ;;  %v1020_v31 = vadd.f32 %v1012_v55, %v926_v8  ;;  %v1085_v5 = vadd.f32 %v1077_v36, %v926_v8  ;;  %v1150_v14 = vadd.f32 %v1142_v10, %v926_v8 }
 0x2c1   :  { %v963_v26 = vmax.f32 %v955_v2, 0.0  ;;  %v1028_v9 = vmax.f32 %v1020_v31, 0.0  ;;  %v1093_v6 = vmax.f32 %v1085_v5, 0.0  ;;  %v1158_v13 = vmax.f32 %v1150_v14, 0.0 }
 0x2c3   :  { %v1302_v15 = vpack.c.bf16 %v963_v26, %v963_v26  ;;  %v1310_v42 = vpack.c.bf16 %v1028_v9, %v1028_v9  ;;  %v1318_v28 = vpack.c.bf16 %v1093_v6, %v1093_v6  ;;  %v1326_v18 = vpack.c.bf16 %v1158_v13, %v1158_v13 }
 0x2c5   :  { %1004 = vst.msk [vmem:[%s2004_s4 + $0x8] sm:$0xf] %vm1001_vm2, %v1302_v15  ;;  %1262 = vst.msk [vmem:[%s2004_s4 + $0x28] sm:$0xf] %vm1001_vm2, %v1310_v42 }
 0x2c6   :  { %1278 = vst.msk [vmem:[%s2004_s4 + $0x48] sm:$0xf] %vm1001_vm2, %v1318_v28  ;;  %1294 = vst.msk [vmem:[%s2004_s4 + $0x68] sm:$0xf] %vm1001_vm2, %v1326_v18  ;;  %v868_v19 = vpop.permute.xlu0 %867 }
 0x2c7   :  { %v873_v45 = vpop.permute.xlu1 %872  ;;  %v905_v39 = vmul.f32 %v868_v19, %v1530_v23  ;;  %v1010_v32 = vmul.f32 %v868_v19, %v1528_v22  ;;  %v1075_v43 = vmul.f32 %v868_v19, %v1582_v49  ;;  %v1140_v47 = vmul.f32 %v868_v19, %v1592_v54 }
 0x2c8   :  { %v906_v59 = vmul.f32 %v873_v45, %v2017_v11  ;;  %v1011_v60 = vmul.f32 %v873_v45, %v2018_v20  ;;  %v1076_v24 = vmul.f32 %v873_v45, %v1598_v57  ;;  %v1141_v25 = vmul.f32 %v873_v45, %v1608_v62 }
 0x2ca   :  { %v931_v52 = vpop.permute.xlu0 %930 }
 0x2cb   :  { %v956_v53 = vadd.f32 %v931_v52, %v908_v50  ;;  %v1021_v56 = vadd.f32 %v1013_v27, %v931_v52  ;;  %v1086_v58 = vadd.f32 %v1078_v12, %v931_v52  ;;  %v1151_v29 = vadd.f32 %v1143_v17, %v931_v52  ;;  %v916_v23 = vpop.permute.xlu1 %915 }
 0x2cc   :  { %v953_v40 = vadd.f32 %v916_v23, %v905_v39  ;;  %v1018_v22 = vadd.f32 %v1010_v32, %v916_v23  ;;  %v1083_v51 = vadd.f32 %v1075_v43, %v916_v23  ;;  %v1148_v49 = vadd.f32 %v1140_v47, %v916_v23 }
 0x2cd   :  { %v964_v21 = vmax.f32 %v956_v53, 0.0  ;;  %v1029_v54 = vmax.f32 %v1021_v56, 0.0  ;;  %v1094_v7 = vmax.f32 %v1086_v58, 0.0  ;;  %v1159_v48 = vmax.f32 %v1151_v29, 0.0 }
 0x2ce   :  { %v961_v1 = vmax.f32 %v953_v40, 0.0  ;;  %v1026_v35 = vmax.f32 %v1018_v22, 0.0  ;;  %v1091_v55 = vmax.f32 %v1083_v51, 0.0  ;;  %v1156_v57 = vmax.f32 %v1148_v49, 0.0  ;;  %v921_v36 = vpop.permute.xlu0 %920  ;;  %v2019_v49 = vld [vmem:[#allocation7_spill] sm:$0xff] }
 0x2cf   :  { %v1303_v62 = vpack.c.bf16 %v964_v21, %v964_v21  ;;  %v1311_v10 = vpack.c.bf16 %v1029_v54, %v1029_v54  ;;  %v1319_v8 = vpack.c.bf16 %v1094_v7, %v1094_v7  ;;  %v1327_v2 = vpack.c.bf16 %v1159_v48, %v1159_v48  ;;  %v2020_v54 = vld [vmem:[#allocation9_spill] sm:$0xff] }
 0x2d0   :  { %v1300_v31 = vpack.c.bf16 %v961_v1, %v961_v1  ;;  %v1308_v5 = vpack.c.bf16 %v1026_v35, %v1026_v35  ;;  %v1316_v14 = vpack.c.bf16 %v1091_v55, %v1091_v55  ;;  %v1324_v26 = vpack.c.bf16 %v1156_v57, %v1156_v57 }
 0x2d1   :  { %1005 = vst.msk [vmem:[%s2004_s4 + $0xc] sm:$0xf] %vm1001_vm2, %v1303_v62  ;;  %1263 = vst.msk [vmem:[%s2004_s4 + $0x2c] sm:$0xf] %vm1001_vm2, %v1311_v10  ;;  %v954_v9 = vadd.f32 %v921_v36, %v906_v59  ;;  %v1019_v6 = vadd.f32 %v1011_v60, %v921_v36  ;;  %v1084_v13 = vadd.f32 %v1076_v24, %v921_v36 }
 0x2d2   :  { %1279 = vst.msk [vmem:[%s2004_s4 + $0x4c] sm:$0xf] %vm1001_vm2, %v1319_v8  ;;  %1295 = vst.msk [vmem:[%s2004_s4 + $0x6c] sm:$0xf] %vm1001_vm2, %v1327_v2  ;;  %v1149_v15 = vadd.f32 %v1141_v25, %v921_v36 }
 0x2d3   :  { %1002 = vst.msk [vmem:[%s2004_s4] sm:$0xf] %vm1001_vm2, %v1300_v31  ;;  %1260 = vst.msk [vmem:[%s2004_s4 + $0x20] sm:$0xf] %vm1001_vm2, %v1308_v5  ;;  %v962_v42 = vmax.f32 %v954_v9, 0.0  ;;  %v1027_v28 = vmax.f32 %v1019_v6, 0.0 }
 0x2d4   :  { %1276 = vst.msk [vmem:[%s2004_s4 + $0x40] sm:$0xf] %vm1001_vm2, %v1316_v14  ;;  %1292 = vst.msk [vmem:[%s2004_s4 + $0x60] sm:$0xf] %vm1001_vm2, %v1324_v26  ;;  %v1092_v18 = vmax.f32 %v1084_v13, 0.0  ;;  %v1157_v19 = vmax.f32 %v1149_v15, 0.0 }
 0x2d5   :  { %v1301_v45 = vpack.c.bf16 %v962_v42, %v962_v42  ;;  %v1309_v50 = vpack.c.bf16 %v1027_v28, %v1027_v28 }
 0x2d6   :  { %v1317_v27 = vpack.c.bf16 %v1092_v18, %v1092_v18  ;;  %v1325_v12 = vpack.c.bf16 %v1157_v19, %v1157_v19 }
 0x2d7   :  { %1003 = vst.msk [vmem:[%s2004_s4 + $0x4] sm:$0xf] %vm1001_vm2, %v1301_v45  ;;  %1261 = vst.msk [vmem:[%s2004_s4 + $0x24] sm:$0xf] %vm1001_vm2, %v1309_v50 }
 0x2d8   :  { %1277 = vst.msk [vmem:[%s2004_s4 + $0x44] sm:$0xf] %vm1001_vm2, %v1317_v27  ;;  %1293 = vst.msk [vmem:[%s2004_s4 + $0x64] sm:$0xf] %vm1001_vm2, %v1325_v12 }
 0x2e6   :  { %v898_v17 = vpop.permute.xlu1 %897 }
 0x2e7   :  { %v941_v39 = vpop.permute.xlu0 %940  ;;  %v911_v24 = vmul.f32 %v1544_v30, %v898_v17  ;;  %v1016_v25 = vmul.f32 %v1552_v34, %v898_v17  ;;  %v1081_v52 = vmul.f32 %v1606_v61, %v898_v17  ;;  %v1146_v53 = vmul.f32 %v1612_v0, %v898_v17 }
 0x2ea   :  { %v888_v32 = vpop.permute.xlu1 %887 }
 0x2eb   :  { %v951_v60 = vpop.permute.xlu0 %950 }
 0x2ee   :  { %v903_v43 = vpop.permute.xlu1 %902 }
 0x2ef   :  { %v912_v47 = vmul.f32 %v1558_v37, %v903_v43  ;;  %v1017_v11 = vmul.f32 %v1566_v41, %v903_v43  ;;  %v1082_v59 = vmul.f32 %v1618_v3, %v903_v43  ;;  %v1147_v20 = vmul.f32 %v2016_v16, %v903_v43 }
 0x2f0   :  { %v909_v37 = vmul.f32 %v888_v32, %v1550_v33  ;;  %v1014_v41 = vmul.f32 %v888_v32, %v1560_v38  ;;  %v1079_v3 = vmul.f32 %v888_v32, %v1610_v63  ;;  %v1144_v16 = vmul.f32 %v888_v32, %v1620_v4 }
 0x2f1   :  { %v960_v56 = vadd.f32 %v951_v60, %v912_v47  ;;  %v1025_v58 = vadd.f32 %v1017_v11, %v951_v60  ;;  %v1090_v29 = vadd.f32 %v1082_v59, %v951_v60  ;;  %v1155_v23 = vadd.f32 %v1147_v20, %v951_v60 }
 0x2f2   :  { %v893_v40 = vpop.permute.xlu1 %892 }
 0x2f3   :  { %v968_v30 = vmax.f32 %v960_v56, 0.0  ;;  %v1033_v22 = vmax.f32 %v1025_v58, 0.0  ;;  %v1098_v34 = vmax.f32 %v1090_v29, 0.0  ;;  %v1163_v51 = vmax.f32 %v1155_v23, 0.0 }
 0x2f4   :  { %v910_v61 = vmul.f32 %v893_v40, %v1572_v44  ;;  %v1015_v0 = vmul.f32 %v893_v40, %v1576_v46  ;;  %v1080_v21 = vmul.f32 %v893_v40, %v2019_v49  ;;  %v1145_v7 = vmul.f32 %v893_v40, %v2020_v54 }
 0x2f5   :  { %v1307_v33 = vpack.c.bf16 %v968_v30, %v968_v30  ;;  %v1315_v48 = vpack.c.bf16 %v1033_v22, %v1033_v22  ;;  %v1323_v38 = vpack.c.bf16 %v1098_v34, %v1098_v34  ;;  %v1331_v1 = vpack.c.bf16 %v1163_v51, %v1163_v51 }
 0x2f6   :  { %v958_v63 = vadd.f32 %v941_v39, %v910_v61  ;;  %v1023_v35 = vadd.f32 %v1015_v0, %v941_v39  ;;  %v1088_v4 = vadd.f32 %v1080_v21, %v941_v39  ;;  %v1153_v55 = vadd.f32 %v1145_v7, %v941_v39  ;;  %v936_v57 = vpop.permute.xlu1 %935 }
 0x2f7   :  { %1009 = vst.msk [vmem:[%s2004_s4 + $0x1c] sm:$0xf] %vm1001_vm2, %v1307_v33  ;;  %1267 = vst.msk [vmem:[%s2004_s4 + $0x3c] sm:$0xf] %vm1001_vm2, %v1315_v48  ;;  %v957_v44 = vadd.f32 %v936_v57, %v909_v37  ;;  %v1022_v46 = vadd.f32 %v1014_v41, %v936_v57  ;;  %v1087_v36 = vadd.f32 %v1079_v3, %v936_v57 }
 0x2f8   :  { %1283 = vst.msk [vmem:[%s2004_s4 + $0x5c] sm:$0xf] %vm1001_vm2, %v1323_v38  ;;  %1299 = vst.msk [vmem:[%s2004_s4 + $0x7c] sm:$0xf] %vm1001_vm2, %v1331_v1  ;;  %v1152_v62 = vadd.f32 %v1144_v16, %v936_v57  ;;  %v966_v10 = vmax.f32 %v958_v63, 0.0  ;;  %v1031_v8 = vmax.f32 %v1023_v35, 0.0 }
 0x2f9   :  { %v1096_v2 = vmax.f32 %v1088_v4, 0.0  ;;  %v1161_v31 = vmax.f32 %v1153_v55, 0.0  ;;  %v965_v5 = vmax.f32 %v957_v44, 0.0  ;;  %v1030_v14 = vmax.f32 %v1022_v46, 0.0 }
 0x2fa   :  { %v1095_v26 = vmax.f32 %v1087_v36, 0.0  ;;  %v1160_v9 = vmax.f32 %v1152_v62, 0.0  ;;  %v1305_v6 = vpack.c.bf16 %v966_v10, %v966_v10  ;;  %v1313_v13 = vpack.c.bf16 %v1031_v8, %v1031_v8  ;;  %v946_v28 = vpop.permute.xlu1 %945 }
 0x2fb   :  { %v1321_v15 = vpack.c.bf16 %v1096_v2, %v1096_v2  ;;  %v1329_v42 = vpack.c.bf16 %v1161_v31, %v1161_v31  ;;  %v1304_v18 = vpack.c.bf16 %v965_v5, %v965_v5  ;;  %v1312_v19 = vpack.c.bf16 %v1030_v14, %v1030_v14 }
 0x2fc   :  { %v1320_v45 = vpack.c.bf16 %v1095_v26, %v1095_v26  ;;  %v1328_v50 = vpack.c.bf16 %v1160_v9, %v1160_v9  ;;  %1007 = vst.msk [vmem:[%s2004_s4 + $0x14] sm:$0xf] %vm1001_vm2, %v1305_v6  ;;  %1265 = vst.msk [vmem:[%s2004_s4 + $0x34] sm:$0xf] %vm1001_vm2, %v1313_v13  ;;  %v959_v27 = vadd.f32 %v946_v28, %v911_v24 }
 0x2fd   :  { %1281 = vst.msk [vmem:[%s2004_s4 + $0x54] sm:$0xf] %vm1001_vm2, %v1321_v15  ;;  %1297 = vst.msk [vmem:[%s2004_s4 + $0x74] sm:$0xf] %vm1001_vm2, %v1329_v42  ;;  %v1024_v12 = vadd.f32 %v1016_v25, %v946_v28  ;;  %v1089_v17 = vadd.f32 %v1081_v52, %v946_v28  ;;  %v1154_v39 = vadd.f32 %v1146_v53, %v946_v28 }
 0x2fe   :  { %1006 = vst.msk [vmem:[%s2004_s4 + $0x10] sm:$0xf] %vm1001_vm2, %v1304_v18  ;;  %1264 = vst.msk [vmem:[%s2004_s4 + $0x30] sm:$0xf] %vm1001_vm2, %v1312_v19  ;;  %v967_v32 = vmax.f32 %v959_v27, 0.0 }
 0x2ff   :  { %1280 = vst.msk [vmem:[%s2004_s4 + $0x50] sm:$0xf] %vm1001_vm2, %v1320_v45  ;;  %1296 = vst.msk [vmem:[%s2004_s4 + $0x70] sm:$0xf] %vm1001_vm2, %v1328_v50  ;;  %v1032_v43 = vmax.f32 %v1024_v12, 0.0  ;;  %v1097_v47 = vmax.f32 %v1089_v17, 0.0 }
 0x300   :  { %v1162_v11 = vmax.f32 %v1154_v39, 0.0  ;;  %v1306_v59 = vpack.c.bf16 %v967_v32, %v967_v32 }
 0x301   :  { %v1314_v20 = vpack.c.bf16 %v1032_v43, %v1032_v43  ;;  %v1322_v60 = vpack.c.bf16 %v1097_v47, %v1097_v47 }
 0x302   :  { %v1330_v24 = vpack.c.bf16 %v1162_v11, %v1162_v11  ;;  %1008 = vst.msk [vmem:[%s2004_s4 + $0x18] sm:$0xf] %vm1001_vm2, %v1306_v59 }
 0x303   :  { %1266 = vst.msk [vmem:[%s2004_s4 + $0x38] sm:$0xf] %vm1001_vm2, %v1314_v20  ;;  %1282 = vst.msk [vmem:[%s2004_s4 + $0x58] sm:$0xf] %vm1001_vm2, %v1322_v60 }
 0x304   :  { %1298 = vst.msk [vmem:[%s2004_s4 + $0x78] sm:$0xf] %vm1001_vm2, %v1330_v24 }
 0x305   :  { %1209 = vsyncpa [#allocation3], 1 }

// kernel: _lambda_.7
= control target key start
LH: loop header
LB: loop body
LE: loop exit
PB: predicated region body
PF: predicated region fallthrough
CT: control target
= control target key end

     0   :  { %9 = vsyncpa [#allocation3], 0  ;;  %s2110_s15 = smov [#allocation2]   ;;  %s2718_s0 = inlined_call_operand.hbm [shape: bf16[4,32,576], index: 0, kind: input, shape index: {}]   ;;  %s2719_s1 = inlined_call_operand.vmem [shape: bf16[576,8], index: 1, kind: input, shape index: {}]   ;;  %s2720_s2 = inlined_call_operand.vmem [shape: f32[32,1], index: 2, kind: input, shape index: {}]   ;;  %s2721_s3 = inlined_call_operand.vmem [shape: f32[32,1], index: 3, kind: input, shape index: {}]   ;;  %s2722_s4 = inlined_call_operand.vmem [shape: bf16[4,32,8], index: 4, kind: output, shape index: {}]  }
   0x1   :  { %s15_s16 = sshll.u32 %s2110_s15, 4  ;;  %s16_s16 = int_to_ptr.vmem [resolvable:$true] %s15_s16 }
   0x2   :  { %s2096_s17 = scalar_lea.vmem %s16_s16, 5120  ;;  %p2101_p1 = scmp.lt.s32.totalorder %s16_s16, %s16_s16 }
   0x3   :  { %p2097_p0 = scmp.ne.s32.totalorder %s16_s16, %s2096_s17  ;;  %p2102_p2 = scmp.lt.s32.totalorder %s2096_s17, %s2096_s17 }
   0x5   :  { %p2103_p3 = por %p2102_p2, %p2101_p1 }
   0x7   :  { %p2104_p4 = pnand %p2103_p3, %p2097_p0 }
   0x9   :  { %2107 = shalt.err (!%p2104_p4)
}
   0xa   :  { %s2111_s18 = smov 320   ;;  %s2112_s19 = smov 20  }
   0xb   :  { %21 = dma.hbm_to_vmem [thread:$0]  %s2718_s0, 5120, %s16_s16, [#allocation3], %s2111_s18, %s2111_s18, %s2112_s19  }
   0xc   :  { %2108 = dma.done.wait [#allocation3], 5120  }
   0xd   :  { %2109 = vsyncadd [#allocation3], 4294962176  ;;  %v2145_v0 = vld [vmem:[%s2719_s1 + $0x78] sm:$0xff]   ;;  %v2168_v4 = vld [vmem:[%s2719_s1 + $0x70] sm:$0xff]   ;;  %vm382_vm0 = vcmask 523264   ;;  %vm1184_vm1 = vcmask 64512  }
   0xe   :  { %v2150_v1 = vld [vmem:[%s2719_s1 + $0xf8] sm:$0xff]   ;;  %1686 = vmatprep.subr.bf16.mxu0 %v2145_v0  ;;  %v2174_v5 = vld [vmem:[%s2719_s1 + $0xf0] sm:$0xff]   ;;  %v2192_v8 = vld [vmem:[%s2719_s1 + $0x68] sm:$0xff]   ;;  %vm1449_vm2 = vcmask 60416  }
   0xf   :  { %v2156_v2 = vld [vmem:[%s2719_s1 + $0x38] sm:$0xff]   ;;  %1714 = vmatprep.subr.bf16.mxu1 %v2150_v1  ;;  %v2180_v6 = vld [vmem:[%s2719_s1 + $0x30] sm:$0xff]   ;;  %v2198_v9 = vld [vmem:[%s2719_s1 + $0xe8] sm:$0xff]  }
  0x10   :  { %v2162_v3 = vld [vmem:[%s2719_s1 + $0xb8] sm:$0xff]   ;;  %1687 = vmatpush3.bf16.msra.mxu0 %v2156_v2  ;;  %v2186_v7 = vld [vmem:[%s2719_s1 + $0xb0] sm:$0xff]   ;;  %v2204_v10 = vld [vmem:[%s2719_s1 + $0x28] sm:$0xff]  }
  0x11   :  { %1715 = vmatpush3.bf16.msra.mxu1 %v2162_v3  ;;  %1688 = vmatprep.subr.bf16.mxu0 %v2168_v4  ;;  %v2210_v11 = vld [vmem:[%s2719_s1 + $0xa8] sm:$0xff]   ;;  %v2216_v12 = vld [vmem:[%s2719_s1 + $0x60] sm:$0xff]   ;;  %v2240_v16 = vld [vmem:[%s2719_s1 + $0x58] sm:$0xff]  }
  0x12   :  { %1716 = vmatprep.subr.bf16.mxu1 %v2174_v5  ;;  %v2222_v13 = vld [vmem:[%s2719_s1 + $0xe0] sm:$0xff]   ;;  %v2246_v17 = vld [vmem:[%s2719_s1 + $0xd8] sm:$0xff]   ;;  %v2264_v20 = vld [vmem:[%s2719_s1 + $0x50] sm:$0xff]  }
  0x13   :  { %v2228_v14 = vld [vmem:[%s2719_s1 + $0x20] sm:$0xff]   ;;  %v2252_v18 = vld [vmem:[%s2719_s1 + $0x18] sm:$0xff]   ;;  %v2270_v21 = vld [vmem:[%s2719_s1 + $0xd0] sm:$0xff]  }
  0x14   :  { %1689 = vmatpush3.bf16.msra.mxu0 %v2180_v6  ;;  %v2234_v15 = vld [vmem:[%s2719_s1 + $0xa0] sm:$0xff]   ;;  %v2258_v19 = vld [vmem:[%s2719_s1 + $0x98] sm:$0xff]   ;;  %v2276_v22 = vld [vmem:[%s2719_s1 + $0x10] sm:$0xff]  }
  0x15   :  { %1717 = vmatpush3.bf16.msra.mxu1 %v2186_v7  ;;  %1690 = vmatprep.subr.bf16.mxu0 %v2192_v8  ;;  %v2282_v23 = vld [vmem:[%s2719_s1 + $0x90] sm:$0xff]   ;;  %v2288_v24 = vld [vmem:[%s2719_s1 + $0x48] sm:$0xff]   ;;  %v2312_v28 = vld [vmem:[%s2719_s1 + $0x40] sm:$0xff]  }
  0x16   :  { %1718 = vmatprep.subr.bf16.mxu1 %v2198_v9  ;;  %v2294_v25 = vld [vmem:[%s2719_s1 + $0xc8] sm:$0xff]   ;;  %v2318_v29 = vld [vmem:[%s2719_s1 + $0xc0] sm:$0xff]   ;;  %v2338_v36 = vld [vmem:[%s2719_s1 + $0x118] sm:$0xff]  }
  0x17   :  { %v2300_v26 = vld [vmem:[%s2719_s1 + $0x8] sm:$0xff]   ;;  %v2324_v30 = vld [vmem:[%s2719_s1] sm:$0xff]   ;;  %v2343_v37 = vld [vmem:[%s2719_s1 + $0x110] sm:$0xff]  }
  0x18   :  { %1691 = vmatpush3.bf16.msra.mxu0 %v2204_v10  ;;  %v2306_v27 = vld [vmem:[%s2719_s1 + $0x88] sm:$0xff]   ;;  %v2330_v31 = vld [vmem:[%s2719_s1 + $0x80] sm:$0xff]   ;;  %v2046_v47 = vld [vmem:[#allocation2 + $0x5c] ss:$20 sps:$4 sm:$0xff]  }
  0x19   :  { %1719 = vmatpush3.bf16.msra.mxu1 %v2210_v11  ;;  %1692 = vmatprep.subr.bf16.mxu0 %v2216_v12  ;;  %v2020_v32 = vld [vmem:[#allocation2] ss:$20 sps:$4 sm:$0xff]   ;;  %v2022_v33 = vld [vmem:[#allocation2 + $0x4] ss:$20 sps:$4 sm:$0xff]   ;;  %v2023_v34 = vld [vmem:[#allocation2 + $0x8] ss:$20 sps:$4 sm:$0xff]  }
  0x1a   :  { %1720 = vmatprep.subr.bf16.mxu1 %v2222_v13  ;;  %v2025_v35 = vld [vmem:[#allocation2 + $0xc] ss:$20 sps:$4 sm:$0xff]   ;;  %421 = vmatprep.mubr.bf16.mxu0 %v2022_v33  ;;  %v2030_v39 = vld [vmem:[#allocation2 + $0x34] ss:$20 sps:$4 sm:$0xff]   ;;  %v2033_v42 = vld [vmem:[#allocation2 + $0x30] ss:$20 sps:$4 sm:$0xff]  }
  0x1b   :  { %470 = vmatprep.mubr.bf16.mxu1 %v2025_v35  ;;  %v2028_v38 = vld [vmem:[#allocation2 + $0x2c] ss:$20 sps:$4 sm:$0xff]   ;;  %v2032_v40 = vld [vmem:[#allocation2 + $0x28] ss:$20 sps:$4 sm:$0xff]   ;;  %v2036_v43 = vld [vmem:[#allocation2 + $0x10] ss:$20 sps:$4 sm:$0xff]  }
  0x1c   :  { %1693 = vmatpush3.bf16.msra.mxu0 %v2228_v14  ;;  %v2353_v41 = vld [vmem:[%s2719_s1 + $0x108] sm:$0xff]   ;;  %v2362_v44 = vld [vmem:[%s2719_s1 + $0x100] sm:$0xff]   ;;  %v2041_v49 = vld [vmem:[#allocation2 + $0x7c] ss:$20 sps:$4 sm:$0xff]  }
  0x1d   :  { %1721 = vmatpush3.bf16.msra.mxu1 %v2234_v15  ;;  %1694 = vmatprep.subr.bf16.mxu0 %v2240_v16  ;;  %v2040_v45 = vld [vmem:[#allocation2 + $0x54] ss:$20 sps:$4 sm:$0xff]   ;;  %v2037_v46 = vld [vmem:[#allocation2 + $0x38] ss:$20 sps:$4 sm:$0xff]   ;;  %v2038_v48 = vld [vmem:[#allocation2 + $0x50] ss:$20 sps:$4 sm:$0xff]  }
  0x1e   :  { %1722 = vmatprep.subr.bf16.mxu1 %v2246_v17  ;;  %v2043_v50 = vld [vmem:[#allocation2 + $0x78] ss:$20 sps:$4 sm:$0xff]   ;;  %v2047_v51 = vld [vmem:[#allocation2 + $0x60] ss:$20 sps:$4 sm:$0xff]   ;;  %v2048_v53 = vld [vmem:[#allocation2 + $0x88] ss:$20 sps:$4 sm:$0xff]  }
  0x1f   :  { %v2044_v52 = vld [vmem:[#allocation2 + $0x58] ss:$20 sps:$4 sm:$0xff]   ;;  %v2051_v56 = vld [vmem:[#allocation2 + $0x80] ss:$20 sps:$4 sm:$0xff]   ;;  %v2055_v59 = vld [vmem:[#allocation2 + $0xa8] ss:$20 sps:$4 sm:$0xff]  }
  0x20   :  { %1695 = vmatpush3.bf16.msra.mxu0 %v2252_v18  ;;  %v2049_v54 = vld [vmem:[#allocation2 + $0x84] ss:$20 sps:$4 sm:$0xff]   ;;  %v2057_v55 = vld [vmem:[#allocation2 + $0xac] ss:$20 sps:$4 sm:$0xff]   ;;  %v2060_v61 = vld [vmem:[#allocation2 + $0xd4] ss:$20 sps:$4 sm:$0xff]  }
  0x21   :  { %1723 = vmatpush3.bf16.msra.mxu1 %v2258_v19  ;;  %1696 = vmatprep.subr.bf16.mxu0 %v2264_v20  ;;  %v2054_v57 = vld [vmem:[#allocation2 + $0xa4] ss:$20 sps:$4 sm:$0xff]   ;;  %v2052_v58 = vld [vmem:[#allocation2 + $0xa0] ss:$20 sps:$4 sm:$0xff]   ;;  %v2062_v62 = vld [vmem:[#allocation2 + $0xc8] ss:$20 sps:$4 sm:$0xff]  }
  0x22   :  { %1724 = vmatprep.subr.bf16.mxu1 %v2270_v21  ;;  %v2058_v60 = vld [vmem:[#allocation2 + $0xcc] ss:$20 sps:$4 sm:$0xff]   ;;  %v2063_v63 = vld [vmem:[#allocation2 + $0xd0] ss:$20 sps:$4 sm:$0xff]  }
  0x24   :  { %1697 = vmatpush3.bf16.msra.mxu0 %v2276_v22 }
  0x25   :  { %1725 = vmatpush3.bf16.msra.mxu1 %v2282_v23  ;;  %1698 = vmatprep.subr.bf16.mxu0 %v2288_v24 }
  0x26   :  { %1726 = vmatprep.subr.bf16.mxu1 %v2294_v25 }
  0x28   :  { %1699 = vmatpush3.bf16.msra.mxu0 %v2300_v26 }
  0x29   :  { %1727 = vmatpush3.bf16.msra.mxu1 %v2306_v27  ;;  %1700 = vmatprep.subr.bf16.mxu0 %v2312_v28 }
  0x2a   :  { %1728 = vmatprep.subr.bf16.mxu1 %v2318_v29 }
  0x2c   :  { %1701 = vmatpush3.bf16.msra.mxu0 %v2324_v30 }
  0x2d   :  { %1729 = vmatpush3.bf16.msra.mxu1 %v2330_v31  ;;  %1934 = vmatprep.subr.bf16.mxu0 %v2338_v36 }
  0x2e   :  { %1748 = vmatprep.subr.bf16.mxu1 %v2145_v0 }
  0x2f   :  { %422 = vmatmul.mubr.bf16.vlgmr.msra.gmra.mxu0 %v2020_v32  ;;  %v2068_v32 = vld [vmem:[#allocation2 + $0xf4] ss:$20 sps:$4 sm:$0xff]  }
  0x30   :  { %471 = vmatmul.mubr.bf16.vlgmr.msra.gmra.mxu1 %v2023_v34  ;;  %1935 = vmatpush3.bf16.msra.mxu0 %v2338_v36 }
  0x31   :  { %1749 = vmatpush3.bf16.msra.mxu1 %v2156_v2  ;;  %1936 = vmatprep.subr.bf16.mxu0 %v2343_v37 }
  0x32   :  { %1750 = vmatprep.subr.bf16.mxu1 %v2168_v4  ;;  %429 = vmatprep.mubr.bf16.mxu0 %v2028_v38 }
  0x33   :  { %478 = vmatprep.mubr.bf16.mxu1 %v2030_v39 }
  0x34   :  { %1937 = vmatpush3.bf16.msra.mxu0 %v2343_v37 }
  0x35   :  { %1751 = vmatpush3.bf16.msra.mxu1 %v2180_v6  ;;  %1938 = vmatprep.subr.bf16.mxu0 %v2353_v41 }
  0x36   :  { %1752 = vmatprep.subr.bf16.mxu1 %v2192_v8 }
  0x37   :  { %430 = vmatmul.mubr.bf16.gmra.mxu0 %v2032_v40 }
  0x38   :  { %479 = vmatmul.mubr.bf16.gmra.mxu1 %v2033_v42  ;;  %1942 = vmatprep.mubr.msk.bf16.mxu0 %vm382_vm0, %v2036_v43 }
  0x39   :  { %1939 = vmatpush3.bf16.msra.mxu0 %v2353_v41  ;;  %1753 = vmatpush3.bf16.msra.mxu1 %v2204_v10 }
  0x3a   :  { %1940 = vmatprep.subr.bf16.mxu0 %v2362_v44  ;;  %1754 = vmatprep.subr.bf16.mxu1 %v2216_v12 }
  0x3b   :  { %637 = vmatprep.mubr.bf16.mxu1 %v2040_v45 }
  0x3d   :  { %1941 = vmatpush3.bf16.msra.mxu0 %v2362_v44  ;;  %1755 = vmatpush3.bf16.msra.mxu1 %v2228_v14 }
  0x3e   :  { %1756 = vmatprep.subr.bf16.mxu1 %v2240_v16  ;;  %1776 = vmatprep.subr.bf16.mxu0 %v2150_v1 }
  0x40   :  { %1943 = vmatmul.mubr.msk.bf16.vlgmr.msra.gmra.mxu0 %vm382_vm0, %v2037_v46 }
  0x41   :  { %1757 = vmatpush3.bf16.msra.mxu1 %v2252_v18  ;;  %1777 = vmatpush3.bf16.msra.mxu0 %v2162_v3 }
  0x42   :  { %1758 = vmatprep.subr.bf16.mxu1 %v2264_v20  ;;  %1778 = vmatprep.subr.bf16.mxu0 %v2174_v5 }
  0x43   :  { %686 = vmatprep.mubr.bf16.mxu0 %v2046_v47 }
  0x45   :  { %1759 = vmatpush3.bf16.msra.mxu1 %v2276_v22  ;;  %1779 = vmatpush3.bf16.msra.mxu0 %v2186_v7 }
  0x46   :  { %1760 = vmatprep.subr.bf16.mxu1 %v2288_v24  ;;  %1780 = vmatprep.subr.bf16.mxu0 %v2198_v9 }
  0x49   :  { %1761 = vmatpush3.bf16.msra.mxu1 %v2300_v26  ;;  %1781 = vmatpush3.bf16.msra.mxu0 %v2210_v11 }
  0x4a   :  { %1762 = vmatprep.subr.bf16.mxu1 %v2312_v28  ;;  %1782 = vmatprep.subr.bf16.mxu0 %v2222_v13 }
  0x4d   :  { %1763 = vmatpush3.bf16.msra.mxu1 %v2324_v30  ;;  %1783 = vmatpush3.bf16.msra.mxu0 %v2234_v15 }
  0x4e   :  { %1784 = vmatprep.subr.bf16.mxu0 %v2246_v17  ;;  %1946 = vmatprep.subr.bf16.mxu1 %v2338_v36 }
  0x50   :  { %638 = vmatmul.mubr.bf16.vlgmr.msra.gmra.mxu1 %v2038_v48 }
  0x51   :  { %1785 = vmatpush3.bf16.msra.mxu0 %v2258_v19  ;;  %1947 = vmatpush3.bf16.msra.mxu1 %v2338_v36 }
  0x52   :  { %1786 = vmatprep.subr.bf16.mxu0 %v2270_v21  ;;  %1948 = vmatprep.subr.bf16.mxu1 %v2343_v37 }
  0x53   :  { %645 = vmatprep.mubr.bf16.mxu1 %v2041_v49 }
  0x55   :  { %1787 = vmatpush3.bf16.msra.mxu0 %v2282_v23  ;;  %1949 = vmatpush3.bf16.msra.mxu1 %v2343_v37 }
  0x56   :  { %1788 = vmatprep.subr.bf16.mxu0 %v2294_v25  ;;  %1950 = vmatprep.subr.bf16.mxu1 %v2353_v41 }
  0x58   :  { %646 = vmatmul.mubr.bf16.gmra.mxu1 %v2043_v50 }
  0x59   :  { %1789 = vmatpush3.bf16.msra.mxu0 %v2306_v27  ;;  %1951 = vmatpush3.bf16.msra.mxu1 %v2353_v41 }
  0x5a   :  { %1790 = vmatprep.subr.bf16.mxu0 %v2318_v29  ;;  %1952 = vmatprep.subr.bf16.mxu1 %v2362_v44 }
  0x5b   :  { %1954 = vmatprep.mubr.msk.bf16.mxu1 %vm382_vm0, %v2047_v51 }
  0x5d   :  { %1791 = vmatpush3.bf16.msra.mxu0 %v2330_v31  ;;  %1953 = vmatpush3.bf16.msra.mxu1 %v2362_v44 }
  0x5e   :  { %1810 = vmatprep.subr.bf16.mxu0 %v2145_v0  ;;  %1838 = vmatprep.subr.bf16.mxu1 %v2150_v1 }
  0x60   :  { %687 = vmatmul.mubr.bf16.vlgmr.msra.gmra.mxu0 %v2044_v52  ;;  %1955 = vmatmul.mubr.msk.bf16.vlgmr.msra.gmra.mxu1 %vm382_vm0, %v2048_v53 }
  0x61   :  { %1811 = vmatpush3.bf16.msra.mxu0 %v2156_v2  ;;  %1839 = vmatpush3.bf16.msra.mxu1 %v2162_v3 }
  0x62   :  { %1812 = vmatprep.subr.bf16.mxu0 %v2168_v4  ;;  %1840 = vmatprep.subr.bf16.mxu1 %v2174_v5 }
  0x63   :  { %694 = vmatprep.mubr.bf16.mxu0 %v2049_v54  ;;  %902 = vmatprep.mubr.bf16.mxu1 %v2057_v55 }
  0x65   :  { %1813 = vmatpush3.bf16.msra.mxu0 %v2180_v6  ;;  %1841 = vmatpush3.bf16.msra.mxu1 %v2186_v7 }
  0x66   :  { %1814 = vmatprep.subr.bf16.mxu0 %v2192_v8  ;;  %1842 = vmatprep.subr.bf16.mxu1 %v2198_v9 }
  0x68   :  { %695 = vmatmul.mubr.bf16.gmra.mxu0 %v2051_v56 }
  0x69   :  { %1815 = vmatpush3.bf16.msra.mxu0 %v2204_v10  ;;  %1843 = vmatpush3.bf16.msra.mxu1 %v2210_v11 }
  0x6a   :  { %1816 = vmatprep.subr.bf16.mxu0 %v2216_v12  ;;  %1844 = vmatprep.subr.bf16.mxu1 %v2222_v13 }
  0x6b   :  { %853 = vmatprep.mubr.bf16.mxu0 %v2054_v57 }
  0x6d   :  { %1817 = vmatpush3.bf16.msra.mxu0 %v2228_v14  ;;  %1845 = vmatpush3.bf16.msra.mxu1 %v2234_v15 }
  0x6e   :  { %1818 = vmatprep.subr.bf16.mxu0 %v2240_v16  ;;  %1846 = vmatprep.subr.bf16.mxu1 %v2246_v17 }
  0x71   :  { %1819 = vmatpush3.bf16.msra.mxu0 %v2252_v18  ;;  %1847 = vmatpush3.bf16.msra.mxu1 %v2258_v19 }
  0x72   :  { %1820 = vmatprep.subr.bf16.mxu0 %v2264_v20  ;;  %1848 = vmatprep.subr.bf16.mxu1 %v2270_v21 }
  0x75   :  { %1821 = vmatpush3.bf16.msra.mxu0 %v2276_v22  ;;  %1849 = vmatpush3.bf16.msra.mxu1 %v2282_v23 }
  0x76   :  { %1822 = vmatprep.subr.bf16.mxu0 %v2288_v24  ;;  %1850 = vmatprep.subr.bf16.mxu1 %v2294_v25 }
  0x79   :  { %1823 = vmatpush3.bf16.msra.mxu0 %v2300_v26  ;;  %1851 = vmatpush3.bf16.msra.mxu1 %v2306_v27 }
  0x7a   :  { %1824 = vmatprep.subr.bf16.mxu0 %v2312_v28  ;;  %1852 = vmatprep.subr.bf16.mxu1 %v2318_v29 }
  0x7d   :  { %1825 = vmatpush3.bf16.msra.mxu0 %v2324_v30  ;;  %1853 = vmatpush3.bf16.msra.mxu1 %v2330_v31 }
  0x7e   :  { %1958 = vmatprep.subr.bf16.mxu0 %v2338_v36  ;;  %1872 = vmatprep.subr.bf16.mxu1 %v2145_v0  ;;  %v2064_v0 = vld [vmem:[#allocation2 + $0xb0] ss:$20 sps:$4 sm:$0xff]  }
  0x80   :  { %854 = vmatmul.mubr.bf16.vlgmr.msra.gmra.mxu0 %v2052_v58  ;;  %903 = vmatmul.mubr.bf16.vlgmr.msra.gmra.mxu1 %v2055_v59 }
  0x81   :  { %1959 = vmatpush3.bf16.msra.mxu0 %v2338_v36  ;;  %1873 = vmatpush3.bf16.msra.mxu1 %v2156_v2  ;;  %v2065_v2 = vld [vmem:[#allocation2 + $0xd8] ss:$20 sps:$4 sm:$0xff]  }
  0x82   :  { %1960 = vmatprep.subr.bf16.mxu0 %v2343_v37  ;;  %1874 = vmatprep.subr.bf16.mxu1 %v2168_v4  ;;  %v2074_v4 = vld [vmem:[#allocation2 + $0xfc] ss:$20 sps:$4 sm:$0xff]  }
  0x83   :  { %861 = vmatprep.mubr.bf16.mxu0 %v2058_v60  ;;  %910 = vmatprep.mubr.bf16.mxu1 %v2060_v61 }
  0x85   :  { %1961 = vmatpush3.bf16.msra.mxu0 %v2343_v37  ;;  %1875 = vmatpush3.bf16.msra.mxu1 %v2180_v6  ;;  %v2075_v6 = vld [vmem:[#allocation2 + $0x100] ss:$20 sps:$4 sm:$0xff]  }
  0x86   :  { %1962 = vmatprep.subr.bf16.mxu0 %v2353_v41  ;;  %1876 = vmatprep.subr.bf16.mxu1 %v2192_v8  ;;  %v2076_v8 = vld [vmem:[#allocation2 + $0x128] ss:$20 sps:$4 sm:$0xff]  }
  0x88   :  { %862 = vmatmul.mubr.bf16.gmra.mxu0 %v2062_v62  ;;  %911 = vmatmul.mubr.bf16.gmra.mxu1 %v2063_v63 }
  0x89   :  { %1963 = vmatpush3.bf16.msra.mxu0 %v2353_v41  ;;  %1877 = vmatpush3.bf16.msra.mxu1 %v2204_v10  ;;  %v2079_v10 = vld [vmem:[#allocation2 + $0x120] ss:$20 sps:$4 sm:$0xff]  }
  0x8a   :  { %1964 = vmatprep.subr.bf16.mxu0 %v2362_v44  ;;  %1878 = vmatprep.subr.bf16.mxu1 %v2216_v12 }
  0x8b   :  { %1966 = vmatprep.mubr.msk.bf16.mxu0 %vm382_vm0, %v2064_v0  ;;  %1069 = vmatprep.mubr.bf16.mxu1 %v2068_v32 }
  0x8d   :  { %1965 = vmatpush3.bf16.msra.mxu0 %v2362_v44  ;;  %1879 = vmatpush3.bf16.msra.mxu1 %v2228_v14 }
  0x8e   :  { %1880 = vmatprep.subr.bf16.mxu1 %v2240_v16  ;;  %1900 = vmatprep.subr.bf16.mxu0 %v2150_v1  ;;  %v2066_v1 = vld [vmem:[#allocation2 + $0xf0] ss:$20 sps:$4 sm:$0xff]  }
  0x90   :  { %1967 = vmatmul.mubr.msk.bf16.vlgmr.msra.gmra.mxu0 %vm382_vm0, %v2065_v2 }
  0x91   :  { %1881 = vmatpush3.bf16.msra.mxu1 %v2252_v18  ;;  %1901 = vmatpush3.bf16.msra.mxu0 %v2162_v3  ;;  %v2069_v3 = vld [vmem:[#allocation2 + $0x11c] ss:$20 sps:$4 sm:$0xff]  }
  0x92   :  { %1882 = vmatprep.subr.bf16.mxu1 %v2264_v20  ;;  %1902 = vmatprep.subr.bf16.mxu0 %v2174_v5  ;;  %v2071_v5 = vld [vmem:[#allocation2 + $0x118] ss:$20 sps:$4 sm:$0xff]  }
  0x93   :  { %1118 = vmatprep.mubr.bf16.mxu0 %v2074_v4 }
  0x95   :  { %1883 = vmatpush3.bf16.msra.mxu1 %v2276_v22  ;;  %1903 = vmatpush3.bf16.msra.mxu0 %v2186_v7  ;;  %v2072_v7 = vld [vmem:[#allocation2 + $0xf8] ss:$20 sps:$4 sm:$0xff]  }
  0x96   :  { %1884 = vmatprep.subr.bf16.mxu1 %v2288_v24  ;;  %1904 = vmatprep.subr.bf16.mxu0 %v2198_v9  ;;  %v2077_v9 = vld [vmem:[#allocation2 + $0x124] ss:$20 sps:$4 sm:$0xff]  }
  0x99   :  { %1885 = vmatpush3.bf16.msra.mxu1 %v2300_v26  ;;  %1905 = vmatpush3.bf16.msra.mxu0 %v2210_v11 }
  0x9a   :  { %1886 = vmatprep.subr.bf16.mxu1 %v2312_v28  ;;  %1906 = vmatprep.subr.bf16.mxu0 %v2222_v13 }
  0x9d   :  { %1887 = vmatpush3.bf16.msra.mxu1 %v2324_v30  ;;  %1907 = vmatpush3.bf16.msra.mxu0 %v2234_v15 }
  0x9e   :  { %1908 = vmatprep.subr.bf16.mxu0 %v2246_v17  ;;  %1970 = vmatprep.subr.bf16.mxu1 %v2338_v36 }
  0xa0   :  { %1070 = vmatmul.mubr.bf16.vlgmr.msra.gmra.mxu1 %v2066_v1 }
  0xa1   :  { %1909 = vmatpush3.bf16.msra.mxu0 %v2258_v19  ;;  %1971 = vmatpush3.bf16.msra.mxu1 %v2338_v36 }
  0xa2   :  { %1910 = vmatprep.subr.bf16.mxu0 %v2270_v21  ;;  %1972 = vmatprep.subr.bf16.mxu1 %v2343_v37 }
  0xa3   :  { %1077 = vmatprep.mubr.bf16.mxu1 %v2069_v3 }
  0xa5   :  { %1911 = vmatpush3.bf16.msra.mxu0 %v2282_v23  ;;  %1973 = vmatpush3.bf16.msra.mxu1 %v2343_v37 }
  0xa6   :  { %1912 = vmatprep.subr.bf16.mxu0 %v2294_v25  ;;  %1974 = vmatprep.subr.bf16.mxu1 %v2353_v41 }
  0xa8   :  { %1078 = vmatmul.mubr.bf16.gmra.mxu1 %v2071_v5 }
  0xa9   :  { %1913 = vmatpush3.bf16.msra.mxu0 %v2306_v27  ;;  %1975 = vmatpush3.bf16.msra.mxu1 %v2353_v41 }
  0xaa   :  { %1914 = vmatprep.subr.bf16.mxu0 %v2318_v29  ;;  %1976 = vmatprep.subr.bf16.mxu1 %v2362_v44 }
  0xab   :  { %1978 = vmatprep.mubr.msk.bf16.mxu1 %vm382_vm0, %v2075_v6 }
  0xad   :  { %1915 = vmatpush3.bf16.msra.mxu0 %v2330_v31  ;;  %1977 = vmatpush3.bf16.msra.mxu1 %v2362_v44 }
  0xb0   :  { %1119 = vmatmul.mubr.bf16.vlgmr.msra.gmra.mxu0 %v2072_v7  ;;  %1979 = vmatmul.mubr.msk.bf16.vlgmr.msra.gmra.mxu1 %vm382_vm0, %v2076_v8 }
  0xb1   :  { %1126 = vmatprep.mubr.bf16.mxu0 %v2077_v9 }
  0xb8   :  { %1127 = vmatmul.mubr.bf16.gmra.mxu0 %v2079_v10 }
  0xef   :  { %v1702_v11 = vpop.f32.mrf.mxu0 }
  0xf0   :  { %v1730_v12 = vpop.f32.mrf.mxu1 }
  0xf1   :  { %v1703_v13 = vpop.f32.mrf.mxu0 }
  0xf2   :  { %v1731_v14 = vpop.f32.mrf.mxu1  ;;  %v1704_v27 = vadd.f32 %v1703_v13, %v1702_v11 }
  0xf3   :  { %v1705_v15 = vpop.f32.mrf.mxu0  ;;  %v1732_v28 = vadd.f32 %v1731_v14, %v1730_v12 }
  0xf4   :  { %v1733_v16 = vpop.f32.mrf.mxu1 }
  0xf5   :  { %v1706_v17 = vpop.f32.mrf.mxu0  ;;  %v473_v39 = vadd.f32 %v1732_v28, %v1704_v27 }
  0xf6   :  { %v1734_v18 = vpop.f32.mrf.mxu1  ;;  %v1707_v36 = vadd.f32 %v1706_v17, %v1705_v15 }
  0xf7   :  { %v1708_v19 = vpop.f32.mrf.mxu0  ;;  %v1735_v37 = vadd.f32 %v1734_v18, %v1733_v16 }
  0xf8   :  { %v1736_v20 = vpop.f32.mrf.mxu1 }
  0xf9   :  { %v1709_v21 = vpop.f32.mrf.mxu0  ;;  %v476_v46 = vadd.f32 %v1735_v37, %v1707_v36 }
  0xfa   :  { %v1737_v22 = vpop.f32.mrf.mxu1  ;;  %v1710_v23 = vadd.f32 %v1709_v21, %v1708_v19 }
  0xfb   :  { %v1738_v24 = vadd.f32 %v1737_v22, %v1736_v20  ;;  %v1711_v25 = vpop.f32.mrf.mxu0 }
  0xfc   :  { %v1739_v26 = vpop.f32.mrf.mxu1 }
  0xfd   :  { %v1712_v29 = vpop.f32.mrf.mxu0  ;;  %v481_v34 = vadd.f32 %v1738_v24, %v1710_v23 }
  0xfe   :  { %v1740_v30 = vpop.f32.mrf.mxu1  ;;  %v1713_v31 = vadd.f32 %v1712_v29, %v1711_v25 }
  0xff   :  { %v1741_v33 = vadd.f32 %v1740_v30, %v1739_v26 }
 0x100   :  { %v1944_v35 = vpop.f32.mrf.mxu0 }
 0x101   :  { %v2490_v38 = vadd.f32 %v1944_v35, %v481_v34  ;;  %v484_v42 = vadd.f32 %v1741_v33, %v1713_v31 }
 0x102   :  { %v521_v40 = vpop.f32.mrf.mxu0 }
 0x103   :  { %v2492_v41 = vadd.f32 %v521_v40, %v473_v39  ;;  %v1191_v43 = vsel %vm1184_vm1, %v2490_v38, 0.0 }
 0x104   :  { %v1945_v44 = vpop.f32.mrf.mxu0  ;;  %1192 = vadd.xlane.f32.xlu1 %v1191_v43 }
 0x105   :  { %v2496_v45 = vadd.f32 %v1945_v44, %v484_v42  ;;  %v1185_v47 = vsel %vm1184_vm1, %v2492_v41, 0.0 }
 0x106   :  { %v524_v48 = vpop.f32.mrf.mxu0  ;;  %1186 = vadd.xlane.f32.xlu0 %v1185_v47 }
 0x107   :  { %v2500_v49 = vadd.f32 %v524_v48, %v476_v46  ;;  %v1194_v50 = vsel %vm1184_vm1, %v2496_v45, 0.0 }
 0x108   :  { %1195 = vadd.xlane.f32.xlu1 %v1194_v50 }
 0x109   :  { %v1188_v51 = vsel %vm1184_vm1, %v2500_v49, 0.0 }
 0x10a   :  { %1189 = vadd.xlane.f32.xlu0 %v1188_v51 }
 0x110   :  { %v1764_v52 = vpop.f32.mrf.mxu1 }
 0x112   :  { %v1765_v53 = vpop.f32.mrf.mxu1 }
 0x113   :  { %v1766_v0 = vadd.f32 %v1765_v53, %v1764_v52 }
 0x114   :  { %v1767_v54 = vpop.f32.mrf.mxu1 }
 0x116   :  { %v1768_v55 = vpop.f32.mrf.mxu1 }
 0x117   :  { %v1769_v5 = vadd.f32 %v1768_v55, %v1767_v54 }
 0x118   :  { %v1770_v56 = vpop.f32.mrf.mxu1 }
 0x11a   :  { %v1771_v57 = vpop.f32.mrf.mxu1 }
 0x11b   :  { %v1772_v13 = vadd.f32 %v1771_v57, %v1770_v56 }
 0x11c   :  { %v1773_v58 = vpop.f32.mrf.mxu1 }
 0x11e   :  { %v1774_v59 = vpop.f32.mrf.mxu1 }
 0x11f   :  { %v1775_v20 = vadd.f32 %v1774_v59, %v1773_v58 }
 0x120   :  { %v1792_v60 = vpop.f32.mrf.mxu0  ;;  %v1956_v61 = vpop.f32.mrf.mxu1 }
 0x122   :  { %v1793_v62 = vpop.f32.mrf.mxu0  ;;  %v737_v63 = vpop.f32.mrf.mxu1 }
 0x123   :  { %v1794_v32 = vadd.f32 %v1793_v62, %v1792_v60 }
 0x124   :  { %v1795_v2 = vpop.f32.mrf.mxu0  ;;  %v1957_v1 = vpop.f32.mrf.mxu1 }
 0x125   :  { %v689_v4 = vadd.f32 %v1794_v32, %v1766_v0 }
 0x126   :  { %v1796_v3 = vpop.f32.mrf.mxu0  ;;  %v740_v11 = vpop.f32.mrf.mxu1 }
 0x127   :  { %v2506_v6 = vadd.f32 %v737_v63, %v689_v4  ;;  %v1797_v7 = vadd.f32 %v1796_v3, %v1795_v2 }
 0x128   :  { %v1798_v8 = vpop.f32.mrf.mxu0 }
 0x129   :  { %v692_v9 = vadd.f32 %v1797_v7, %v1769_v5  ;;  %v1201_v10 = vsel %vm1184_vm1, %v2506_v6, 0.0 }
 0x12a   :  { %v1799_v12 = vpop.f32.mrf.mxu0  ;;  %1202 = vadd.xlane.f32.xlu0 %v1201_v10 }
 0x12b   :  { %v2510_v14 = vadd.f32 %v740_v11, %v692_v9  ;;  %v1800_v15 = vadd.f32 %v1799_v12, %v1798_v8 }
 0x12c   :  { %v1801_v16 = vpop.f32.mrf.mxu0 }
 0x12d   :  { %v697_v17 = vadd.f32 %v1800_v15, %v1772_v13  ;;  %v1204_v18 = vsel %vm1184_vm1, %v2510_v14, 0.0 }
 0x12e   :  { %v1802_v19 = vpop.f32.mrf.mxu0  ;;  %1205 = vadd.xlane.f32.xlu1 %v1204_v18 }
 0x12f   :  { %v2514_v21 = vadd.f32 %v1956_v61, %v697_v17  ;;  %v1803_v22 = vadd.f32 %v1802_v19, %v1801_v16 }
 0x131   :  { %v700_v23 = vadd.f32 %v1803_v22, %v1775_v20  ;;  %v1207_v24 = vsel %vm1184_vm1, %v2514_v21, 0.0 }
 0x132   :  { %1208 = vadd.xlane.f32.xlu0 %v1207_v24 }
 0x133   :  { %v2518_v25 = vadd.f32 %v1957_v1, %v700_v23 }
 0x135   :  { %v1210_v26 = vsel %vm1184_vm1, %v2518_v25, 0.0 }
 0x136   :  { %1211 = vadd.xlane.f32.xlu1 %v1210_v26 }
 0x140   :  { %v1826_v27 = vpop.f32.mrf.mxu0  ;;  %v1854_v28 = vpop.f32.mrf.mxu1 }
 0x142   :  { %v1827_v29 = vpop.f32.mrf.mxu0  ;;  %v1855_v30 = vpop.f32.mrf.mxu1 }
 0x143   :  { %v1828_v47 = vadd.f32 %v1827_v29, %v1826_v27  ;;  %v1856_v48 = vadd.f32 %v1855_v30, %v1854_v28 }
 0x144   :  { %v1829_v31 = vpop.f32.mrf.mxu0  ;;  %v1857_v33 = vpop.f32.mrf.mxu1 }
 0x145   :  { %v905_v59 = vadd.f32 %v1856_v48, %v1828_v47 }
 0x146   :  { %v1830_v34 = vpop.f32.mrf.mxu0  ;;  %v1858_v35 = vpop.f32.mrf.mxu1 }
 0x147   :  { %v1831_v56 = vadd.f32 %v1830_v34, %v1829_v31  ;;  %v1859_v57 = vadd.f32 %v1858_v35, %v1857_v33 }
 0x148   :  { %v1832_v36 = vpop.f32.mrf.mxu0  ;;  %v1860_v37 = vpop.f32.mrf.mxu1 }
 0x149   :  { %v908_v2 = vadd.f32 %v1859_v57, %v1831_v56 }
 0x14a   :  { %v1833_v39 = vpop.f32.mrf.mxu0  ;;  %v1861_v40 = vpop.f32.mrf.mxu1 }
 0x14b   :  { %v1834_v42 = vadd.f32 %v1833_v39, %v1832_v36  ;;  %v1862_v43 = vadd.f32 %v1861_v40, %v1860_v37 }
 0x14c   :  { %v1835_v44 = vpop.f32.mrf.mxu0  ;;  %v1863_v46 = vpop.f32.mrf.mxu1 }
 0x14d   :  { %v913_v54 = vadd.f32 %v1862_v43, %v1834_v42 }
 0x14e   :  { %v1836_v50 = vpop.f32.mrf.mxu0  ;;  %v1864_v51 = vpop.f32.mrf.mxu1 }
 0x14f   :  { %v1837_v52 = vadd.f32 %v1836_v50, %v1835_v44  ;;  %v1865_v53 = vadd.f32 %v1864_v51, %v1863_v46 }
 0x150   :  { %v1968_v55 = vpop.f32.mrf.mxu0 }
 0x151   :  { %v2522_v58 = vadd.f32 %v1968_v55, %v913_v54  ;;  %v916_v62 = vadd.f32 %v1865_v53, %v1837_v52 }
 0x152   :  { %v953_v60 = vpop.f32.mrf.mxu0 }
 0x153   :  { %v2524_v61 = vadd.f32 %v953_v60, %v905_v59  ;;  %v1223_v63 = vsel %vm1184_vm1, %v2522_v58, 0.0 }
 0x154   :  { %v1969_v0 = vpop.f32.mrf.mxu0  ;;  %1224 = vadd.xlane.f32.xlu0 %v1223_v63 }
 0x155   :  { %v2528_v32 = vadd.f32 %v1969_v0, %v916_v62  ;;  %v1217_v5 = vsel %vm1184_vm1, %v2524_v61, 0.0 }
 0x156   :  { %v956_v4 = vpop.f32.mrf.mxu0 }
 0x157   :  { %v2530_v1 = vadd.f32 %v956_v4, %v908_v2  ;;  %v1226_v3 = vsel %vm1184_vm1, %v2528_v32, 0.0 }
 0x158   :  { %1227 = vadd.xlane.f32.xlu1 %v1226_v3  ;;  %1218 = vadd.xlane.f32.xlu0 %v1217_v5 }
 0x159   :  { %v1220_v7 = vsel %vm1184_vm1, %v2530_v1, 0.0 }
 0x15c   :  { %1221 = vadd.xlane.f32.xlu1 %v1220_v7 }
 0x160   :  { %v1888_v8 = vpop.f32.mrf.mxu1 }
 0x162   :  { %v1889_v9 = vpop.f32.mrf.mxu1 }
 0x163   :  { %v1890_v22 = vadd.f32 %v1889_v9, %v1888_v8 }
 0x164   :  { %v1891_v10 = vpop.f32.mrf.mxu1 }
 0x166   :  { %v1892_v11 = vpop.f32.mrf.mxu1 }
 0x167   :  { %v1893_v29 = vadd.f32 %v1892_v11, %v1891_v10 }
 0x168   :  { %v1894_v12 = vpop.f32.mrf.mxu1 }
 0x16a   :  { %v1895_v13 = vpop.f32.mrf.mxu1 }
 0x16b   :  { %v1896_v39 = vadd.f32 %v1895_v13, %v1894_v12 }
 0x16c   :  { %v1897_v15 = vpop.f32.mrf.mxu1 }
 0x16e   :  { %v1898_v16 = vpop.f32.mrf.mxu1 }
 0x16f   :  { %v1899_v48 = vadd.f32 %v1898_v16, %v1897_v15 }
 0x170   :  { %v1916_v17 = vpop.f32.mrf.mxu0  ;;  %v1980_v18 = vpop.f32.mrf.mxu1 }
 0x172   :  { %v1917_v19 = vpop.f32.mrf.mxu0  ;;  %v1169_v20 = vpop.f32.mrf.mxu1 }
 0x173   :  { %v1918_v23 = vadd.f32 %v1917_v19, %v1916_v17 }
 0x174   :  { %v1919_v24 = vpop.f32.mrf.mxu0  ;;  %v1981_v27 = vpop.f32.mrf.mxu1 }
 0x175   :  { %v1121_v26 = vadd.f32 %v1918_v23, %v1890_v22 }
 0x176   :  { %v1920_v28 = vpop.f32.mrf.mxu0  ;;  %v1172_v36 = vpop.f32.mrf.mxu1 }
 0x177   :  { %v2538_v30 = vadd.f32 %v1169_v20, %v1121_v26  ;;  %v1921_v31 = vadd.f32 %v1920_v28, %v1919_v24 }
 0x178   :  { %v1922_v33 = vpop.f32.mrf.mxu0 }
 0x179   :  { %v1124_v34 = vadd.f32 %v1921_v31, %v1893_v29  ;;  %v1233_v35 = vsel %vm1184_vm1, %v2538_v30, 0.0 }
 0x17a   :  { %v1923_v37 = vpop.f32.mrf.mxu0  ;;  %1234 = vadd.xlane.f32.xlu0 %v1233_v35 }
 0x17b   :  { %v2542_v40 = vadd.f32 %v1172_v36, %v1124_v34  ;;  %v1924_v42 = vadd.f32 %v1923_v37, %v1922_v33 }
 0x17c   :  { %v1925_v43 = vpop.f32.mrf.mxu0 }
 0x17d   :  { %v1129_v44 = vadd.f32 %v1924_v42, %v1896_v39  ;;  %v1236_v46 = vsel %vm1184_vm1, %v2542_v40, 0.0 }
 0x17e   :  { %v1926_v47 = vpop.f32.mrf.mxu0  ;;  %1237 = vadd.xlane.f32.xlu1 %v1236_v46 }
 0x17f   :  { %v2546_v50 = vadd.f32 %v1980_v18, %v1129_v44  ;;  %v1927_v51 = vadd.f32 %v1926_v47, %v1925_v43 }
 0x181   :  { %v1132_v52 = vadd.f32 %v1927_v51, %v1899_v48  ;;  %v1239_v53 = vsel %vm1184_vm1, %v2546_v50, 0.0 }
 0x182   :  { %1240 = vadd.xlane.f32.xlu0 %v1239_v53 }
 0x183   :  { %v2550_v54 = vadd.f32 %v1981_v27, %v1132_v52 }
 0x185   :  { %v1242_v55 = vsel %vm1184_vm1, %v2550_v54, 0.0 }
 0x186   :  { %1243 = vadd.xlane.f32.xlu1 %v1242_v55 }
 0x18d   :  { %v1193_v57 = vpop.xlane.xlu1 %1192 }
 0x18f   :  { %v1187_v56 = vpop.xlane.xlu0 %1186 }
 0x191   :  { %v1196_v60 = vpop.xlane.xlu1 %1195 }
 0x193   :  { %v1190_v59 = vpop.xlane.xlu0 %1189 }
 0x1b3   :  { %v1203_v62 = vpop.xlane.xlu0 %1202 }
 0x1b4   :  { %v1213_v7 = vadd.f32 %v1203_v62, %v1187_v56 }
 0x1b7   :  { %v1206_v63 = vpop.xlane.xlu1 %1205 }
 0x1b8   :  { %v1214_v11 = vadd.f32 %v1206_v63, %v1190_v59 }
 0x1bb   :  { %v1209_v0 = vpop.xlane.xlu0 %1208 }
 0x1bc   :  { %v1215_v17 = vadd.f32 %v1209_v0, %v1193_v57 }
 0x1bf   :  { %v1212_v2 = vpop.xlane.xlu1 %1211 }
 0x1c0   :  { %v1216_v29 = vadd.f32 %v1212_v2, %v1196_v60 }
 0x1dd   :  { %v1225_v4 = vpop.xlane.xlu0 %1224 }
 0x1de   :  { %v1231_v22 = vadd.f32 %v1225_v4, %v1215_v17 }
 0x1e1   :  { %v1228_v3 = vpop.xlane.xlu1 %1227  ;;  %v1219_v5 = vpop.xlane.xlu0 %1218 }
 0x1e2   :  { %v1229_v8 = vadd.f32 %v1219_v5, %v1213_v7  ;;  %v1232_v36 = vadd.f32 %v1228_v3, %v1216_v29 }
 0x1e5   :  { %v1222_v9 = vpop.xlane.xlu1 %1221 }
 0x1e6   :  { %v1230_v13 = vadd.f32 %v1222_v9, %v1214_v11 }
 0x203   :  { %v1235_v10 = vpop.xlane.xlu0 %1234 }
 0x204   :  { %v1245_v12 = vadd.f32 %v1235_v10, %v1229_v8 }
 0x206   :  { %v2554_v15 = vmul.f32 0.03125, %v1245_v12 }
 0x207   :  { %v1238_v16 = vpop.xlane.xlu1 %1237 }
 0x208   :  { %v1246_v18 = vadd.f32 %v1238_v16, %v1230_v13  ;;  %v1253_v19 = vsub.f32 %v2492_v41, %v2554_v15  ;;  %v1277_v20 = vsub.f32 %v2506_v6, %v2554_v15  ;;  %v1301_v28 = vsub.f32 %v2524_v61, %v2554_v15 }
 0x209   :  { %v1325_v46 = vsub.f32 %v2538_v30, %v2554_v15 }
 0x20a   :  { %v2560_v23 = vmul.f32 0.03125, %v1246_v18  ;;  %v1257_v24 = vmul.f32 %v1253_v19, %v1253_v19  ;;  %v1281_v27 = vmul.f32 %v1277_v20, %v1277_v20  ;;  %v1305_v43 = vmul.f32 %v1301_v28, %v1301_v28 }
 0x20b   :  { %v1241_v26 = vpop.xlane.xlu0 %1240  ;;  %v1329_v55 = vmul.f32 %v1325_v46, %v1325_v46 }
 0x20c   :  { %v1247_v31 = vadd.f32 %v1241_v26, %v1231_v22  ;;  %v1261_v33 = vsel %vm1184_vm1, %v1257_v24, 0.0  ;;  %v1254_v34 = vsub.f32 %v2500_v49, %v2560_v23  ;;  %v1278_v35 = vsub.f32 %v2510_v14, %v2560_v23 }
 0x20d   :  { %1262 = vadd.xlane.f32.xlu0 %v1261_v33  ;;  %v1285_v42 = vsel %vm1184_vm1, %v1281_v27, 0.0  ;;  %v1302_v44 = vsub.f32 %v2530_v1, %v2560_v23  ;;  %v1309_v53 = vsel %vm1184_vm1, %v1305_v43, 0.0  ;;  %v1326_v56 = vsub.f32 %v2542_v40, %v2560_v23 }
 0x20e   :  { %v1258_v37 = vmul.f32 %v1254_v34, %v1254_v34  ;;  %v2574_v47 = vmul.f32 0.03125, %v1247_v31  ;;  %v1282_v52 = vmul.f32 %v1278_v35, %v1278_v35  ;;  %v1333_v63 = vsel %vm1184_vm1, %v1329_v55, 0.0 }
 0x20f   :  { %v1244_v39 = vpop.xlane.xlu1 %1243  ;;  %v1306_v60 = vmul.f32 %v1302_v44, %v1302_v44  ;;  %v1330_v0 = vmul.f32 %v1326_v56, %v1326_v56  ;;  %v2113_v35 = vmov 0  }
 0x210   :  { %v1248_v48 = vadd.f32 %v1244_v39, %v1232_v36  ;;  %v1264_v51 = vsel %vm1184_vm1, %v1258_v37, 0.0  ;;  %v1288_v59 = vsel %vm1184_vm1, %v1282_v52, 0.0  ;;  %v1255_v62 = vsub.f32 %v2490_v38, %v2574_v47  ;;  %1986 = vset.pattern.permute.xlu0 %v2113_v35  ;;  %1987 = vset.pattern.permute.xlu1 %v2113_v35  ;;  %v1369_v35 = vld [vmem:[%s2721_s3] sm:$0xff] }
 0x211   :  { %1265 = vadd.xlane.f32.xlu1 %v1264_v51  ;;  %1286 = vadd.xlane.f32.xlu0 %v1285_v42  ;;  %v1312_v2 = vsel %vm1184_vm1, %v1306_v60, 0.0  ;;  %v1279_v5 = vsub.f32 %v2514_v21, %v2574_v47  ;;  %v1336_v7 = vsel %vm1184_vm1, %v1330_v0, 0.0  ;;  %v1303_v8 = vsub.f32 %v2522_v58, %v2574_v47 }
 0x212   :  { %v2580_v57 = vmul.f32 0.03125, %v1248_v48  ;;  %v1259_v4 = vmul.f32 %v1255_v62, %v1255_v62  ;;  %v1327_v16 = vsub.f32 %v2546_v50, %v2574_v47 }
 0x213   :  { %v1283_v11 = vmul.f32 %v1279_v5, %v1279_v5  ;;  %v1307_v13 = vmul.f32 %v1303_v8, %v1303_v8 }
 0x214   :  { %v1256_v3 = vsub.f32 %v2496_v45, %v2580_v57  ;;  %v1267_v9 = vsel %vm1184_vm1, %v1259_v4, 0.0  ;;  %v1280_v12 = vsub.f32 %v2518_v25, %v2580_v57  ;;  %v1304_v20 = vsub.f32 %v2528_v32, %v2580_v57 }
 0x215   :  { %1289 = vadd.xlane.f32.xlu1 %v1288_v59  ;;  %1310 = vadd.xlane.f32.xlu0 %v1309_v53  ;;  %v1291_v18 = vsel %vm1184_vm1, %v1283_v11, 0.0  ;;  %v1315_v22 = vsel %vm1184_vm1, %v1307_v13, 0.0  ;;  %v1331_v27 = vmul.f32 %v1327_v16, %v1327_v16  ;;  %v1328_v28 = vsub.f32 %v2550_v54, %v2580_v57  ;;  %v1353_v16 = vld [vmem:[%s2720_s2] sm:$0xff] }
 0x216   :  { %v1260_v10 = vmul.f32 %v1256_v3, %v1256_v3  ;;  %v1284_v19 = vmul.f32 %v1280_v12, %v1280_v12  ;;  %v1308_v26 = vmul.f32 %v1304_v20, %v1304_v20 }
 0x217   :  { %v1339_v31 = vsel %vm1184_vm1, %v1331_v27, 0.0  ;;  %v1332_v33 = vmul.f32 %v1328_v28, %v1328_v28  ;;  %v1354_v27 = vld [vmem:[%s2720_s2 + $0x8] sm:$0xff] }
 0x218   :  { %v1270_v17 = vsel %vm1184_vm1, %v1260_v10, 0.0  ;;  %v1294_v24 = vsel %vm1184_vm1, %v1284_v19, 0.0  ;;  %v1318_v29 = vsel %vm1184_vm1, %v1308_v26, 0.0 }
 0x219   :  { %1313 = vadd.xlane.f32.xlu1 %v1312_v2  ;;  %1334 = vadd.xlane.f32.xlu0 %v1333_v63  ;;  %v1342_v34 = vsel %vm1184_vm1, %v1332_v33, 0.0 }
 0x21d   :  { %1337 = vadd.xlane.f32.xlu1 %v1336_v7  ;;  %1268 = vadd.xlane.f32.xlu0 %v1267_v9 }
 0x221   :  { %1271 = vadd.xlane.f32.xlu1 %v1270_v17  ;;  %1292 = vadd.xlane.f32.xlu0 %v1291_v18 }
 0x225   :  { %1295 = vadd.xlane.f32.xlu1 %v1294_v24  ;;  %1316 = vadd.xlane.f32.xlu0 %v1315_v22 }
 0x229   :  { %1319 = vadd.xlane.f32.xlu1 %v1318_v29  ;;  %1340 = vadd.xlane.f32.xlu0 %v1339_v31 }
 0x22d   :  { %1343 = vadd.xlane.f32.xlu1 %v1342_v34 }
 0x296   :  { %v1263_v36 = vpop.xlane.xlu0 %1262 }
 0x29a   :  { %v1266_v37 = vpop.xlane.xlu1 %1265  ;;  %v1287_v39 = vpop.xlane.xlu0 %1286 }
 0x29b   :  { %v1297_v44 = vadd.f32 %v1287_v39, %v1263_v36 }
 0x29e   :  { %v1290_v42 = vpop.xlane.xlu1 %1289  ;;  %v1311_v43 = vpop.xlane.xlu0 %1310 }
 0x29f   :  { %v1321_v46 = vadd.f32 %v1311_v43, %v1297_v44  ;;  %v1298_v52 = vadd.f32 %v1290_v42, %v1266_v37  ;;  %v1355_v37 = vld [vmem:[%s2720_s2 + $0x10] sm:$0xff] }
 0x2a2   :  { %v1314_v48 = vpop.xlane.xlu1 %1313  ;;  %v1335_v51 = vpop.xlane.xlu0 %1334 }
 0x2a3   :  { %v1345_v53 = vadd.f32 %v1335_v51, %v1321_v46  ;;  %v1322_v55 = vadd.f32 %v1314_v48, %v1298_v52  ;;  %v1356_v48 = vld [vmem:[%s2720_s2 + $0x18] sm:$0xff] }
 0x2a5   :  { %v1349_v56 = vmul.f32 0.03125, %v1345_v53  ;;  %v1371_v53 = vld [vmem:[%s2721_s3 + $0x10] sm:$0xff] }
 0x2a6   :  { %v1338_v59 = vpop.xlane.xlu1 %1337  ;;  %v1269_v60 = vpop.xlane.xlu0 %1268 }
 0x2a7   :  { %v1357_v62 = vadd.f32 1e-05, %v1349_v56  ;;  %v1346_v63 = vadd.f32 %v1338_v59, %v1322_v55  ;;  %v1372_v56 = vld [vmem:[%s2721_s3 + $0x18] sm:$0xff] }
 0x2a9   :  { %2080 = vrsqrt.f32 %v1357_v62  ;;  %v1350_v0 = vmul.f32 0.03125, %v1346_v63 }
 0x2aa   :  { %v1272_v2 = vpop.xlane.xlu1 %1271  ;;  %v1293_v4 = vpop.xlane.xlu0 %1292 }
 0x2ab   :  { %v1358_v3 = vadd.f32 1e-05, %v1350_v0  ;;  %v1299_v8 = vadd.f32 %v1293_v4, %v1269_v60 }
 0x2ad   :  { %2082 = vrsqrt.f32 %v1358_v3 }
 0x2ae   :  { %v1296_v5 = vpop.xlane.xlu1 %1295  ;;  %v1317_v7 = vpop.xlane.xlu0 %1316 }
 0x2af   :  { %v1323_v9 = vadd.f32 %v1317_v7, %v1299_v8  ;;  %v1300_v12 = vadd.f32 %v1296_v5, %v1272_v2 }
 0x2b2   :  { %v1320_v10 = vpop.xlane.xlu1 %1319  ;;  %v1341_v11 = vpop.xlane.xlu0 %1340 }
 0x2b3   :  { %v1347_v13 = vadd.f32 %v1341_v11, %v1323_v9  ;;  %v1324_v17 = vadd.f32 %v1320_v10, %v1300_v12 }
 0x2b5   :  { %v1351_v18 = vmul.f32 0.03125, %v1347_v13 }
 0x2b6   :  { %v2081_v19 = vpop.eup %2080  ;;  %v1344_v20 = vpop.xlane.xlu1 %1343 }
 0x2b7   :  { %v1359_v22 = vadd.f32 1e-05, %v1351_v18  ;;  %v1348_v24 = vadd.f32 %v1344_v20, %v1324_v17  ;;  %v1365_v26 = vmul.f32 %v2081_v19, %v1353_v16 }
 0x2b9   :  { %2084 = vrsqrt.f32 %v1359_v22  ;;  %v1352_v28 = vmul.f32 0.03125, %v1348_v24  ;;  %1383 = vperm.xlu0 %1986, %v1365_v26   ;;  %v1373_v34 = vmul.f32 %v1365_v26, %v2554_v15  ;;  %v1370_v15 = vld [vmem:[%s2721_s3 + $0x8] sm:$0xff] }
 0x2ba   :  { %v2083_v29 = vpop.eup %2082 }
 0x2bb   :  { %v1360_v31 = vadd.f32 1e-05, %v1352_v28  ;;  %v1366_v33 = vmul.f32 %v2083_v29, %v1354_v27  ;;  %v1377_v36 = vsub.f32 %v1369_v35, %v1373_v34 }
 0x2bd   :  { %1388 = vperm.xlu1 %1987, %v1366_v33   ;;  %2086 = vrsqrt.f32 %v1360_v31  ;;  %v1374_v43 = vmul.f32 %v1366_v33, %v2560_v23 }
 0x2bf   :  { %v1378_v44 = vsub.f32 %v1370_v15, %v1374_v43 }
 0x2c1   :  { %1407 = vperm.xlu1 %1987, %v1377_v36  }
 0x2c6   :  { %v2085_v39 = vpop.eup %2084 }
 0x2c7   :  { %v1367_v42 = vmul.f32 %v2085_v39, %v1355_v37 }
 0x2c9   :  { %1393 = vperm.xlu1 %1987, %v1367_v42   ;;  %v1375_v52 = vmul.f32 %v1367_v42, %v2574_v47 }
 0x2ca   :  { %v2087_v46 = vpop.eup %2086 }
 0x2cb   :  { %v1368_v51 = vmul.f32 %v2087_v46, %v1356_v48  ;;  %v1379_v23 = vsub.f32 %v1371_v53, %v1375_v52 }
 0x2cd   :  { %1412 = vperm.xlu1 %1987, %v1378_v44   ;;  %v1376_v55 = vmul.f32 %v1368_v51, %v2580_v57 }
 0x2cf   :  { %v1380_v59 = vsub.f32 %v1372_v56, %v1376_v55 }
 0x2d1   :  { %1398 = vperm.xlu1 %1987, %v1368_v51  }
 0x2d5   :  { %1417 = vperm.xlu1 %1987, %v1379_v23  }
 0x2d9   :  { %1422 = vperm.xlu1 %1987, %v1380_v59  }
 0x334   :  { %v1384_v60 = vpop.permute.xlu0 %1383 }
 0x335   :  { %v1401_v63 = vmul.f32 %v1384_v60, %v2492_v41  ;;  %v1454_v47 = vmul.f32 %v1384_v60, %v2506_v6  ;;  %v1487_v0 = vmul.f32 %v1384_v60, %v2524_v61  ;;  %v1520_v2 = vmul.f32 %v1384_v60, %v2538_v30 }
 0x338   :  { %v1389_v62 = vpop.permute.xlu1 %1388 }
 0x339   :  { %v1402_v61 = vmul.f32 %v1389_v62, %v2500_v49  ;;  %v1455_v30 = vmul.f32 %v1389_v62, %v2510_v14  ;;  %v1488_v17 = vmul.f32 %v1389_v62, %v2530_v1  ;;  %v1521_v18 = vmul.f32 %v1389_v62, %v2542_v40 }
 0x33c   :  { %v1408_v4 = vpop.permute.xlu1 %1407 }
 0x33d   :  { %v1425_v3 = vadd.f32 %v1408_v4, %v1401_v63  ;;  %v1458_v57 = vadd.f32 %v1454_v47, %v1408_v4  ;;  %v1491_v5 = vadd.f32 %v1487_v0, %v1408_v4  ;;  %v1524_v7 = vadd.f32 %v1520_v2, %v1408_v4 }
 0x33f   :  { %v1429_v8 = vmax.f32 %v1425_v3, 0.0  ;;  %v1462_v9 = vmax.f32 %v1458_v57, 0.0  ;;  %v1495_v10 = vmax.f32 %v1491_v5, 0.0  ;;  %v1528_v11 = vmax.f32 %v1524_v7, 0.0 }
 0x341   :  { %v1670_v12 = vpack.c.bf16 %v1429_v8, %v1429_v8  ;;  %v1674_v13 = vpack.c.bf16 %v1462_v9, %v1462_v9  ;;  %v1678_v16 = vpack.c.bf16 %v1495_v10, %v1495_v10  ;;  %v1682_v41 = vpack.c.bf16 %v1528_v11, %v1528_v11 }
 0x343   :  { %1450 = vst.msk [vmem:[%s2722_s4] sm:$0xf] %vm1449_vm2, %v1670_v12  ;;  %1650 = vst.msk [vmem:[%s2722_s4 + $0x10] sm:$0xf] %vm1449_vm2, %v1674_v13 }
 0x344   :  { %1658 = vst.msk [vmem:[%s2722_s4 + $0x20] sm:$0xf] %vm1449_vm2, %v1678_v16  ;;  %1666 = vst.msk [vmem:[%s2722_s4 + $0x30] sm:$0xf] %vm1449_vm2, %v1682_v41  ;;  %v1394_v6 = vpop.permute.xlu1 %1393 }
 0x345   :  { %v1403_v14 = vmul.f32 %v1394_v6, %v2490_v38  ;;  %v1456_v1 = vmul.f32 %v1394_v6, %v2514_v21  ;;  %v1489_v40 = vmul.f32 %v1394_v6, %v2522_v58  ;;  %v1522_v37 = vmul.f32 %v1394_v6, %v2546_v50 }
 0x348   :  { %v1413_v19 = vpop.permute.xlu1 %1412 }
 0x349   :  { %v1426_v20 = vadd.f32 %v1413_v19, %v1402_v61  ;;  %v1459_v22 = vadd.f32 %v1455_v30, %v1413_v19  ;;  %v1492_v24 = vadd.f32 %v1488_v17, %v1413_v19  ;;  %v1525_v26 = vadd.f32 %v1521_v18, %v1413_v19 }
 0x34b   :  { %v1430_v27 = vmax.f32 %v1426_v20, 0.0  ;;  %v1463_v28 = vmax.f32 %v1459_v22, 0.0  ;;  %v1496_v29 = vmax.f32 %v1492_v24, 0.0  ;;  %v1529_v31 = vmax.f32 %v1525_v26, 0.0 }
 0x34c   :  { %v1399_v33 = vpop.permute.xlu1 %1398 }
 0x34d   :  { %v1671_v34 = vpack.c.bf16 %v1430_v27, %v1430_v27  ;;  %v1675_v35 = vpack.c.bf16 %v1463_v28, %v1463_v28  ;;  %v1679_v36 = vpack.c.bf16 %v1496_v29, %v1496_v29  ;;  %v1683_v49 = vpack.c.bf16 %v1529_v31, %v1529_v31 }
 0x34e   :  { %v1404_v46 = vmul.f32 %v1399_v33, %v2496_v45  ;;  %v1457_v48 = vmul.f32 %v1399_v33, %v2518_v25  ;;  %v1490_v51 = vmul.f32 %v1399_v33, %v2528_v32  ;;  %v1523_v52 = vmul.f32 %v1399_v33, %v2550_v54 }
 0x34f   :  { %1451 = vst.msk [vmem:[%s2722_s4 + $0x4] sm:$0xf] %vm1449_vm2, %v1671_v34  ;;  %1651 = vst.msk [vmem:[%s2722_s4 + $0x14] sm:$0xf] %vm1449_vm2, %v1675_v35 }
 0x350   :  { %1659 = vst.msk [vmem:[%s2722_s4 + $0x24] sm:$0xf] %vm1449_vm2, %v1679_v36  ;;  %1667 = vst.msk [vmem:[%s2722_s4 + $0x34] sm:$0xf] %vm1449_vm2, %v1683_v49  ;;  %v1418_v38 = vpop.permute.xlu1 %1417 }
 0x351   :  { %v1427_v21 = vadd.f32 %v1418_v38, %v1403_v14  ;;  %v1460_v58 = vadd.f32 %v1456_v1, %v1418_v38  ;;  %v1493_v50 = vadd.f32 %v1489_v40, %v1418_v38  ;;  %v1526_v39 = vadd.f32 %v1522_v37, %v1418_v38 }
 0x353   :  { %v1431_v42 = vmax.f32 %v1427_v21, 0.0  ;;  %v1464_v43 = vmax.f32 %v1460_v58, 0.0  ;;  %v1497_v15 = vmax.f32 %v1493_v50, 0.0  ;;  %v1530_v44 = vmax.f32 %v1526_v39, 0.0 }
 0x354   :  { %v1423_v53 = vpop.permute.xlu1 %1422 }
 0x355   :  { %v1672_v23 = vpack.c.bf16 %v1431_v42, %v1431_v42  ;;  %v1676_v55 = vpack.c.bf16 %v1464_v43, %v1464_v43  ;;  %v1680_v56 = vpack.c.bf16 %v1497_v15, %v1497_v15  ;;  %v1684_v59 = vpack.c.bf16 %v1530_v44, %v1530_v44 }
 0x356   :  { %v1428_v60 = vadd.f32 %v1423_v53, %v1404_v46  ;;  %v1461_v62 = vadd.f32 %v1457_v48, %v1423_v53  ;;  %v1494_v63 = vadd.f32 %v1490_v51, %v1423_v53  ;;  %v1527_v47 = vadd.f32 %v1523_v52, %v1423_v53 }
 0x357   :  { %1452 = vst.msk [vmem:[%s2722_s4 + $0x8] sm:$0xf] %vm1449_vm2, %v1672_v23  ;;  %1652 = vst.msk [vmem:[%s2722_s4 + $0x18] sm:$0xf] %vm1449_vm2, %v1676_v55 }
 0x358   :  { %1660 = vst.msk [vmem:[%s2722_s4 + $0x28] sm:$0xf] %vm1449_vm2, %v1680_v56  ;;  %1668 = vst.msk [vmem:[%s2722_s4 + $0x38] sm:$0xf] %vm1449_vm2, %v1684_v59  ;;  %v1432_v45 = vmax.f32 %v1428_v60, 0.0  ;;  %v1465_v25 = vmax.f32 %v1461_v62, 0.0 }
 0x359   :  { %v1498_v32 = vmax.f32 %v1494_v63, 0.0  ;;  %v1531_v54 = vmax.f32 %v1527_v47, 0.0 }
 0x35a   :  { %v1673_v0 = vpack.c.bf16 %v1432_v45, %v1432_v45  ;;  %v1677_v2 = vpack.c.bf16 %v1465_v25, %v1465_v25 }
 0x35b   :  { %v1681_v4 = vpack.c.bf16 %v1498_v32, %v1498_v32  ;;  %v1685_v3 = vpack.c.bf16 %v1531_v54, %v1531_v54 }
 0x35c   :  { %1453 = vst.msk [vmem:[%s2722_s4 + $0xc] sm:$0xf] %vm1449_vm2, %v1673_v0  ;;  %1653 = vst.msk [vmem:[%s2722_s4 + $0x1c] sm:$0xf] %vm1449_vm2, %v1677_v2 }
 0x35d   :  { %1661 = vst.msk [vmem:[%s2722_s4 + $0x2c] sm:$0xf] %vm1449_vm2, %v1681_v4  ;;  %1669 = vst.msk [vmem:[%s2722_s4 + $0x3c] sm:$0xf] %vm1449_vm2, %v1685_v3 }
 0x35e   :  { %1557 = vsyncpa [#allocation3], 1 }

// kernel: _lambda_.8
= control target key start
LH: loop header
LB: loop body
LE: loop exit
PB: predicated region body
PF: predicated region fallthrough
CT: control target
= control target key end

     0   :  { %v1015_v0 = vmov 0.0   ;;  %vm1016_vm0 = vmmov 0   ;;  %vm181_vm1 = vcmask 261120   ;;  %vm714_vm2 = vcmask 257024   ;;  %s1375_s1 = inlined_call_operand.vmem [shape: bf16[288,32], index: 1, kind: input, shape index: {}]   ;;  %s1376_s0 = inlined_call_operand.vmem [shape: bf16[4,16,288], index: 0, kind: input, shape index: {}]   ;;  %s1377_s2 = inlined_call_operand.vmem [shape: f32[16,1], index: 2, kind: input, shape index: {}]   ;;  %s1378_s3 = inlined_call_operand.vmem [shape: f32[16,1], index: 3, kind: input, shape index: {}]   ;;  %s1379_s4 = inlined_call_operand.vmem [shape: bf16[4,16,32], index: 4, kind: output, shape index: {}]  }
   0x1   :  { %940 = vmatprep.subr.bf16.mxu1 %v1015_v0  ;;  %v1047_v1 = vld [vmem:[%s1375_s1 + $0x78] sm:$0xff]   ;;  %944 = vmatprep.mubr.msk.bf16.mxu1 %vm1016_vm0, %v1015_v0  ;;  %v1054_v2 = vld [vmem:[%s1375_s1 + $0x88] sm:$0xff]   ;;  %v1066_v4 = vld [vmem:[%s1375_s1 + $0x70] sm:$0xff]  }
   0x2   :  { %840 = vmatprep.subr.bf16.mxu0 %v1047_v1  ;;  %v1060_v3 = vld [vmem:[%s1375_s1 + $0x38] sm:$0xff]   ;;  %941 = vmatpush3.bf16.msra.mxu1 %v1054_v2  ;;  %v1073_v5 = vld [vmem:[%s1375_s1 + $0x80] sm:$0xff]   ;;  %v1079_v6 = vld [vmem:[%s1375_s1 + $0x30] sm:$0xff]  }
   0x3   :  { %841 = vmatpush3.bf16.msra.mxu0 %v1060_v3  ;;  %942 = vmatprep.subr.bf16.mxu1 %v1015_v0  ;;  %v983_v7 = vld [vmem:[%s1376_s0 + $0x8] ss:$12 sps:$4 sm:$0xff]   ;;  %v1101_v10 = vld [vmem:[%s1375_s1 + $0x60] sm:$0xff]   ;;  %v1116_v12 = vld [vmem:[%s1375_s1 + $0x58] sm:$0xff]  }
   0x4   :  { %842 = vmatprep.subr.bf16.mxu0 %v1066_v4  ;;  %v1088_v8 = vld [vmem:[%s1375_s1 + $0x68] sm:$0xff]   ;;  %v1110_v11 = vld [vmem:[%s1375_s1 + $0x20] sm:$0xff]   ;;  %v1124_v13 = vld [vmem:[%s1375_s1 + $0x18] sm:$0xff]  }
   0x5   :  { %v1095_v9 = vld [vmem:[%s1375_s1 + $0x28] sm:$0xff]   ;;  %v1130_v14 = vld [vmem:[%s1375_s1 + $0x50] sm:$0xff]   ;;  %v1164_v20 = vld [vmem:[%s1375_s1 + $0x40] sm:$0xff]  }
   0x6   :  { %943 = vmatpush3.bf16.msra.mxu1 %v1073_v5  ;;  %v1136_v15 = vld [vmem:[%s1375_s1 + $0x10] sm:$0xff]   ;;  %v1147_v17 = vld [vmem:[%s1375_s1 + $0x48] sm:$0xff]   ;;  %v1172_v21 = vld [vmem:[%s1375_s1] sm:$0xff]  }
   0x7   :  { %843 = vmatpush3.bf16.msra.mxu0 %v1079_v6  ;;  %865 = vmatprep.subr.bf16.mxu1 %v1047_v1  ;;  %v998_v16 = vld [vmem:[%s1376_s0 + $0x4] ss:$12 sps:$4 sm:$0xff]   ;;  %v1001_v18 = vld [vmem:[%s1376_s0 + $0x1c] ss:$12 sps:$4 sm:$0xff]   ;;  %v996_v22 = vld [vmem:[%s1376_s0] ss:$12 sps:$4 sm:$0xff]  }
   0x8   :  { %844 = vmatprep.subr.bf16.mxu0 %v1088_v8  ;;  %217 = vmatprep.mubr.bf16.mxu0 %v998_v16  ;;  %v1158_v19 = vld [vmem:[%s1375_s1 + $0x8] sm:$0xff]   ;;  %v999_v23 = vld [vmem:[%s1376_s0 + $0x18] ss:$12 sps:$4 sm:$0xff]   ;;  %v1006_v25 = vld [vmem:[%s1376_s0 + $0x34] ss:$12 sps:$4 sm:$0xff]  }
   0x9   :  { %945 = vmatmul.mubr.msk.bf16.vlgmr.msra.gmra.mxu1 %vm181_vm1, %v983_v7  ;;  %v1002_v24 = vld [vmem:[%s1376_s0 + $0x20] ss:$12 sps:$4 sm:$0xff]   ;;  %v1003_v26 = vld [vmem:[%s1376_s0 + $0x38] ss:$12 sps:$4 sm:$0xff]   ;;  %v1004_v28 = vld [vmem:[%s1376_s0 + $0x30] ss:$12 sps:$4 sm:$0xff]  }
   0xa   :  { %866 = vmatpush3.bf16.msra.mxu1 %v1060_v3  ;;  %322 = vmatprep.mubr.bf16.mxu1 %v1001_v18  ;;  %v1009_v27 = vld [vmem:[%s1376_s0 + $0x4c] ss:$12 sps:$4 sm:$0xff]   ;;  %v1007_v29 = vld [vmem:[%s1376_s0 + $0x48] ss:$12 sps:$4 sm:$0xff]   ;;  %v1010_v30 = vld [vmem:[%s1376_s0 + $0x50] ss:$12 sps:$4 sm:$0xff]  }
   0xb   :  { %845 = vmatpush3.bf16.msra.mxu0 %v1095_v9  ;;  %867 = vmatprep.subr.bf16.mxu1 %v1066_v4 }
   0xc   :  { %846 = vmatprep.subr.bf16.mxu0 %v1101_v10 }
   0xe   :  { %868 = vmatpush3.bf16.msra.mxu1 %v1079_v6 }
   0xf   :  { %847 = vmatpush3.bf16.msra.mxu0 %v1110_v11  ;;  %869 = vmatprep.subr.bf16.mxu1 %v1088_v8 }
  0x10   :  { %848 = vmatprep.subr.bf16.mxu0 %v1116_v12 }
  0x12   :  { %870 = vmatpush3.bf16.msra.mxu1 %v1095_v9 }
  0x13   :  { %849 = vmatpush3.bf16.msra.mxu0 %v1124_v13  ;;  %871 = vmatprep.subr.bf16.mxu1 %v1101_v10 }
  0x14   :  { %850 = vmatprep.subr.bf16.mxu0 %v1130_v14 }
  0x16   :  { %872 = vmatpush3.bf16.msra.mxu1 %v1110_v11 }
  0x17   :  { %851 = vmatpush3.bf16.msra.mxu0 %v1136_v15  ;;  %873 = vmatprep.subr.bf16.mxu1 %v1116_v12 }
  0x18   :  { %852 = vmatprep.subr.bf16.mxu0 %v1147_v17 }
  0x1a   :  { %874 = vmatpush3.bf16.msra.mxu1 %v1124_v13 }
  0x1b   :  { %853 = vmatpush3.bf16.msra.mxu0 %v1158_v19  ;;  %875 = vmatprep.subr.bf16.mxu1 %v1130_v14 }
  0x1c   :  { %854 = vmatprep.subr.bf16.mxu0 %v1164_v20 }
  0x1e   :  { %876 = vmatpush3.bf16.msra.mxu1 %v1136_v15 }
  0x1f   :  { %855 = vmatpush3.bf16.msra.mxu0 %v1172_v21  ;;  %877 = vmatprep.subr.bf16.mxu1 %v1147_v17 }
  0x20   :  { %948 = vmatprep.subr.bf16.mxu0 %v1015_v0 }
  0x22   :  { %218 = vmatmul.mubr.bf16.vlgmr.msra.gmra.mxu0 %v996_v22  ;;  %878 = vmatpush3.bf16.msra.mxu1 %v1158_v19 }
  0x23   :  { %949 = vmatpush3.bf16.msra.mxu0 %v1054_v2  ;;  %879 = vmatprep.subr.bf16.mxu1 %v1164_v20 }
  0x24   :  { %950 = vmatprep.subr.bf16.mxu0 %v1015_v0  ;;  %952 = vmatprep.mubr.msk.bf16.mxu0 %vm1016_vm0, %v1015_v0 }
  0x26   :  { %880 = vmatpush3.bf16.msra.mxu1 %v1172_v21 }
  0x27   :  { %951 = vmatpush3.bf16.msra.mxu0 %v1073_v5  ;;  %956 = vmatprep.subr.bf16.mxu1 %v1015_v0 }
  0x28   :  { %890 = vmatprep.subr.bf16.mxu0 %v1047_v1 }
  0x29   :  { %323 = vmatmul.mubr.bf16.vlgmr.msra.gmra.mxu1 %v999_v23 }
  0x2a   :  { %953 = vmatmul.mubr.msk.bf16.vlgmr.msra.gmra.mxu0 %vm181_vm1, %v1002_v24  ;;  %957 = vmatpush3.bf16.msra.mxu1 %v1054_v2 }
  0x2b   :  { %891 = vmatpush3.bf16.msra.mxu0 %v1060_v3  ;;  %958 = vmatprep.subr.bf16.mxu1 %v1015_v0 }
  0x2c   :  { %892 = vmatprep.subr.bf16.mxu0 %v1066_v4  ;;  %960 = vmatprep.mubr.msk.bf16.mxu1 %vm1016_vm0, %v1015_v0 }
  0x2d   :  { %427 = vmatprep.mubr.bf16.mxu0 %v1006_v25 }
  0x2e   :  { %959 = vmatpush3.bf16.msra.mxu1 %v1073_v5 }
  0x2f   :  { %893 = vmatpush3.bf16.msra.mxu0 %v1079_v6  ;;  %915 = vmatprep.subr.bf16.mxu1 %v1047_v1 }
  0x30   :  { %894 = vmatprep.subr.bf16.mxu0 %v1088_v8 }
  0x31   :  { %961 = vmatmul.mubr.msk.bf16.vlgmr.msra.gmra.mxu1 %vm181_vm1, %v1003_v26 }
  0x32   :  { %916 = vmatpush3.bf16.msra.mxu1 %v1060_v3  ;;  %532 = vmatprep.mubr.bf16.mxu1 %v1009_v27 }
  0x33   :  { %895 = vmatpush3.bf16.msra.mxu0 %v1095_v9  ;;  %917 = vmatprep.subr.bf16.mxu1 %v1066_v4 }
  0x34   :  { %896 = vmatprep.subr.bf16.mxu0 %v1101_v10 }
  0x36   :  { %918 = vmatpush3.bf16.msra.mxu1 %v1079_v6 }
  0x37   :  { %897 = vmatpush3.bf16.msra.mxu0 %v1110_v11  ;;  %919 = vmatprep.subr.bf16.mxu1 %v1088_v8 }
  0x38   :  { %898 = vmatprep.subr.bf16.mxu0 %v1116_v12 }
  0x3a   :  { %920 = vmatpush3.bf16.msra.mxu1 %v1095_v9 }
  0x3b   :  { %899 = vmatpush3.bf16.msra.mxu0 %v1124_v13  ;;  %921 = vmatprep.subr.bf16.mxu1 %v1101_v10 }
  0x3c   :  { %900 = vmatprep.subr.bf16.mxu0 %v1130_v14 }
  0x3e   :  { %922 = vmatpush3.bf16.msra.mxu1 %v1110_v11 }
  0x3f   :  { %901 = vmatpush3.bf16.msra.mxu0 %v1136_v15  ;;  %923 = vmatprep.subr.bf16.mxu1 %v1116_v12 }
  0x40   :  { %902 = vmatprep.subr.bf16.mxu0 %v1147_v17 }
  0x42   :  { %924 = vmatpush3.bf16.msra.mxu1 %v1124_v13 }
  0x43   :  { %903 = vmatpush3.bf16.msra.mxu0 %v1158_v19  ;;  %925 = vmatprep.subr.bf16.mxu1 %v1130_v14 }
  0x44   :  { %904 = vmatprep.subr.bf16.mxu0 %v1164_v20 }
  0x46   :  { %926 = vmatpush3.bf16.msra.mxu1 %v1136_v15 }
  0x47   :  { %905 = vmatpush3.bf16.msra.mxu0 %v1172_v21  ;;  %927 = vmatprep.subr.bf16.mxu1 %v1147_v17 }
  0x48   :  { %964 = vmatprep.subr.bf16.mxu0 %v1015_v0 }
  0x4a   :  { %428 = vmatmul.mubr.bf16.vlgmr.msra.gmra.mxu0 %v1004_v28  ;;  %928 = vmatpush3.bf16.msra.mxu1 %v1158_v19 }
  0x4b   :  { %965 = vmatpush3.bf16.msra.mxu0 %v1054_v2  ;;  %929 = vmatprep.subr.bf16.mxu1 %v1164_v20 }
  0x4c   :  { %966 = vmatprep.subr.bf16.mxu0 %v1015_v0  ;;  %968 = vmatprep.mubr.msk.bf16.mxu0 %vm1016_vm0, %v1015_v0 }
  0x4e   :  { %930 = vmatpush3.bf16.msra.mxu1 %v1172_v21 }
  0x4f   :  { %967 = vmatpush3.bf16.msra.mxu0 %v1073_v5 }
  0x51   :  { %533 = vmatmul.mubr.bf16.vlgmr.msra.gmra.mxu1 %v1007_v29 }
  0x52   :  { %969 = vmatmul.mubr.msk.bf16.vlgmr.msra.gmra.mxu0 %vm181_vm1, %v1010_v30 }
  0xc9   :  { %v260_v31 = vpop.f32.mrf.mxu1 }
  0xcb   :  { %v946_v32 = vpop.f32.mrf.mxu1 }
  0xcd   :  { %v263_v33 = vpop.f32.mrf.mxu1 }
  0xcf   :  { %v947_v34 = vpop.f32.mrf.mxu1 }
  0xe2   :  { %v856_v35 = vpop.f32.mrf.mxu0 }
  0xe4   :  { %v857_v36 = vpop.f32.mrf.mxu0 }
  0xe5   :  { %v858_v37 = vadd.f32 %v857_v36, %v856_v35 }
  0xe6   :  { %v859_v38 = vpop.f32.mrf.mxu0 }
  0xe7   :  { %v1261_v39 = vadd.f32 %v858_v37, %v260_v31 }
  0xe8   :  { %v860_v40 = vpop.f32.mrf.mxu0 }
  0xe9   :  { %v861_v41 = vadd.f32 %v860_v40, %v859_v38  ;;  %v881_v42 = vpop.f32.mrf.mxu1  ;;  %v582_v43 = vsel %vm181_vm1, %v1261_v39, 0.0 }
  0xea   :  { %v365_v44 = vpop.f32.mrf.mxu0  ;;  %583 = vadd.xlane.f32.xlu0 %v582_v43 }
  0xeb   :  { %v1265_v45 = vadd.f32 %v861_v41, %v263_v33  ;;  %v882_v46 = vpop.f32.mrf.mxu1 }
  0xec   :  { %v883_v47 = vadd.f32 %v882_v46, %v881_v42  ;;  %v954_v48 = vpop.f32.mrf.mxu0 }
  0xed   :  { %v884_v49 = vpop.f32.mrf.mxu1  ;;  %v585_v50 = vsel %vm181_vm1, %v1265_v45, 0.0 }
  0xee   :  { %v1269_v51 = vadd.f32 %v883_v47, %v365_v44  ;;  %v368_v52 = vpop.f32.mrf.mxu0  ;;  %586 = vadd.xlane.f32.xlu0 %v585_v50 }
  0xef   :  { %v885_v53 = vpop.f32.mrf.mxu1 }
  0xf0   :  { %v886_v54 = vadd.f32 %v885_v53, %v884_v49  ;;  %v955_v55 = vpop.f32.mrf.mxu0  ;;  %v590_v56 = vsel %vm181_vm1, %v1269_v51, 0.0 }
  0xf1   :  { %v470_v57 = vpop.f32.mrf.mxu1  ;;  %591 = vadd.xlane.f32.xlu1 %v590_v56 }
  0xf2   :  { %v1273_v58 = vadd.f32 %v886_v54, %v368_v52 }
  0xf3   :  { %v962_v59 = vpop.f32.mrf.mxu1 }
  0xf4   :  { %v593_v60 = vsel %vm181_vm1, %v1273_v58, 0.0 }
  0xf5   :  { %v473_v61 = vpop.f32.mrf.mxu1  ;;  %594 = vadd.xlane.f32.xlu1 %v593_v60 }
  0xf7   :  { %v963_v62 = vpop.f32.mrf.mxu1 }
 0x10a   :  { %v906_v63 = vpop.f32.mrf.mxu0 }
 0x10c   :  { %v907_v0 = vpop.f32.mrf.mxu0 }
 0x10d   :  { %v908_v1 = vadd.f32 %v907_v0, %v906_v63 }
 0x10e   :  { %v909_v2 = vpop.f32.mrf.mxu0 }
 0x10f   :  { %v1277_v3 = vadd.f32 %v908_v1, %v470_v57 }
 0x110   :  { %v910_v4 = vpop.f32.mrf.mxu0 }
 0x111   :  { %v911_v5 = vadd.f32 %v910_v4, %v909_v2  ;;  %v931_v6 = vpop.f32.mrf.mxu1  ;;  %v598_v7 = vsel %vm181_vm1, %v1277_v3, 0.0  ;;  %v1017_v4 = vmov 0  }
 0x112   :  { %v575_v8 = vpop.f32.mrf.mxu0  ;;  %599 = vadd.xlane.f32.xlu0 %v598_v7  ;;  %976 = vset.pattern.permute.xlu1 %v1017_v4 }
 0x113   :  { %v1281_v9 = vadd.f32 %v911_v5, %v473_v61  ;;  %v932_v10 = vpop.f32.mrf.mxu1  ;;  %975 = vset.pattern.permute.xlu0 %v1017_v4 }
 0x114   :  { %v933_v11 = vadd.f32 %v932_v10, %v931_v6  ;;  %v970_v12 = vpop.f32.mrf.mxu0 }
 0x115   :  { %v934_v13 = vpop.f32.mrf.mxu1  ;;  %v601_v14 = vsel %vm181_vm1, %v1281_v9, 0.0 }
 0x116   :  { %v1285_v15 = vadd.f32 %v933_v11, %v575_v8  ;;  %v578_v16 = vpop.f32.mrf.mxu0  ;;  %602 = vadd.xlane.f32.xlu1 %v601_v14 }
 0x117   :  { %v935_v17 = vpop.f32.mrf.mxu1 }
 0x118   :  { %v936_v18 = vadd.f32 %v935_v17, %v934_v13  ;;  %v971_v19 = vpop.f32.mrf.mxu0  ;;  %v606_v20 = vsel %vm181_vm1, %v1285_v15, 0.0 }
 0x119   :  { %607 = vadd.xlane.f32.xlu0 %v606_v20 }
 0x11a   :  { %v1289_v21 = vadd.f32 %v936_v18, %v578_v16 }
 0x11c   :  { %v609_v22 = vsel %vm181_vm1, %v1289_v21, 0.0 }
 0x11d   :  { %610 = vadd.xlane.f32.xlu1 %v609_v22 }
 0x173   :  { %v584_v23 = vpop.xlane.xlu0 %583 }
 0x177   :  { %v587_v25 = vpop.xlane.xlu0 %586 }
 0x17a   :  { %v592_v24 = vpop.xlane.xlu1 %591 }
 0x17b   :  { %v596_v28 = vadd.f32 %v592_v24, %v584_v23 }
 0x17e   :  { %v595_v26 = vpop.xlane.xlu1 %594 }
 0x17f   :  { %v597_v32 = vadd.f32 %v595_v26, %v587_v25  ;;  %v666_v26 = vld [vmem:[%s1377_s2] sm:$0xff] }
 0x19b   :  { %v600_v27 = vpop.xlane.xlu0 %599 }
 0x19c   :  { %v604_v29 = vadd.f32 %v600_v27, %v596_v28 }
 0x19f   :  { %v603_v30 = vpop.xlane.xlu1 %602 }
 0x1a0   :  { %v605_v34 = vadd.f32 %v603_v30, %v597_v32 }
 0x1a2   :  { %v608_v31 = vpop.xlane.xlu0 %607 }
 0x1a3   :  { %v612_v33 = vadd.f32 %v608_v31, %v604_v29  ;;  %v667_v29 = vld [vmem:[%s1377_s2 + $0x8] sm:$0xff] }
 0x1a5   :  { %v1293_v35 = vmul.f32 0.0078125, %v612_v33  ;;  %v674_v33 = vld [vmem:[%s1378_s3] sm:$0xff] }
 0x1a6   :  { %v611_v36 = vpop.xlane.xlu1 %610 }
 0x1a7   :  { %v613_v37 = vadd.f32 %v611_v36, %v605_v34  ;;  %v616_v38 = vsub.f32 %v1261_v39, %v1293_v35  ;;  %v628_v40 = vsub.f32 %v1269_v51, %v1293_v35  ;;  %v640_v43 = vsub.f32 %v1277_v3, %v1293_v35 }
 0x1a8   :  { %v652_v52 = vsub.f32 %v1285_v15, %v1293_v35 }
 0x1a9   :  { %v1299_v41 = vmul.f32 0.0078125, %v613_v37  ;;  %v618_v42 = vmul.f32 %v616_v38, %v616_v38  ;;  %v630_v47 = vmul.f32 %v628_v40, %v628_v40  ;;  %v642_v50 = vmul.f32 %v640_v43, %v640_v43  ;;  %v675_v37 = vld [vmem:[%s1378_s3 + $0x8] sm:$0xff] }
 0x1aa   :  { %v654_v57 = vmul.f32 %v652_v52, %v652_v52 }
 0x1ab   :  { %v620_v44 = vsel %vm181_vm1, %v618_v42, 0.0  ;;  %v617_v46 = vsub.f32 %v1265_v45, %v1299_v41  ;;  %v629_v48 = vsub.f32 %v1273_v58, %v1299_v41  ;;  %v632_v54 = vsel %vm181_vm1, %v630_v47, 0.0 }
 0x1ac   :  { %621 = vadd.xlane.f32.xlu0 %v620_v44  ;;  %v641_v56 = vsub.f32 %v1281_v9, %v1299_v41  ;;  %v644_v60 = vsel %vm181_vm1, %v642_v50, 0.0  ;;  %v653_v62 = vsub.f32 %v1289_v21, %v1299_v41  ;;  %v656_v0 = vsel %vm181_vm1, %v654_v57, 0.0 }
 0x1ad   :  { %v619_v49 = vmul.f32 %v617_v46, %v617_v46  ;;  %v631_v55 = vmul.f32 %v629_v48, %v629_v48 }
 0x1ae   :  { %v643_v61 = vmul.f32 %v641_v56, %v641_v56  ;;  %v655_v1 = vmul.f32 %v653_v62, %v653_v62 }
 0x1af   :  { %v623_v53 = vsel %vm181_vm1, %v619_v49, 0.0  ;;  %v635_v59 = vsel %vm181_vm1, %v631_v55, 0.0 }
 0x1b0   :  { %624 = vadd.xlane.f32.xlu1 %v623_v53  ;;  %633 = vadd.xlane.f32.xlu0 %v632_v54  ;;  %v647_v63 = vsel %vm181_vm1, %v643_v61, 0.0  ;;  %v659_v2 = vsel %vm181_vm1, %v655_v1, 0.0 }
 0x1b4   :  { %636 = vadd.xlane.f32.xlu1 %v635_v59  ;;  %645 = vadd.xlane.f32.xlu0 %v644_v60 }
 0x1b8   :  { %648 = vadd.xlane.f32.xlu1 %v647_v63  ;;  %657 = vadd.xlane.f32.xlu0 %v656_v0 }
 0x1bc   :  { %660 = vadd.xlane.f32.xlu1 %v659_v2 }
 0x235   :  { %v622_v5 = vpop.xlane.xlu0 %621 }
 0x239   :  { %v625_v6 = vpop.xlane.xlu1 %624  ;;  %v634_v7 = vpop.xlane.xlu0 %633 }
 0x23a   :  { %v638_v11 = vadd.f32 %v634_v7, %v622_v5 }
 0x23d   :  { %v637_v8 = vpop.xlane.xlu1 %636  ;;  %v646_v10 = vpop.xlane.xlu0 %645 }
 0x23e   :  { %v650_v12 = vadd.f32 %v646_v10, %v638_v11  ;;  %v639_v16 = vadd.f32 %v637_v8, %v625_v6 }
 0x241   :  { %v649_v13 = vpop.xlane.xlu1 %648  ;;  %v658_v14 = vpop.xlane.xlu0 %657 }
 0x242   :  { %v662_v17 = vadd.f32 %v658_v14, %v650_v12  ;;  %v651_v18 = vadd.f32 %v649_v13, %v639_v16 }
 0x244   :  { %v664_v19 = vmul.f32 0.0078125, %v662_v17 }
 0x245   :  { %v661_v20 = vpop.xlane.xlu1 %660 }
 0x246   :  { %v668_v22 = vadd.f32 1e-05, %v664_v19  ;;  %v663_v23 = vadd.f32 %v661_v20, %v651_v18 }
 0x248   :  { %1011 = vrsqrt.f32 %v668_v22  ;;  %v665_v24 = vmul.f32 0.0078125, %v663_v23 }
 0x24a   :  { %v669_v25 = vadd.f32 1e-05, %v665_v24 }
 0x24c   :  { %1013 = vrsqrt.f32 %v669_v25 }
 0x255   :  { %v1012_v27 = vpop.eup %1011 }
 0x256   :  { %v672_v28 = vmul.f32 %v1012_v27, %v666_v26 }
 0x258   :  { %682 = vperm.xlu0 %975, %v672_v28   ;;  %v676_v32 = vmul.f32 %v672_v28, %v1293_v35 }
 0x259   :  { %v1014_v30 = vpop.eup %1013 }
 0x25a   :  { %v673_v31 = vmul.f32 %v1014_v30, %v667_v29  ;;  %v678_v34 = vsub.f32 %v674_v33, %v676_v32 }
 0x25c   :  { %687 = vperm.xlu1 %976, %v673_v31   ;;  %v677_v36 = vmul.f32 %v673_v31, %v1299_v41 }
 0x25e   :  { %v679_v38 = vsub.f32 %v675_v37, %v677_v36 }
 0x260   :  { %694 = vperm.xlu1 %976, %v678_v34  }
 0x264   :  { %699 = vperm.xlu1 %976, %v679_v38  }
 0x2d3   :  { %v683_v40 = vpop.permute.xlu0 %682 }
 0x2d4   :  { %v690_v43 = vmul.f32 %v683_v40, %v1261_v39  ;;  %v717_v35 = vmul.f32 %v683_v40, %v1269_v51  ;;  %v734_v44 = vmul.f32 %v683_v40, %v1277_v3  ;;  %v751_v46 = vmul.f32 %v683_v40, %v1285_v15 }
 0x2d7   :  { %v688_v42 = vpop.permute.xlu1 %687 }
 0x2d8   :  { %v691_v56 = vmul.f32 %v688_v42, %v1265_v45  ;;  %v718_v39 = vmul.f32 %v688_v42, %v1273_v58  ;;  %v735_v51 = vmul.f32 %v688_v42, %v1281_v9  ;;  %v752_v3 = vmul.f32 %v688_v42, %v1289_v21 }
 0x2db   :  { %v695_v47 = vpop.permute.xlu1 %694 }
 0x2dc   :  { %v702_v48 = vadd.f32 %v695_v47, %v690_v43  ;;  %v719_v41 = vadd.f32 %v717_v35, %v695_v47  ;;  %v736_v49 = vadd.f32 %v734_v44, %v695_v47  ;;  %v753_v50 = vadd.f32 %v751_v46, %v695_v47 }
 0x2de   :  { %v704_v52 = vmax.f32 %v702_v48, 0.0  ;;  %v721_v53 = vmax.f32 %v719_v41, 0.0  ;;  %v738_v54 = vmax.f32 %v736_v49, 0.0  ;;  %v755_v55 = vmax.f32 %v753_v50, 0.0 }
 0x2df   :  { %v700_v57 = vpop.permute.xlu1 %699 }
 0x2e0   :  { %v832_v15 = vpack.c.bf16 %v704_v52, %v704_v52  ;;  %v834_v59 = vpack.c.bf16 %v721_v53, %v721_v53  ;;  %v836_v60 = vpack.c.bf16 %v738_v54, %v738_v54  ;;  %v838_v61 = vpack.c.bf16 %v755_v55, %v755_v55 }
 0x2e1   :  { %v703_v62 = vadd.f32 %v700_v57, %v691_v56  ;;  %v720_v63 = vadd.f32 %v718_v39, %v700_v57  ;;  %v737_v0 = vadd.f32 %v735_v51, %v700_v57  ;;  %v754_v1 = vadd.f32 %v752_v3, %v700_v57 }
 0x2e2   :  { %715 = vst.msk [vmem:[%s1379_s4] sm:$0xf] %vm714_vm2, %v832_v15  ;;  %822 = vst.msk [vmem:[%s1379_s4 + $0x8] sm:$0xf] %vm714_vm2, %v834_v59 }
 0x2e3   :  { %826 = vst.msk [vmem:[%s1379_s4 + $0x10] sm:$0xf] %vm714_vm2, %v836_v60  ;;  %830 = vst.msk [vmem:[%s1379_s4 + $0x18] sm:$0xf] %vm714_vm2, %v838_v61  ;;  %v705_v45 = vmax.f32 %v703_v62, 0.0  ;;  %v722_v58 = vmax.f32 %v720_v63, 0.0 }
 0x2e4   :  { %v739_v9 = vmax.f32 %v737_v0, 0.0  ;;  %v756_v21 = vmax.f32 %v754_v1, 0.0 }
 0x2e5   :  { %v833_v2 = vpack.c.bf16 %v705_v45, %v705_v45  ;;  %v835_v4 = vpack.c.bf16 %v722_v58, %v722_v58 }
 0x2e6   :  { %v837_v5 = vpack.c.bf16 %v739_v9, %v739_v9  ;;  %v839_v6 = vpack.c.bf16 %v756_v21, %v756_v21 }
 0x2e7   :  { %716 = vst.msk [vmem:[%s1379_s4 + $0x4] sm:$0xf] %vm714_vm2, %v833_v2  ;;  %823 = vst.msk [vmem:[%s1379_s4 + $0xc] sm:$0xf] %vm714_vm2, %v835_v4 }
 0x2e8   :  { %827 = vst.msk [vmem:[%s1379_s4 + $0x14] sm:$0xf] %vm714_vm2, %v837_v5  ;;  %831 = vst.msk [vmem:[%s1379_s4 + $0x1c] sm:$0xf] %vm714_vm2, %v839_v6 }

// kernel: _lambda_.9
= control target key start
LH: loop header
LB: loop body
LE: loop exit
PB: predicated region body
PF: predicated region fallthrough
CT: control target
= control target key end

     0   :  { %v421_v0 = vmov 0   ;;  %vm97_vm0 = vcmask 130048   ;;  %s564_s1 = inlined_call_operand.vmem [shape: bf16[144,128], index: 1, kind: input, shape index: {}]   ;;  %s565_s0 = inlined_call_operand.vmem [shape: bf16[4,8,144], index: 0, kind: input, shape index: {}]   ;;  %s566_s2 = inlined_call_operand.vmem [shape: f32[8,1], index: 2, kind: input, shape index: {}]   ;;  %s567_s3 = inlined_call_operand.vmem [shape: f32[8,1], index: 3, kind: input, shape index: {}]   ;;  %s568_s4 = inlined_call_operand.vmem [shape: bf16[4,8,128], index: 4, kind: output, shape index: {}]  }
   0x1   :  { %101 = vmatprep.subr.bf16.mxu0 %v421_v0  ;;  %152 = vmatprep.subr.bf16.mxu1 %v421_v0  ;;  %v452_v1 = vld [vmem:[%s564_s1 + $0x38] sm:$0xff]   ;;  %v461_v2 = vld [vmem:[%s564_s1 + $0x30] sm:$0xff]   ;;  %v470_v3 = vld [vmem:[%s564_s1 + $0x28] sm:$0xff]  }
   0x2   :  { %400 = vset.pattern.permute.xlu0 %v421_v0  ;;  %401 = vset.pattern.permute.xlu1 %v421_v0  ;;  %v36_v4 = vld [vmem:[%s565_s0] sm:$0xff]  ;;  %v384_v5 = vld [vmem:[%s565_s0 + $0x8] sm:$0xff]  ;;  %v406_v9 = vld [vmem:[%s564_s1 + $0x18] sm:$0xff]  }
   0x3   :  { %102 = vmatpush1.bf16.msra.mxu0 %v452_v1  ;;  %153 = vmatpush1.bf16.msra.mxu1 %v452_v1  ;;  %v405_v6 = vld [vmem:[%s564_s1 + $0x20] sm:$0xff]   ;;  %v373_v7 = vcombine.high %v36_v4, %v36_v4  ;;  %v386_v8 = vcombine.high %v384_v5, %v384_v5  ;;  %v407_v10 = vld [vmem:[%s564_s1 + $0x10] sm:$0xff]   ;;  %v408_v11 = vld [vmem:[%s564_s1 + $0x8] sm:$0xff]   ;;  %v372_v14 = vcombine.low %v36_v4, %v36_v4 }
   0x4   :  { %103 = vmatprep.subr.bf16.mxu0 %v421_v0  ;;  %154 = vmatprep.subr.bf16.mxu1 %v421_v0  ;;  %v409_v12 = vld [vmem:[%s564_s1] sm:$0xff]   ;;  %v385_v15 = vcombine.low %v384_v5, %v384_v5  ;;  %v388_v16 = vld [vmem:[%s565_s0 + $0x10] sm:$0xff]  ;;  %v392_v17 = vld [vmem:[%s565_s0 + $0x18] sm:$0xff] }
   0x5   :  { %383 = vmatprep.mubr.msk.bf16.mxu0 %vm97_vm0, %v373_v7  ;;  %387 = vmatprep.mubr.msk.bf16.mxu1 %vm97_vm0, %v386_v8  ;;  %v410_v13 = vld [vmem:[%s564_s1 + $0x40] sm:$0xff]   ;;  %v390_v18 = vcombine.high %v388_v16, %v388_v16  ;;  %v394_v19 = vcombine.high %v392_v17, %v392_v17  ;;  %v389_v20 = vcombine.low %v388_v16, %v388_v16 }
   0x6   :  { %v393_v21 = vcombine.low %v392_v17, %v392_v17  ;;  %v328_v63 = vld [vmem:[%s566_s2] sm:$0xff] }
   0x7   :  { %104 = vmatpush1.bf16.msra.mxu0 %v461_v2  ;;  %155 = vmatpush1.bf16.msra.mxu1 %v461_v2 }
   0x8   :  { %105 = vmatprep.subr.bf16.mxu0 %v421_v0  ;;  %156 = vmatprep.subr.bf16.mxu1 %v421_v0 }
   0xb   :  { %106 = vmatpush1.bf16.msra.mxu0 %v470_v3  ;;  %157 = vmatpush1.bf16.msra.mxu1 %v470_v3 }
   0xc   :  { %107 = vmatprep.subr.bf16.mxu0 %v421_v0  ;;  %158 = vmatprep.subr.bf16.mxu1 %v421_v0 }
   0xf   :  { %108 = vmatpush1.bf16.msra.mxu0 %v405_v6  ;;  %159 = vmatpush1.bf16.msra.mxu1 %v405_v6 }
  0x10   :  { %109 = vmatprep.subr.bf16.mxu0 %v421_v0  ;;  %160 = vmatprep.subr.bf16.mxu1 %v421_v0 }
  0x13   :  { %110 = vmatpush1.bf16.msra.mxu0 %v406_v9  ;;  %161 = vmatpush1.bf16.msra.mxu1 %v406_v9 }
  0x14   :  { %111 = vmatprep.subr.bf16.mxu0 %v421_v0  ;;  %162 = vmatprep.subr.bf16.mxu1 %v421_v0 }
  0x17   :  { %112 = vmatpush1.bf16.msra.mxu0 %v407_v10  ;;  %163 = vmatpush1.bf16.msra.mxu1 %v407_v10 }
  0x18   :  { %113 = vmatprep.subr.bf16.mxu0 %v421_v0  ;;  %164 = vmatprep.subr.bf16.mxu1 %v421_v0 }
  0x1b   :  { %114 = vmatpush1.bf16.msra.mxu0 %v408_v11  ;;  %165 = vmatpush1.bf16.msra.mxu1 %v408_v11 }
  0x1c   :  { %115 = vmatprep.subr.bf16.mxu0 %v421_v0  ;;  %166 = vmatprep.subr.bf16.mxu1 %v421_v0 }
  0x1f   :  { %116 = vmatpush1.bf16.msra.mxu0 %v409_v12  ;;  %167 = vmatpush1.bf16.msra.mxu1 %v409_v12 }
  0x20   :  { %131 = vmatprep.subr.bf16.mxu0 %v421_v0  ;;  %182 = vmatprep.subr.bf16.mxu1 %v421_v0 }
  0x23   :  { %132 = vmatpush2.bf16.msra.mxu0 %v410_v13  ;;  %183 = vmatpush2.bf16.msra.mxu1 %v410_v13 }
  0x24   :  { %203 = vmatprep.subr.bf16.mxu0 %v421_v0  ;;  %254 = vmatprep.subr.bf16.mxu1 %v421_v0 }
  0x26   :  { %134 = vmatmul.mubr.bf16.vlgmr.msra.gmra.mxu0 %v372_v14  ;;  %185 = vmatmul.mubr.bf16.vlgmr.msra.gmra.mxu1 %v385_v15 }
  0x27   :  { %204 = vmatpush1.bf16.msra.mxu0 %v452_v1  ;;  %255 = vmatpush1.bf16.msra.mxu1 %v452_v1 }
  0x28   :  { %205 = vmatprep.subr.bf16.mxu0 %v421_v0  ;;  %256 = vmatprep.subr.bf16.mxu1 %v421_v0 }
  0x29   :  { %391 = vmatprep.mubr.msk.bf16.mxu0 %vm97_vm0, %v390_v18  ;;  %395 = vmatprep.mubr.msk.bf16.mxu1 %vm97_vm0, %v394_v19 }
  0x2b   :  { %206 = vmatpush1.bf16.msra.mxu0 %v461_v2  ;;  %257 = vmatpush1.bf16.msra.mxu1 %v461_v2  ;;  %v332_v2 = vld [vmem:[%s567_s3] sm:$0xff] }
  0x2c   :  { %207 = vmatprep.subr.bf16.mxu0 %v421_v0  ;;  %258 = vmatprep.subr.bf16.mxu1 %v421_v0 }
  0x2f   :  { %208 = vmatpush1.bf16.msra.mxu0 %v470_v3  ;;  %259 = vmatpush1.bf16.msra.mxu1 %v470_v3 }
  0x30   :  { %209 = vmatprep.subr.bf16.mxu0 %v421_v0  ;;  %260 = vmatprep.subr.bf16.mxu1 %v421_v0 }
  0x33   :  { %210 = vmatpush1.bf16.msra.mxu0 %v405_v6  ;;  %261 = vmatpush1.bf16.msra.mxu1 %v405_v6 }
  0x34   :  { %211 = vmatprep.subr.bf16.mxu0 %v421_v0  ;;  %262 = vmatprep.subr.bf16.mxu1 %v421_v0 }
  0x37   :  { %212 = vmatpush1.bf16.msra.mxu0 %v406_v9  ;;  %263 = vmatpush1.bf16.msra.mxu1 %v406_v9 }
  0x38   :  { %213 = vmatprep.subr.bf16.mxu0 %v421_v0  ;;  %264 = vmatprep.subr.bf16.mxu1 %v421_v0 }
  0x3b   :  { %214 = vmatpush1.bf16.msra.mxu0 %v407_v10  ;;  %265 = vmatpush1.bf16.msra.mxu1 %v407_v10 }
  0x3c   :  { %215 = vmatprep.subr.bf16.mxu0 %v421_v0  ;;  %266 = vmatprep.subr.bf16.mxu1 %v421_v0 }
  0x3f   :  { %216 = vmatpush1.bf16.msra.mxu0 %v408_v11  ;;  %267 = vmatpush1.bf16.msra.mxu1 %v408_v11 }
  0x40   :  { %217 = vmatprep.subr.bf16.mxu0 %v421_v0  ;;  %268 = vmatprep.subr.bf16.mxu1 %v421_v0 }
  0x43   :  { %218 = vmatpush1.bf16.msra.mxu0 %v409_v12  ;;  %269 = vmatpush1.bf16.msra.mxu1 %v409_v12 }
  0x44   :  { %233 = vmatprep.subr.bf16.mxu0 %v421_v0  ;;  %284 = vmatprep.subr.bf16.mxu1 %v421_v0 }
  0x47   :  { %234 = vmatpush2.bf16.msra.mxu0 %v410_v13  ;;  %285 = vmatpush2.bf16.msra.mxu1 %v410_v13 }
  0x4a   :  { %236 = vmatmul.mubr.bf16.vlgmr.msra.gmra.mxu0 %v389_v20  ;;  %287 = vmatmul.mubr.bf16.vlgmr.msra.gmra.mxu1 %v393_v21 }
  0xe6   :  { %v135_v22 = vpop.f32.mrf.mxu0  ;;  %v186_v23 = vpop.f32.mrf.mxu1 }
  0xe7   :  { %294 = vadd.xlane.f32.xlu0 %v135_v22 }
  0xe8   :  { %v137_v24 = vpop.f32.mrf.mxu0  ;;  %v188_v25 = vpop.f32.mrf.mxu1 }
  0xea   :  { %v138_v26 = vpop.f32.mrf.mxu0  ;;  %v189_v27 = vpop.f32.mrf.mxu1 }
  0xeb   :  { %297 = vadd.xlane.f32.xlu0 %v186_v23 }
  0xec   :  { %v139_v28 = vpop.f32.mrf.mxu0  ;;  %v190_v29 = vpop.f32.mrf.mxu1 }
 0x10a   :  { %v237_v30 = vpop.f32.mrf.mxu0  ;;  %v288_v31 = vpop.f32.mrf.mxu1 }
 0x10b   :  { %300 = vadd.xlane.f32.xlu1 %v237_v30 }
 0x10c   :  { %v239_v32 = vpop.f32.mrf.mxu0  ;;  %v290_v33 = vpop.f32.mrf.mxu1 }
 0x10e   :  { %v240_v34 = vpop.f32.mrf.mxu0  ;;  %v291_v35 = vpop.f32.mrf.mxu1 }
 0x10f   :  { %303 = vadd.xlane.f32.xlu1 %v288_v31 }
 0x110   :  { %v241_v36 = vpop.f32.mrf.mxu0  ;;  %v292_v37 = vpop.f32.mrf.mxu1 }
 0x170   :  { %v295_v38 = vpop.xlane.xlu0 %294 }
 0x174   :  { %v298_v39 = vpop.xlane.xlu0 %297 }
 0x175   :  { %v299_v41 = vadd.f32 %v298_v39, %v295_v38 }
 0x194   :  { %v301_v40 = vpop.xlane.xlu1 %300 }
 0x195   :  { %v302_v42 = vadd.f32 %v301_v40, %v299_v41 }
 0x198   :  { %v304_v43 = vpop.xlane.xlu1 %303 }
 0x199   :  { %v305_v44 = vadd.f32 %v304_v43, %v302_v42 }
 0x19b   :  { %v306_v45 = vmul.f32 0.001953125, %v305_v44 }
 0x19d   :  { %v312_v46 = vsub.f32 %v186_v23, %v306_v45  ;;  %v307_v47 = vsub.f32 %v135_v22, %v306_v45  ;;  %v322_v50 = vsub.f32 %v288_v31, %v306_v45  ;;  %v317_v51 = vsub.f32 %v237_v30, %v306_v45 }
 0x19f   :  { %v313_v48 = vmul.f32 %v312_v46, %v312_v46  ;;  %v308_v49 = vmul.f32 %v307_v47, %v307_v47  ;;  %v323_v52 = vmul.f32 %v322_v50, %v322_v50  ;;  %v318_v53 = vmul.f32 %v317_v51, %v317_v51 }
 0x1a1   :  { %314 = vadd.xlane.f32.xlu1 %v313_v48  ;;  %309 = vadd.xlane.f32.xlu0 %v308_v49 }
 0x1a5   :  { %324 = vadd.xlane.f32.xlu1 %v323_v52  ;;  %319 = vadd.xlane.f32.xlu0 %v318_v53 }
 0x22a   :  { %v315_v54 = vpop.xlane.xlu1 %314  ;;  %v310_v55 = vpop.xlane.xlu0 %309 }
 0x22b   :  { %v316_v56 = vadd.f32 %v315_v54, %v310_v55 }
 0x22e   :  { %v320_v57 = vpop.xlane.xlu0 %319  ;;  %v325_v59 = vpop.xlane.xlu1 %324 }
 0x22f   :  { %v321_v58 = vadd.f32 %v320_v57, %v316_v56 }
 0x231   :  { %v326_v60 = vadd.f32 %v325_v59, %v321_v58 }
 0x233   :  { %v327_v61 = vmul.f32 0.001953125, %v326_v60 }
 0x235   :  { %v329_v62 = vadd.f32 1e-05, %v327_v61 }
 0x237   :  { %419 = vrsqrt.f32 %v329_v62 }
 0x244   :  { %v420_v0 = vpop.eup %419 }
 0x245   :  { %v331_v1 = vmul.f32 %v420_v0, %v328_v63 }
 0x247   :  { %337 = vperm.xlu0 %400, %v331_v1   ;;  %v333_v3 = vmul.f32 %v331_v1, %v306_v45 }
 0x249   :  { %v334_v4 = vsub.f32 %v332_v2, %v333_v3 }
 0x24b   :  { %343 = vperm.xlu1 %401, %v334_v4  }
 0x2c2   :  { %v338_v5 = vpop.permute.xlu0 %337 }
 0x2c3   :  { %v340_v6 = vmul.f32 %v338_v5, %v135_v22  ;;  %v350_v7 = vmul.f32 %v338_v5, %v186_v23  ;;  %v356_v8 = vmul.f32 %v338_v5, %v237_v30  ;;  %v362_v9 = vmul.f32 %v338_v5, %v288_v31 }
 0x2c6   :  { %v344_v10 = vpop.permute.xlu1 %343 }
 0x2c7   :  { %v346_v11 = vadd.f32 %v344_v10, %v340_v6  ;;  %v351_v12 = vadd.f32 %v350_v7, %v344_v10  ;;  %v357_v13 = vadd.f32 %v356_v8, %v344_v10  ;;  %v363_v14 = vadd.f32 %v362_v9, %v344_v10 }
 0x2c9   :  { %v347_v15 = vmax.f32 %v346_v11, 0.0  ;;  %v352_v16 = vmax.f32 %v351_v12, 0.0  ;;  %v358_v17 = vmax.f32 %v357_v13, 0.0  ;;  %v364_v18 = vmax.f32 %v363_v14, 0.0 }
 0x2cb   :  { %v348_v19 = vpack.c.bf16 %v347_v15, %v347_v15  ;;  %v353_v20 = vpack.c.bf16 %v352_v16, %v352_v16  ;;  %v359_v21 = vpack.c.bf16 %v358_v17, %v358_v17  ;;  %v365_v24 = vpack.c.bf16 %v364_v18, %v364_v18 }
 0x2cd   :  { %349 = vst [vmem:[%s568_s4] sm:$0xf] %v348_v19  ;;  %396 = vst [vmem:[%s568_s4 + $0x4] sm:$0xf] %v353_v20 }
 0x2ce   :  { %397 = vst [vmem:[%s568_s4 + $0x8] sm:$0xf] %v359_v21  ;;  %398 = vst [vmem:[%s568_s4 + $0xc] sm:$0xf] %v365_v24 }

// kernel: _lambda_.10
= control target key start
LH: loop header
LB: loop body
LE: loop exit
PB: predicated region body
PF: predicated region fallthrough
CT: control target
= control target key end

     0   :  { %vm131_vm0 = vcmask 1043456   ;;  %v865_v2 = vmov 0   ;;  %vm127_vm1 = vcmask 588800   ;;  %s1265_s1 = inlined_call_operand.vmem [shape: bf16[72,512], index: 1, kind: input, shape index: {}]   ;;  %s1266_s0 = inlined_call_operand.vmem [shape: bf16[4,4,72], index: 0, kind: input, shape index: {}]   ;;  %s1267_s2 = inlined_call_operand.vmem [shape: f32[4,1], index: 2, kind: input, shape index: {}]   ;;  %s1268_s3 = inlined_call_operand.vmem [shape: f32[4,1], index: 3, kind: input, shape index: {}]   ;;  %s1269_s4 = inlined_call_operand.vmem [shape: bf16[4,4,512], index: 4, kind: output, shape index: {}]  }
   0x1   :  { %v34_v0 = vld [vmem:[%s1265_s1 + $0x80] sm:$0xff]  ;;  %v35_v1 = vld [vmem:[%s1265_s1 + $0x88] sm:$0xff]  ;;  %176 = vmatprep.mubr.bf16.mxu0 %v865_v2  ;;  %217 = vmatprep.mubr.bf16.mxu1 %v865_v2 }
   0x2   :  { %v900_v3 = vcombine.high %v34_v0, %v34_v0  ;;  %v902_v4 = vcombine.high %v35_v1, %v35_v1  ;;  %v797_v5 = vcombine.low %v34_v0, %v34_v0  ;;  %v799_v6 = vcombine.low %v35_v1, %v35_v1  ;;  %v907_v7 = vld [vmem:[%s1265_s1 + $0x64] ss:$16 sps:$4 sm:$0xff]   ;;  %833 = vset.pattern.permute.xlu0 %v865_v2  ;;  %v913_v8 = vld [vmem:[%s1265_s1 + $0x6c] ss:$16 sps:$4 sm:$0xff]   ;;  %v929_v11 = vld [vmem:[%s1265_s1 + $0x60] ss:$16 sps:$4 sm:$0xff]  }
   0x3   :  { %834 = vset.pattern.permute.xlu1 %v865_v2  ;;  %v936_v12 = vld [vmem:[%s1265_s1 + $0x68] ss:$16 sps:$4 sm:$0xff]   ;;  %v943_v13 = vld [vmem:[%s1265_s1 + $0x44] ss:$16 sps:$4 sm:$0xff]   ;;  %v948_v14 = vld [vmem:[%s1265_s1 + $0x4c] ss:$16 sps:$4 sm:$0xff]  }
   0x4   :  { %801 = vmatprep.subr.msk.bf16.mxu0 %vm131_vm0, %v900_v3  ;;  %803 = vmatprep.subr.msk.bf16.mxu1 %vm131_vm0, %v902_v4  ;;  %v921_v9 = vsel %vm131_vm0, %v797_v5, 0  ;;  %v924_v10 = vsel %vm131_vm0, %v799_v6, 0  ;;  %v953_v15 = vld [vmem:[%s1265_s1 + $0x40] ss:$16 sps:$4 sm:$0xff]   ;;  %v960_v16 = vld [vmem:[%s1265_s1 + $0x48] ss:$16 sps:$4 sm:$0xff]  }
   0x5   :  { %151 = vmatpush1.bf16.msra.mxu0 %v921_v9  ;;  %192 = vmatpush1.bf16.msra.mxu1 %v924_v10  ;;  %v965_v17 = vld [vmem:[%s1265_s1 + $0x24] ss:$16 sps:$4 sm:$0xff]   ;;  %v972_v18 = vld [vmem:[%s1265_s1 + $0x2c] ss:$16 sps:$4 sm:$0xff]   ;;  %v979_v19 = vld [vmem:[%s1265_s1 + $0x20] ss:$16 sps:$4 sm:$0xff]  }
   0x6   :  { %152 = vmatprep.subr.bf16.mxu0 %v907_v7  ;;  %193 = vmatprep.subr.bf16.mxu1 %v913_v8  ;;  %v984_v20 = vld [vmem:[%s1265_s1 + $0x28] ss:$16 sps:$4 sm:$0xff]   ;;  %v991_v21 = vld [vmem:[%s1265_s1 + $0x4] ss:$16 sps:$4 sm:$0xff]   ;;  %v996_v22 = vld [vmem:[%s1265_s1 + $0xc] ss:$16 sps:$4 sm:$0xff]  }
   0x7   :  { %v1003_v23 = vld [vmem:[%s1265_s1] ss:$16 sps:$4 sm:$0xff]   ;;  %v1008_v24 = vld [vmem:[%s1265_s1 + $0x8] ss:$16 sps:$4 sm:$0xff]   ;;  %v810_v27 = vld [vmem:[%s1266_s0 + $0x4] sm:$0x3] }
   0x8   :  { %v36_v25 = vld [vmem:[%s1266_s0] sm:$0x3]  ;;  %v805_v26 = vld [vmem:[%s1266_s0 + $0x2] sm:$0x3]  ;;  %v815_v28 = vld [vmem:[%s1266_s0 + $0x6] sm:$0x3] }
   0x9   :  { %153 = vmatpush1.bf16.msra.mxu0 %v929_v11  ;;  %194 = vmatpush1.bf16.msra.mxu1 %v936_v12 }
   0xa   :  { %154 = vmatprep.subr.bf16.mxu0 %v943_v13  ;;  %195 = vmatprep.subr.bf16.mxu1 %v948_v14 }
   0xd   :  { %155 = vmatpush1.bf16.msra.mxu0 %v953_v15  ;;  %196 = vmatpush1.bf16.msra.mxu1 %v960_v16 }
   0xe   :  { %156 = vmatprep.subr.bf16.mxu0 %v965_v17  ;;  %197 = vmatprep.subr.bf16.mxu1 %v972_v18 }
  0x11   :  { %157 = vmatpush1.bf16.msra.mxu0 %v979_v19  ;;  %198 = vmatpush1.bf16.msra.mxu1 %v984_v20 }
  0x12   :  { %158 = vmatprep.subr.bf16.mxu0 %v991_v21  ;;  %199 = vmatprep.subr.bf16.mxu1 %v996_v22 }
  0x15   :  { %159 = vmatpush1.bf16.msra.mxu0 %v1003_v23  ;;  %200 = vmatpush1.bf16.msra.mxu1 %v1008_v24 }
  0x16   :  { %806 = vmatprep.subr.msk.bf16.mxu0 %vm131_vm0, %v900_v3  ;;  %808 = vmatprep.subr.msk.bf16.mxu1 %vm131_vm0, %v902_v4 }
  0x18   :  { %802 = vmatmul.mubr.msk.bf16.vlgmr.msra.gmra.mxu0 %vm127_vm1, %v36_v25  ;;  %804 = vmatmul.mubr.msk.bf16.vlgmr.msra.gmra.mxu1 %vm127_vm1, %v36_v25 }
  0x19   :  { %238 = vmatpush1.bf16.msra.mxu0 %v921_v9  ;;  %279 = vmatpush1.bf16.msra.mxu1 %v924_v10 }
  0x1a   :  { %239 = vmatprep.subr.bf16.mxu0 %v907_v7  ;;  %280 = vmatprep.subr.bf16.mxu1 %v913_v8 }
  0x1b   :  { %263 = vmatprep.mubr.bf16.mxu0 %v865_v2  ;;  %304 = vmatprep.mubr.bf16.mxu1 %v865_v2 }
  0x1d   :  { %240 = vmatpush1.bf16.msra.mxu0 %v929_v11  ;;  %281 = vmatpush1.bf16.msra.mxu1 %v936_v12 }
  0x1e   :  { %241 = vmatprep.subr.bf16.mxu0 %v943_v13  ;;  %282 = vmatprep.subr.bf16.mxu1 %v948_v14 }
  0x21   :  { %242 = vmatpush1.bf16.msra.mxu0 %v953_v15  ;;  %283 = vmatpush1.bf16.msra.mxu1 %v960_v16 }
  0x22   :  { %243 = vmatprep.subr.bf16.mxu0 %v965_v17  ;;  %284 = vmatprep.subr.bf16.mxu1 %v972_v18 }
  0x25   :  { %244 = vmatpush1.bf16.msra.mxu0 %v979_v19  ;;  %285 = vmatpush1.bf16.msra.mxu1 %v984_v20 }
  0x26   :  { %245 = vmatprep.subr.bf16.mxu0 %v991_v21  ;;  %286 = vmatprep.subr.bf16.mxu1 %v996_v22 }
  0x29   :  { %246 = vmatpush1.bf16.msra.mxu0 %v1003_v23  ;;  %287 = vmatpush1.bf16.msra.mxu1 %v1008_v24 }
  0x2a   :  { %811 = vmatprep.subr.msk.bf16.mxu0 %vm131_vm0, %v900_v3  ;;  %813 = vmatprep.subr.msk.bf16.mxu1 %vm131_vm0, %v902_v4 }
  0x2c   :  { %807 = vmatmul.mubr.msk.bf16.vlgmr.msra.gmra.mxu0 %vm127_vm1, %v805_v26  ;;  %809 = vmatmul.mubr.msk.bf16.vlgmr.msra.gmra.mxu1 %vm127_vm1, %v805_v26 }
  0x2d   :  { %325 = vmatpush1.bf16.msra.mxu0 %v921_v9  ;;  %366 = vmatpush1.bf16.msra.mxu1 %v924_v10 }
  0x2e   :  { %326 = vmatprep.subr.bf16.mxu0 %v907_v7  ;;  %367 = vmatprep.subr.bf16.mxu1 %v913_v8 }
  0x2f   :  { %350 = vmatprep.mubr.bf16.mxu0 %v865_v2  ;;  %391 = vmatprep.mubr.bf16.mxu1 %v865_v2 }
  0x31   :  { %327 = vmatpush1.bf16.msra.mxu0 %v929_v11  ;;  %368 = vmatpush1.bf16.msra.mxu1 %v936_v12 }
  0x32   :  { %328 = vmatprep.subr.bf16.mxu0 %v943_v13  ;;  %369 = vmatprep.subr.bf16.mxu1 %v948_v14 }
  0x35   :  { %329 = vmatpush1.bf16.msra.mxu0 %v953_v15  ;;  %370 = vmatpush1.bf16.msra.mxu1 %v960_v16 }
  0x36   :  { %330 = vmatprep.subr.bf16.mxu0 %v965_v17  ;;  %371 = vmatprep.subr.bf16.mxu1 %v972_v18 }
  0x39   :  { %331 = vmatpush1.bf16.msra.mxu0 %v979_v19  ;;  %372 = vmatpush1.bf16.msra.mxu1 %v984_v20 }
  0x3a   :  { %332 = vmatprep.subr.bf16.mxu0 %v991_v21  ;;  %373 = vmatprep.subr.bf16.mxu1 %v996_v22 }
  0x3d   :  { %333 = vmatpush1.bf16.msra.mxu0 %v1003_v23  ;;  %374 = vmatpush1.bf16.msra.mxu1 %v1008_v24 }
  0x3e   :  { %816 = vmatprep.subr.msk.bf16.mxu0 %vm131_vm0, %v900_v3  ;;  %818 = vmatprep.subr.msk.bf16.mxu1 %vm131_vm0, %v902_v4 }
  0x40   :  { %812 = vmatmul.mubr.msk.bf16.vlgmr.msra.gmra.mxu0 %vm127_vm1, %v810_v27  ;;  %814 = vmatmul.mubr.msk.bf16.vlgmr.msra.gmra.mxu1 %vm127_vm1, %v810_v27 }
  0x41   :  { %412 = vmatpush1.bf16.msra.mxu0 %v921_v9  ;;  %453 = vmatpush1.bf16.msra.mxu1 %v924_v10 }
  0x42   :  { %413 = vmatprep.subr.bf16.mxu0 %v907_v7  ;;  %454 = vmatprep.subr.bf16.mxu1 %v913_v8 }
  0x43   :  { %437 = vmatprep.mubr.bf16.mxu0 %v865_v2  ;;  %478 = vmatprep.mubr.bf16.mxu1 %v865_v2 }
  0x45   :  { %414 = vmatpush1.bf16.msra.mxu0 %v929_v11  ;;  %455 = vmatpush1.bf16.msra.mxu1 %v936_v12 }
  0x46   :  { %415 = vmatprep.subr.bf16.mxu0 %v943_v13  ;;  %456 = vmatprep.subr.bf16.mxu1 %v948_v14 }
  0x49   :  { %416 = vmatpush1.bf16.msra.mxu0 %v953_v15  ;;  %457 = vmatpush1.bf16.msra.mxu1 %v960_v16 }
  0x4a   :  { %417 = vmatprep.subr.bf16.mxu0 %v965_v17  ;;  %458 = vmatprep.subr.bf16.mxu1 %v972_v18 }
  0x4d   :  { %418 = vmatpush1.bf16.msra.mxu0 %v979_v19  ;;  %459 = vmatpush1.bf16.msra.mxu1 %v984_v20 }
  0x4e   :  { %419 = vmatprep.subr.bf16.mxu0 %v991_v21  ;;  %460 = vmatprep.subr.bf16.mxu1 %v996_v22 }
  0x51   :  { %420 = vmatpush1.bf16.msra.mxu0 %v1003_v23  ;;  %461 = vmatpush1.bf16.msra.mxu1 %v1008_v24 }
  0x54   :  { %817 = vmatmul.mubr.msk.bf16.vlgmr.msra.gmra.mxu0 %vm127_vm1, %v815_v28  ;;  %819 = vmatmul.mubr.msk.bf16.vlgmr.msra.gmra.mxu1 %vm127_vm1, %v815_v28 }
  0xd8   :  { %v1106_v29 = vpop.f32.mrf.mxu0  ;;  %v1108_v30 = vpop.f32.mrf.mxu1 }
  0xd9   :  { %v487_v31 = vsel %vm131_vm0, %v1106_v29, 0.0  ;;  %v490_v35 = vsel %vm131_vm0, %v1108_v30, 0.0 }
  0xda   :  { %v1112_v32 = vpop.f32.mrf.mxu0  ;;  %v1114_v33 = vpop.f32.mrf.mxu1 }
  0xdb   :  { %v488_v34 = vsel %vm131_vm0, %v1112_v32, 0.0  ;;  %v492_v39 = vsel %vm131_vm0, %v1114_v33, 0.0 }
  0xdc   :  { %v182_v36 = vpop.f32.mrf.mxu0  ;;  %v223_v37 = vpop.f32.mrf.mxu1  ;;  %v489_v38 = vadd.f32 %v488_v34, %v487_v31 }
  0xde   :  { %v183_v40 = vpop.f32.mrf.mxu0  ;;  %v224_v41 = vpop.f32.mrf.mxu1  ;;  %v491_v42 = vadd.f32 %v490_v35, %v489_v38 }
  0xe0   :  { %v493_v43 = vadd.f32 %v492_v39, %v491_v42 }
  0xe2   :  { %494 = vadd.xlane.f32.xlu0 %v493_v43 }
  0xec   :  { %v1122_v44 = vpop.f32.mrf.mxu0  ;;  %v1124_v45 = vpop.f32.mrf.mxu1 }
  0xed   :  { %v497_v46 = vsel %vm131_vm0, %v1122_v44, 0.0  ;;  %v500_v49 = vsel %vm131_vm0, %v1124_v45, 0.0 }
  0xee   :  { %v1128_v47 = vpop.f32.mrf.mxu0  ;;  %v1130_v48 = vpop.f32.mrf.mxu1 }
  0xef   :  { %v498_v50 = vsel %vm131_vm0, %v1128_v47, 0.0  ;;  %v502_v54 = vsel %vm131_vm0, %v1130_v48, 0.0 }
  0xf0   :  { %v499_v51 = vadd.f32 %v498_v50, %v497_v46  ;;  %v269_v52 = vpop.f32.mrf.mxu0  ;;  %v310_v53 = vpop.f32.mrf.mxu1 }
  0xf2   :  { %v270_v55 = vpop.f32.mrf.mxu0  ;;  %v311_v56 = vpop.f32.mrf.mxu1  ;;  %v501_v57 = vadd.f32 %v500_v49, %v499_v51 }
  0xf4   :  { %v503_v58 = vadd.f32 %v502_v54, %v501_v57 }
  0xf6   :  { %504 = vadd.xlane.f32.xlu0 %v503_v58 }
 0x100   :  { %v1138_v59 = vpop.f32.mrf.mxu0  ;;  %v1140_v60 = vpop.f32.mrf.mxu1 }
 0x101   :  { %v507_v61 = vsel %vm131_vm0, %v1138_v59, 0.0  ;;  %v510_v1 = vsel %vm131_vm0, %v1140_v60, 0.0 }
 0x102   :  { %v1144_v62 = vpop.f32.mrf.mxu0  ;;  %v1146_v63 = vpop.f32.mrf.mxu1 }
 0x103   :  { %v508_v0 = vsel %vm131_vm0, %v1144_v62, 0.0  ;;  %v512_v5 = vsel %vm131_vm0, %v1146_v63, 0.0 }
 0x104   :  { %v356_v2 = vpop.f32.mrf.mxu0  ;;  %v397_v3 = vpop.f32.mrf.mxu1  ;;  %v509_v4 = vadd.f32 %v508_v0, %v507_v61 }
 0x106   :  { %v357_v6 = vpop.f32.mrf.mxu0  ;;  %v398_v7 = vpop.f32.mrf.mxu1  ;;  %v511_v8 = vadd.f32 %v510_v1, %v509_v4 }
 0x108   :  { %v513_v9 = vadd.f32 %v512_v5, %v511_v8 }
 0x10a   :  { %514 = vadd.xlane.f32.xlu1 %v513_v9 }
 0x114   :  { %v1154_v10 = vpop.f32.mrf.mxu0  ;;  %v1156_v11 = vpop.f32.mrf.mxu1 }
 0x115   :  { %v517_v14 = vsel %vm131_vm0, %v1154_v10, 0.0  ;;  %v520_v15 = vsel %vm131_vm0, %v1156_v11, 0.0 }
 0x116   :  { %v1158_v12 = vpop.f32.mrf.mxu0  ;;  %v1160_v13 = vpop.f32.mrf.mxu1 }
 0x117   :  { %v518_v16 = vsel %vm131_vm0, %v1158_v12, 0.0  ;;  %v522_v23 = vsel %vm131_vm0, %v1160_v13, 0.0 }
 0x118   :  { %v519_v17 = vadd.f32 %v518_v16, %v517_v14  ;;  %v443_v18 = vpop.f32.mrf.mxu0  ;;  %v484_v19 = vpop.f32.mrf.mxu1 }
 0x11a   :  { %v444_v20 = vpop.f32.mrf.mxu0  ;;  %v485_v21 = vpop.f32.mrf.mxu1  ;;  %v521_v22 = vadd.f32 %v520_v15, %v519_v17 }
 0x11c   :  { %v523_v24 = vadd.f32 %v522_v23, %v521_v22 }
 0x11e   :  { %524 = vadd.xlane.f32.xlu1 %v523_v24 }
 0x16b   :  { %v495_v25 = vpop.xlane.xlu0 %494 }
 0x17f   :  { %v505_v26 = vpop.xlane.xlu0 %504 }
 0x180   :  { %v506_v28 = vadd.f32 %v505_v26, %v495_v25 }
 0x193   :  { %v515_v27 = vpop.xlane.xlu1 %514 }
 0x194   :  { %v516_v31 = vadd.f32 %v515_v27, %v506_v28 }
 0x1a7   :  { %v525_v34 = vpop.xlane.xlu1 %524 }
 0x1a8   :  { %v526_v35 = vadd.f32 %v525_v34, %v516_v31 }
 0x1aa   :  { %v1170_v36 = vmul.f32 0.00048828125, %v526_v35 }
 0x1ac   :  { %v546_v37 = vsub.f32 %v1122_v44, %v1170_v36  ;;  %v547_v38 = vsub.f32 %v1128_v47, %v1170_v36  ;;  %v548_v39 = vsub.f32 %v1124_v45, %v1170_v36  ;;  %v549_v40 = vsub.f32 %v1130_v48, %v1170_v36 }
 0x1ad   :  { %v528_v41 = vsub.f32 %v1106_v29, %v1170_v36  ;;  %v529_v42 = vsub.f32 %v1112_v32, %v1170_v36  ;;  %v530_v43 = vsub.f32 %v1108_v30, %v1170_v36  ;;  %v531_v46 = vsub.f32 %v1114_v33, %v1170_v36 }
 0x1ae   :  { %v550_v49 = vmul.f32 %v546_v37, %v546_v37  ;;  %v551_v50 = vmul.f32 %v547_v38, %v547_v38  ;;  %v552_v51 = vmul.f32 %v548_v39, %v548_v39  ;;  %v553_v52 = vmul.f32 %v549_v40, %v549_v40 }
 0x1af   :  { %v532_v53 = vmul.f32 %v528_v41, %v528_v41  ;;  %v533_v54 = vmul.f32 %v529_v42, %v529_v42  ;;  %v534_v55 = vmul.f32 %v530_v43, %v530_v43  ;;  %v535_v56 = vmul.f32 %v531_v46, %v531_v46 }
 0x1b0   :  { %v554_v57 = vsel %vm131_vm0, %v550_v49, 0.0  ;;  %v555_v58 = vsel %vm131_vm0, %v551_v50, 0.0  ;;  %v557_v61 = vsel %vm131_vm0, %v552_v51, 0.0  ;;  %v559_v0 = vsel %vm131_vm0, %v553_v52, 0.0 }
 0x1b1   :  { %v556_v1 = vadd.f32 %v555_v58, %v554_v57  ;;  %v536_v2 = vsel %vm131_vm0, %v532_v53, 0.0  ;;  %v537_v3 = vsel %vm131_vm0, %v533_v54, 0.0  ;;  %v539_v4 = vsel %vm131_vm0, %v534_v55, 0.0 }
 0x1b2   :  { %v538_v5 = vadd.f32 %v537_v3, %v536_v2  ;;  %v541_v6 = vsel %vm131_vm0, %v535_v56, 0.0  ;;  %v582_v7 = vsub.f32 %v1154_v10, %v1170_v36  ;;  %v583_v8 = vsub.f32 %v1158_v12, %v1170_v36  ;;  %v601_v3 = vld [vmem:[%s1267_s2] sm:$0xf] }
 0x1b3   :  { %v558_v9 = vadd.f32 %v557_v61, %v556_v1  ;;  %v584_v14 = vsub.f32 %v1156_v11, %v1170_v36  ;;  %v585_v15 = vsub.f32 %v1160_v13, %v1170_v36  ;;  %v564_v16 = vsub.f32 %v1138_v59, %v1170_v36 }
 0x1b4   :  { %v540_v17 = vadd.f32 %v539_v4, %v538_v5  ;;  %v586_v18 = vmul.f32 %v582_v7, %v582_v7  ;;  %v587_v19 = vmul.f32 %v583_v8, %v583_v8  ;;  %v565_v20 = vsub.f32 %v1144_v62, %v1170_v36 }
 0x1b5   :  { %v560_v21 = vadd.f32 %v559_v0, %v558_v9  ;;  %v588_v22 = vmul.f32 %v584_v14, %v584_v14  ;;  %v589_v23 = vmul.f32 %v585_v15, %v585_v15  ;;  %v566_v24 = vsub.f32 %v1140_v60, %v1170_v36 }
 0x1b6   :  { %v542_v25 = vadd.f32 %v541_v6, %v540_v17  ;;  %v590_v26 = vsel %vm131_vm0, %v586_v18, 0.0  ;;  %v591_v27 = vsel %vm131_vm0, %v587_v19, 0.0  ;;  %v567_v28 = vsub.f32 %v1146_v63, %v1170_v36  ;;  %v605_v6 = vld [vmem:[%s1268_s3] sm:$0xf] }
 0x1b7   :  { %561 = vadd.xlane.f32.xlu1 %v560_v21  ;;  %v592_v31 = vadd.f32 %v591_v27, %v590_v26  ;;  %v568_v34 = vmul.f32 %v564_v16, %v564_v16  ;;  %v593_v35 = vsel %vm131_vm0, %v588_v22, 0.0  ;;  %v569_v37 = vmul.f32 %v565_v20, %v565_v20 }
 0x1b8   :  { %543 = vadd.xlane.f32.xlu0 %v542_v25  ;;  %v570_v38 = vmul.f32 %v566_v24, %v566_v24  ;;  %v595_v41 = vsel %vm131_vm0, %v589_v23, 0.0  ;;  %v571_v42 = vmul.f32 %v567_v28, %v567_v28  ;;  %v866_v9 = vmov 1983009808  }
 0x1b9   :  { %v594_v39 = vadd.f32 %v593_v35, %v592_v31  ;;  %v572_v40 = vsel %vm131_vm0, %v568_v34, 0.0  ;;  %v573_v43 = vsel %vm131_vm0, %v569_v37, 0.0  ;;  %v641_v14 = vunpack.c.l.s4 %v866_v9 }
 0x1ba   :  { %v574_v49 = vadd.f32 %v573_v43, %v572_v40  ;;  %v575_v50 = vsel %vm131_vm0, %v570_v38, 0.0  ;;  %v577_v52 = vsel %vm131_vm0, %v571_v42, 0.0  ;;  %v643_v15 = vlaneseq }
 0x1bb   :  { %v596_v46 = vadd.f32 %v595_v41, %v594_v39  ;;  %v642_v16 = vunpack.c.0.s8 %v641_v14 }
 0x1bc   :  { %v576_v51 = vadd.f32 %v575_v50, %v574_v49  ;;  %v644_v17 = vshrl.u32 %v643_v15, 7 }
 0x1bd   :  { %597 = vadd.xlane.f32.xlu1 %v596_v46 }
 0x1be   :  { %v578_v53 = vadd.f32 %v577_v52, %v576_v51  ;;  %v1227_v19 = vsub.s32 %v642_v16, %v644_v17 }
 0x1c0   :  { %579 = vadd.xlane.f32.xlu0 %v578_v53 }
 0x240   :  { %v562_v55 = vpop.xlane.xlu1 %561 }
 0x241   :  { %v544_v54 = vpop.xlane.xlu0 %543 }
 0x242   :  { %v563_v56 = vadd.f32 %v562_v55, %v544_v54 }
 0x246   :  { %v598_v61 = vpop.xlane.xlu1 %597 }
 0x249   :  { %v580_v57 = vpop.xlane.xlu0 %579 }
 0x24a   :  { %v581_v58 = vadd.f32 %v580_v57, %v563_v56 }
 0x24c   :  { %v599_v0 = vadd.f32 %v598_v61, %v581_v58 }
 0x24e   :  { %v600_v1 = vmul.f32 0.00048828125, %v599_v0 }
 0x250   :  { %v602_v2 = vadd.f32 1e-05, %v600_v1 }
 0x252   :  { %863 = vrsqrt.f32 %v602_v2 }
 0x25f   :  { %v864_v4 = vpop.eup %863 }
 0x260   :  { %v604_v5 = vmul.f32 %v864_v4, %v601_v3 }
 0x262   :  { %610 = vperm.xlu0 %833, %v604_v5   ;;  %v606_v7 = vmul.f32 %v604_v5, %v1170_v36 }
 0x264   :  { %v607_v8 = vsub.f32 %v605_v6, %v606_v7 }
 0x266   :  { %619 = vperm.xlu1 %834, %v607_v8  }
 0x2dd   :  { %v611_v18 = vpop.permute.xlu0 %610 }
 0x2de   :  { %v613_v20 = vmul.f32 %v611_v18, %v1106_v29  ;;  %v614_v21 = vmul.f32 %v611_v18, %v1112_v32  ;;  %v615_v22 = vmul.f32 %v611_v18, %v1108_v30  ;;  %v616_v23 = vmul.f32 %v611_v18, %v1114_v33 }
 0x2df   :  { %v657_v36 = vmul.f32 %v611_v18, %v1122_v44  ;;  %v658_v24 = vmul.f32 %v611_v18, %v1128_v47  ;;  %v659_v25 = vmul.f32 %v611_v18, %v1124_v45  ;;  %v660_v26 = vmul.f32 %v611_v18, %v1130_v48 }
 0x2e0   :  { %v697_v27 = vmul.f32 %v611_v18, %v1138_v59  ;;  %v698_v28 = vmul.f32 %v611_v18, %v1144_v62  ;;  %v699_v29 = vmul.f32 %v611_v18, %v1140_v60  ;;  %v700_v32 = vmul.f32 %v611_v18, %v1146_v63 }
 0x2e1   :  { %v737_v30 = vmul.f32 %v611_v18, %v1154_v10  ;;  %v738_v33 = vmul.f32 %v611_v18, %v1158_v12  ;;  %v739_v44 = vmul.f32 %v611_v18, %v1156_v11  ;;  %v740_v47 = vmul.f32 %v611_v18, %v1160_v13  ;;  %v620_v31 = vpop.permute.xlu1 %619 }
 0x2e2   :  { %v622_v45 = vadd.f32 %v620_v31, %v613_v20  ;;  %v623_v34 = vadd.f32 %v620_v31, %v614_v21  ;;  %v624_v48 = vadd.f32 %v620_v31, %v615_v22  ;;  %v625_v35 = vadd.f32 %v620_v31, %v616_v23 }
 0x2e3   :  { %v661_v59 = vadd.f32 %v657_v36, %v620_v31  ;;  %v662_v37 = vadd.f32 %v658_v24, %v620_v31  ;;  %v663_v62 = vadd.f32 %v659_v25, %v620_v31  ;;  %v664_v38 = vadd.f32 %v660_v26, %v620_v31 }
 0x2e4   :  { %v626_v60 = vmax.f32 %v622_v45, 0.0  ;;  %v627_v39 = vmax.f32 %v623_v34, 0.0  ;;  %v628_v63 = vmax.f32 %v624_v48, 0.0  ;;  %v629_v40 = vmax.f32 %v625_v35, 0.0 }
 0x2e5   :  { %v665_v10 = vmax.f32 %v661_v59, 0.0  ;;  %v666_v41 = vmax.f32 %v662_v37, 0.0  ;;  %v667_v12 = vmax.f32 %v663_v62, 0.0  ;;  %v668_v42 = vmax.f32 %v664_v38, 0.0 }
 0x2e6   :  { %v820_v11 = vpack.c.bf16 %v627_v39, %v626_v60  ;;  %v821_v43 = vpack.c.bf16 %v629_v40, %v628_v63  ;;  %v701_v13 = vadd.f32 %v697_v27, %v620_v31  ;;  %v702_v46 = vadd.f32 %v698_v28, %v620_v31 }
 0x2e7   :  { %v822_v49 = vpack.c.bf16 %v666_v41, %v665_v10  ;;  %v823_v50 = vpack.c.bf16 %v668_v42, %v667_v12  ;;  %v703_v51 = vadd.f32 %v699_v29, %v620_v31  ;;  %v704_v52 = vadd.f32 %v700_v32, %v620_v31 }
 0x2e8   :  { %v646_v53 = vrot.slane %v820_v11, %v1227_v19  ;;  %v653_v54 = vrot.slane %v821_v43, %v1227_v19  ;;  %v705_v55 = vmax.f32 %v701_v13, 0.0  ;;  %v706_v56 = vmax.f32 %v702_v46, 0.0 }
 0x2e9   :  { %v685_v57 = vrot.slane %v822_v49, %v1227_v19  ;;  %v692_v58 = vrot.slane %v823_v50, %v1227_v19  ;;  %v707_v61 = vmax.f32 %v703_v51, 0.0  ;;  %v708_v0 = vmax.f32 %v704_v52, 0.0 }
 0x2ea   :  { %v654_v1 = vcombine.low %v646_v53, %v653_v54  ;;  %v825_v2 = vpack.c.bf16 %v706_v56, %v705_v55  ;;  %v741_v3 = vadd.f32 %v737_v30, %v620_v31  ;;  %v742_v4 = vadd.f32 %v738_v33, %v620_v31 }
 0x2eb   :  { %v693_v5 = vcombine.low %v685_v57, %v692_v58  ;;  %v826_v6 = vpack.c.bf16 %v708_v0, %v707_v61  ;;  %v743_v7 = vadd.f32 %v739_v44, %v620_v31  ;;  %v744_v8 = vadd.f32 %v740_v47, %v620_v31 }
 0x2ec   :  { %656 = vst [vmem:[%s1269_s4] sm:$0xff] %v654_v1  ;;  %v725_v9 = vrot.slane %v825_v2, %v1227_v19  ;;  %v745_v14 = vmax.f32 %v741_v3, 0.0  ;;  %v746_v15 = vmax.f32 %v742_v4, 0.0 }
 0x2ed   :  { %824 = vst [vmem:[%s1269_s4 + $0x8] sm:$0xff] %v693_v5  ;;  %v732_v16 = vrot.slane %v826_v6, %v1227_v19  ;;  %v747_v17 = vmax.f32 %v743_v7, 0.0  ;;  %v748_v18 = vmax.f32 %v744_v8, 0.0 }
 0x2ee   :  { %v828_v20 = vpack.c.bf16 %v746_v15, %v745_v14 }
 0x2ef   :  { %v733_v21 = vcombine.low %v725_v9, %v732_v16  ;;  %v829_v22 = vpack.c.bf16 %v748_v18, %v747_v17 }
 0x2f0   :  { %v765_v23 = vrot.slane %v828_v20, %v1227_v19 }
 0x2f1   :  { %827 = vst [vmem:[%s1269_s4 + $0x10] sm:$0xff] %v733_v21  ;;  %v772_v36 = vrot.slane %v829_v22, %v1227_v19 }
 0x2f3   :  { %v773_v24 = vcombine.low %v765_v23, %v772_v36 }
 0x2f5   :  { %830 = vst [vmem:[%s1269_s4 + $0x18] sm:$0xff] %v773_v24 }

// kernel: _lambda_.11
= control target key start
LH: loop header
LB: loop body
LE: loop exit
PB: predicated region body
PF: predicated region fallthrough
CT: control target
= control target key end

     0   :  { %vm266_vm0 = vcmask 1041408   ;;  %v2177_v3 = vmov 0   ;;  %vm262_vm1 = vcmask 293888   ;;  %s2914_s1 = inlined_call_operand.vmem [shape: bf16[36,2048], index: 1, kind: input, shape index: {}]   ;;  %s2915_s0 = inlined_call_operand.vmem [shape: bf16[4,3,36], index: 0, kind: input, shape index: {}]   ;;  %s2916_s2 = inlined_call_operand.vmem [shape: f32[3,1], index: 2, kind: input, shape index: {}]   ;;  %s2917_s3 = inlined_call_operand.vmem [shape: f32[4,3,2048], index: 3, kind: output, shape index: {}]  }
   0x1   :  { %v47_v0 = vld [vmem:[%s2914_s1 + $0x100] sm:$0x33]  ;;  %v48_v1 = vld [vmem:[%s2914_s1 + $0x108] sm:$0x33]  ;;  %347 = vmatprep.mubr.bf16.mxu0 %v2177_v3  ;;  %388 = vmatprep.mubr.bf16.mxu1 %v2177_v3  ;;  %v49_v23 = vld [vmem:[%s2914_s1 + $0x110] sm:$0x33] }
   0x2   :  { %v31_v2 = vld [vmem:[%s2914_s1 + $0x80] sm:$0xff]  ;;  %v2209_v4 = vcombine.high %v47_v0, %v47_v0  ;;  %v2211_v5 = vcombine.high %v48_v1, %v48_v1  ;;  %v1923_v6 = vcombine.low %v47_v0, %v47_v0  ;;  %v1925_v7 = vcombine.low %v48_v1, %v48_v1  ;;  %v32_v9 = vld [vmem:[%s2914_s1 + $0x88] sm:$0xff]  ;;  %2031 = vset.pattern.permute.xlu0 %v2177_v3  ;;  %v50_v24 = vld [vmem:[%s2914_s1 + $0x118] sm:$0x33] }
   0x3   :  { %v39_v8 = vld [vmem:[%s2914_s1 + $0xc0] sm:$0xff]  ;;  %v40_v10 = vld [vmem:[%s2914_s1 + $0xc8] sm:$0xff]  ;;  %2032 = vset.pattern.permute.xlu1 %v2177_v3  ;;  %v2274_v27 = vcombine.high %v49_v23, %v49_v23  ;;  %v2278_v28 = vcombine.high %v50_v24, %v50_v24  ;;  %v1927_v29 = vcombine.low %v49_v23, %v49_v23  ;;  %v1929_v30 = vcombine.low %v50_v24, %v50_v24  ;;  %v33_v31 = vld [vmem:[%s2914_s1 + $0x90] sm:$0xff] }
   0x4   :  { %v2223_v11 = vcombine.high %v31_v2, %v39_v8  ;;  %v2225_v12 = vcombine.high %v32_v9, %v40_v10  ;;  %v15_v13 = vld [vmem:[%s2914_s1] sm:$0xff]  ;;  %v16_v15 = vld [vmem:[%s2914_s1 + $0x8] sm:$0xff]  ;;  %1939 = vmatprep.subr.msk.bf16.mxu0 %vm266_vm0, %v2209_v4  ;;  %1941 = vmatprep.subr.msk.bf16.mxu1 %vm266_vm0, %v2211_v5  ;;  %v2242_v16 = vsel %vm266_vm0, %v1923_v6, 0  ;;  %v2245_v17 = vsel %vm266_vm0, %v1925_v7, 0  ;;  %v41_v32 = vld [vmem:[%s2914_s1 + $0xd0] sm:$0xff] }
   0x5   :  { %v23_v14 = vld [vmem:[%s2914_s1 + $0x40] sm:$0xff]  ;;  %v24_v18 = vld [vmem:[%s2914_s1 + $0x48] sm:$0xff]  ;;  %326 = vmatpush1.bf16.msra.mxu0 %v2242_v16  ;;  %367 = vmatpush1.bf16.msra.mxu1 %v2245_v17  ;;  %v2252_v19 = vcombine.low %v31_v2, %v39_v8  ;;  %v2254_v20 = vcombine.low %v32_v9, %v40_v10  ;;  %v34_v33 = vld [vmem:[%s2914_s1 + $0x98] sm:$0xff]  ;;  %v2304_v36 = vsel %vm266_vm0, %v1927_v29, 0  ;;  %v2307_v37 = vsel %vm266_vm0, %v1929_v30, 0 }
   0x6   :  { %327 = vmatprep.subr.bf16.mxu0 %v2223_v11  ;;  %368 = vmatprep.subr.bf16.mxu1 %v2225_v12  ;;  %v2258_v21 = vcombine.high %v15_v13, %v23_v14  ;;  %v2260_v22 = vcombine.high %v16_v15, %v24_v18  ;;  %v2270_v25 = vcombine.low %v15_v13, %v23_v14  ;;  %v42_v34 = vld [vmem:[%s2914_s1 + $0xd8] sm:$0xff]  ;;  %v2297_v35 = vld [vmem:[%s2915_s0] sm:$0x3]  ;;  %v17_v40 = vld [vmem:[%s2914_s1 + $0x10] sm:$0xff] }
   0x7   :  { %v2272_v26 = vcombine.low %v16_v15, %v24_v18  ;;  %v2309_v38 = vcombine.high %v33_v31, %v41_v32  ;;  %v2311_v39 = vcombine.high %v34_v33, %v42_v34  ;;  %v25_v41 = vld [vmem:[%s2914_s1 + $0x50] sm:$0xff]  ;;  %v18_v42 = vld [vmem:[%s2914_s1 + $0x18] sm:$0xff]  ;;  %v2331_v44 = vcombine.low %v33_v31, %v41_v32  ;;  %v56_v46 = vld [vmem:[%s2916_s2] sm:$0x7] }
   0x8   :  { %v26_v43 = vld [vmem:[%s2914_s1 + $0x58] sm:$0xff]  ;;  %v2333_v45 = vcombine.low %v34_v33, %v42_v34  ;;  %v2340_v47 = vcombine.high %v17_v40, %v25_v41  ;;  %v51_v49 = vld [vmem:[%s2914_s1 + $0x120] sm:$0x33]  ;;  %v52_v50 = vld [vmem:[%s2914_s1 + $0x128] sm:$0x33]  ;;  %59 = vperm.xlu0 %2031, %v56_v46   ;;  %v2354_v51 = vcombine.low %v17_v40, %v25_v41 }
   0x9   :  { %328 = vmatpush1.bf16.msra.mxu0 %v2252_v19  ;;  %369 = vmatpush1.bf16.msra.mxu1 %v2254_v20  ;;  %v2342_v48 = vcombine.high %v18_v42, %v26_v43  ;;  %v2356_v52 = vcombine.low %v18_v42, %v26_v43  ;;  %v2358_v53 = vcombine.high %v51_v49, %v51_v49  ;;  %v701_v54 = vld [vmem:[%s2916_s2] sm:$0x7]  ;;  %v36_v60 = vld [vmem:[%s2914_s1 + $0xa8] sm:$0xff]  ;;  %v53_v15 = vld [vmem:[%s2914_s1 + $0x130] sm:$0x33] }
   0xa   :  { %329 = vmatprep.subr.bf16.mxu0 %v2258_v21  ;;  %370 = vmatprep.subr.bf16.mxu1 %v2260_v22  ;;  %v2365_v55 = vcombine.high %v52_v50, %v52_v50  ;;  %v1931_v56 = vcombine.low %v51_v49, %v51_v49  ;;  %v1933_v57 = vcombine.low %v52_v50, %v52_v50  ;;  %v35_v58 = vld [vmem:[%s2914_s1 + $0xa0] sm:$0xff]  ;;  %v44_v61 = vld [vmem:[%s2914_s1 + $0xe8] sm:$0xff]  ;;  %v54_v18 = vld [vmem:[%s2914_s1 + $0x138] sm:$0x33] }
   0xb   :  { %v43_v59 = vld [vmem:[%s2914_s1 + $0xe0] sm:$0xff]  ;;  %v2393_v1 = vcombine.high %v36_v60, %v44_v61  ;;  %v20_v7 = vld [vmem:[%s2914_s1 + $0x28] sm:$0xff]  ;;  %v2415_v10 = vcombine.low %v36_v60, %v44_v61  ;;  %v2437_v29 = vcombine.high %v53_v15, %v53_v15  ;;  %v2441_v30 = vcombine.high %v54_v18, %v54_v18  ;;  %v37_v33 = vld [vmem:[%s2914_s1 + $0xb0] sm:$0xff] }
   0xc   :  { %704 = vperm.xlu0 %2031, %v701_v54   ;;  %v2386_v62 = vsel %vm266_vm0, %v1931_v56, 0  ;;  %v2389_v63 = vsel %vm266_vm0, %v1933_v57, 0  ;;  %v2391_v0 = vcombine.high %v35_v58, %v43_v59  ;;  %v19_v2 = vld [vmem:[%s2914_s1 + $0x20] sm:$0xff]  ;;  %v28_v8 = vld [vmem:[%s2914_s1 + $0x68] sm:$0xff]  ;;  %v2413_v9 = vcombine.low %v35_v58, %v43_v59  ;;  %v45_v34 = vld [vmem:[%s2914_s1 + $0xf0] sm:$0xff] }
   0xd   :  { %330 = vmatpush1.bf16.msra.mxu0 %v2270_v25  ;;  %371 = vmatpush1.bf16.msra.mxu1 %v2272_v26  ;;  %v27_v6 = vld [vmem:[%s2914_s1 + $0x60] sm:$0xff]  ;;  %v2421_v14 = vcombine.high %v20_v7, %v28_v8  ;;  %v2435_v24 = vcombine.low %v20_v7, %v28_v8  ;;  %v1935_v31 = vcombine.low %v53_v15, %v53_v15  ;;  %v38_v40 = vld [vmem:[%s2914_s1 + $0xb8] sm:$0xff]  ;;  %v21_v50 = vld [vmem:[%s2914_s1 + $0x30] sm:$0xff] }
   0xe   :  { %1943 = vmatprep.subr.msk.bf16.mxu0 %vm266_vm0, %v2274_v27  ;;  %1945 = vmatprep.subr.msk.bf16.mxu1 %vm266_vm0, %v2278_v28  ;;  %v2419_v13 = vcombine.high %v19_v2, %v27_v6  ;;  %v2433_v23 = vcombine.low %v19_v2, %v27_v6  ;;  %v1937_v32 = vcombine.low %v54_v18, %v54_v18  ;;  %v46_v41 = vld [vmem:[%s2914_s1 + $0xf8] sm:$0xff]  ;;  %v29_v54 = vld [vmem:[%s2914_s1 + $0x70] sm:$0xff]  ;;  %v1097_v7 = vld [vmem:[%s2916_s2] sm:$0x7] }
   0xf   :  { %v2462_v42 = vsel %vm266_vm0, %v1935_v31, 0  ;;  %v2467_v46 = vcombine.high %v37_v33, %v45_v34  ;;  %v2469_v49 = vcombine.high %v38_v40, %v46_v41  ;;  %v22_v56 = vld [vmem:[%s2914_s1 + $0x38] sm:$0xff]  ;;  %v2489_v58 = vcombine.low %v37_v33, %v45_v34  ;;  %1100 = vperm.xlu1 %2032, %v1097_v7   ;;  %v1493_v8 = vld [vmem:[%s2916_s2] sm:$0x7]  ;;  %v1980_v15 = vld [vmem:[%s2915_s0 + $0x4] sm:$0x3] }
  0x10   :  { %1940 = vmatmul.mubr.msk.bf16.vlgmr.msra.gmra.mxu0 %vm262_vm1, %v2297_v35  ;;  %1942 = vmatmul.mubr.msk.bf16.vlgmr.msra.gmra.mxu1 %vm262_vm1, %v2297_v35  ;;  %v2465_v43 = vsel %vm266_vm0, %v1937_v32, 0  ;;  %v30_v57 = vld [vmem:[%s2914_s1 + $0x78] sm:$0xff]  ;;  %v2491_v59 = vcombine.low %v38_v40, %v46_v41  ;;  %v2495_v60 = vcombine.high %v21_v50, %v29_v54  ;;  %v2503_v2 = vcombine.low %v21_v50, %v29_v54 }
  0x11   :  { %408 = vmatpush1.bf16.msra.mxu0 %v2304_v36  ;;  %449 = vmatpush1.bf16.msra.mxu1 %v2307_v37  ;;  %v2497_v61 = vcombine.high %v22_v56, %v30_v57  ;;  %v2505_v6 = vcombine.low %v22_v56, %v30_v57 }
  0x12   :  { %409 = vmatprep.subr.bf16.mxu0 %v2309_v38  ;;  %450 = vmatprep.subr.bf16.mxu1 %v2311_v39 }
  0x13   :  { %429 = vmatprep.mubr.bf16.mxu0 %v2177_v3  ;;  %470 = vmatprep.mubr.bf16.mxu1 %v2177_v3 }
  0x14   :  { %1496 = vperm.xlu1 %2032, %v1493_v8  }
  0x15   :  { %410 = vmatpush1.bf16.msra.mxu0 %v2331_v44  ;;  %451 = vmatpush1.bf16.msra.mxu1 %v2333_v45 }
  0x16   :  { %411 = vmatprep.subr.bf16.mxu0 %v2340_v47  ;;  %452 = vmatprep.subr.bf16.mxu1 %v2342_v48 }
  0x19   :  { %412 = vmatpush1.bf16.msra.mxu0 %v2354_v51  ;;  %453 = vmatpush1.bf16.msra.mxu1 %v2356_v52 }
  0x1a   :  { %1947 = vmatprep.subr.msk.bf16.mxu0 %vm266_vm0, %v2358_v53  ;;  %1949 = vmatprep.subr.msk.bf16.mxu1 %vm266_vm0, %v2365_v55 }
  0x1c   :  { %1944 = vmatmul.mubr.msk.bf16.vlgmr.msra.gmra.mxu0 %vm262_vm1, %v2297_v35  ;;  %1946 = vmatmul.mubr.msk.bf16.vlgmr.msra.gmra.mxu1 %vm262_vm1, %v2297_v35 }
  0x1d   :  { %490 = vmatpush1.bf16.msra.mxu0 %v2386_v62  ;;  %531 = vmatpush1.bf16.msra.mxu1 %v2389_v63 }
  0x1e   :  { %491 = vmatprep.subr.bf16.mxu0 %v2391_v0  ;;  %532 = vmatprep.subr.bf16.mxu1 %v2393_v1 }
  0x1f   :  { %511 = vmatprep.mubr.bf16.mxu0 %v2177_v3  ;;  %552 = vmatprep.mubr.bf16.mxu1 %v2177_v3 }
  0x21   :  { %492 = vmatpush1.bf16.msra.mxu0 %v2413_v9  ;;  %533 = vmatpush1.bf16.msra.mxu1 %v2415_v10 }
  0x22   :  { %493 = vmatprep.subr.bf16.mxu0 %v2419_v13  ;;  %534 = vmatprep.subr.bf16.mxu1 %v2421_v14 }
  0x25   :  { %494 = vmatpush1.bf16.msra.mxu0 %v2433_v23  ;;  %535 = vmatpush1.bf16.msra.mxu1 %v2435_v24 }
  0x26   :  { %1951 = vmatprep.subr.msk.bf16.mxu0 %vm266_vm0, %v2437_v29  ;;  %1953 = vmatprep.subr.msk.bf16.mxu1 %vm266_vm0, %v2441_v30 }
  0x28   :  { %1948 = vmatmul.mubr.msk.bf16.vlgmr.msra.gmra.mxu0 %vm262_vm1, %v2297_v35  ;;  %1950 = vmatmul.mubr.msk.bf16.vlgmr.msra.gmra.mxu1 %vm262_vm1, %v2297_v35 }
  0x29   :  { %572 = vmatpush1.bf16.msra.mxu0 %v2462_v42  ;;  %613 = vmatpush1.bf16.msra.mxu1 %v2465_v43 }
  0x2a   :  { %573 = vmatprep.subr.bf16.mxu0 %v2467_v46  ;;  %614 = vmatprep.subr.bf16.mxu1 %v2469_v49 }
  0x2b   :  { %593 = vmatprep.mubr.bf16.mxu0 %v2177_v3  ;;  %634 = vmatprep.mubr.bf16.mxu1 %v2177_v3 }
  0x2d   :  { %574 = vmatpush1.bf16.msra.mxu0 %v2489_v58  ;;  %615 = vmatpush1.bf16.msra.mxu1 %v2491_v59 }
  0x2e   :  { %575 = vmatprep.subr.bf16.mxu0 %v2495_v60  ;;  %616 = vmatprep.subr.bf16.mxu1 %v2497_v61 }
  0x31   :  { %576 = vmatpush1.bf16.msra.mxu0 %v2503_v2  ;;  %617 = vmatpush1.bf16.msra.mxu1 %v2505_v6 }
  0x32   :  { %1956 = vmatprep.subr.msk.bf16.mxu0 %vm266_vm0, %v2209_v4  ;;  %1958 = vmatprep.subr.msk.bf16.mxu1 %vm266_vm0, %v2211_v5 }
  0x34   :  { %1952 = vmatmul.mubr.msk.bf16.vlgmr.msra.gmra.mxu0 %vm262_vm1, %v2297_v35  ;;  %1954 = vmatmul.mubr.msk.bf16.vlgmr.msra.gmra.mxu1 %vm262_vm1, %v2297_v35  ;;  %v1955_v35 = vld [vmem:[%s2915_s0 + $0x2] sm:$0x3] }
  0x35   :  { %721 = vmatpush1.bf16.msra.mxu0 %v2242_v16  ;;  %762 = vmatpush1.bf16.msra.mxu1 %v2245_v17 }
  0x36   :  { %722 = vmatprep.subr.bf16.mxu0 %v2223_v11  ;;  %763 = vmatprep.subr.bf16.mxu1 %v2225_v12 }
  0x37   :  { %742 = vmatprep.mubr.bf16.mxu0 %v2177_v3  ;;  %783 = vmatprep.mubr.bf16.mxu1 %v2177_v3 }
  0x39   :  { %723 = vmatpush1.bf16.msra.mxu0 %v2252_v19  ;;  %764 = vmatpush1.bf16.msra.mxu1 %v2254_v20 }
  0x3a   :  { %724 = vmatprep.subr.bf16.mxu0 %v2258_v21  ;;  %765 = vmatprep.subr.bf16.mxu1 %v2260_v22 }
  0x3d   :  { %725 = vmatpush1.bf16.msra.mxu0 %v2270_v25  ;;  %766 = vmatpush1.bf16.msra.mxu1 %v2272_v26 }
  0x3e   :  { %1960 = vmatprep.subr.msk.bf16.mxu0 %vm266_vm0, %v2274_v27  ;;  %1962 = vmatprep.subr.msk.bf16.mxu1 %vm266_vm0, %v2278_v28 }
  0x40   :  { %1957 = vmatmul.mubr.msk.bf16.vlgmr.msra.gmra.mxu0 %vm262_vm1, %v1955_v35  ;;  %1959 = vmatmul.mubr.msk.bf16.vlgmr.msra.gmra.mxu1 %vm262_vm1, %v1955_v35 }
  0x41   :  { %803 = vmatpush1.bf16.msra.mxu0 %v2304_v36  ;;  %844 = vmatpush1.bf16.msra.mxu1 %v2307_v37 }
  0x42   :  { %804 = vmatprep.subr.bf16.mxu0 %v2309_v38  ;;  %845 = vmatprep.subr.bf16.mxu1 %v2311_v39 }
  0x43   :  { %824 = vmatprep.mubr.bf16.mxu0 %v2177_v3  ;;  %865 = vmatprep.mubr.bf16.mxu1 %v2177_v3 }
  0x45   :  { %805 = vmatpush1.bf16.msra.mxu0 %v2331_v44  ;;  %846 = vmatpush1.bf16.msra.mxu1 %v2333_v45 }
  0x46   :  { %806 = vmatprep.subr.bf16.mxu0 %v2340_v47  ;;  %847 = vmatprep.subr.bf16.mxu1 %v2342_v48 }
  0x49   :  { %807 = vmatpush1.bf16.msra.mxu0 %v2354_v51  ;;  %848 = vmatpush1.bf16.msra.mxu1 %v2356_v52 }
  0x4a   :  { %1964 = vmatprep.subr.msk.bf16.mxu0 %vm266_vm0, %v2358_v53  ;;  %1966 = vmatprep.subr.msk.bf16.mxu1 %vm266_vm0, %v2365_v55 }
  0x4c   :  { %1961 = vmatmul.mubr.msk.bf16.vlgmr.msra.gmra.mxu0 %vm262_vm1, %v1955_v35  ;;  %1963 = vmatmul.mubr.msk.bf16.vlgmr.msra.gmra.mxu1 %vm262_vm1, %v1955_v35 }
  0x4d   :  { %885 = vmatpush1.bf16.msra.mxu0 %v2386_v62  ;;  %926 = vmatpush1.bf16.msra.mxu1 %v2389_v63 }
  0x4e   :  { %886 = vmatprep.subr.bf16.mxu0 %v2391_v0  ;;  %927 = vmatprep.subr.bf16.mxu1 %v2393_v1 }
  0x4f   :  { %906 = vmatprep.mubr.bf16.mxu0 %v2177_v3  ;;  %947 = vmatprep.mubr.bf16.mxu1 %v2177_v3 }
  0x51   :  { %887 = vmatpush1.bf16.msra.mxu0 %v2413_v9  ;;  %928 = vmatpush1.bf16.msra.mxu1 %v2415_v10 }
  0x52   :  { %888 = vmatprep.subr.bf16.mxu0 %v2419_v13  ;;  %929 = vmatprep.subr.bf16.mxu1 %v2421_v14 }
  0x55   :  { %889 = vmatpush1.bf16.msra.mxu0 %v2433_v23  ;;  %930 = vmatpush1.bf16.msra.mxu1 %v2435_v24 }
  0x56   :  { %1968 = vmatprep.subr.msk.bf16.mxu0 %vm266_vm0, %v2437_v29  ;;  %1970 = vmatprep.subr.msk.bf16.mxu1 %vm266_vm0, %v2441_v30 }
  0x58   :  { %1965 = vmatmul.mubr.msk.bf16.vlgmr.msra.gmra.mxu0 %vm262_vm1, %v1955_v35  ;;  %1967 = vmatmul.mubr.msk.bf16.vlgmr.msra.gmra.mxu1 %vm262_vm1, %v1955_v35 }
  0x59   :  { %967 = vmatpush1.bf16.msra.mxu0 %v2462_v42  ;;  %1008 = vmatpush1.bf16.msra.mxu1 %v2465_v43 }
  0x5a   :  { %968 = vmatprep.subr.bf16.mxu0 %v2467_v46  ;;  %1009 = vmatprep.subr.bf16.mxu1 %v2469_v49 }
  0x5b   :  { %988 = vmatprep.mubr.bf16.mxu0 %v2177_v3  ;;  %1029 = vmatprep.mubr.bf16.mxu1 %v2177_v3 }
  0x5d   :  { %969 = vmatpush1.bf16.msra.mxu0 %v2489_v58  ;;  %1010 = vmatpush1.bf16.msra.mxu1 %v2491_v59 }
  0x5e   :  { %970 = vmatprep.subr.bf16.mxu0 %v2495_v60  ;;  %1011 = vmatprep.subr.bf16.mxu1 %v2497_v61 }
  0x61   :  { %971 = vmatpush1.bf16.msra.mxu0 %v2503_v2  ;;  %1012 = vmatpush1.bf16.msra.mxu1 %v2505_v6 }
  0x62   :  { %1981 = vmatprep.subr.msk.bf16.mxu0 %vm266_vm0, %v2209_v4  ;;  %1983 = vmatprep.subr.msk.bf16.mxu1 %vm266_vm0, %v2211_v5 }
  0x64   :  { %1969 = vmatmul.mubr.msk.bf16.vlgmr.msra.gmra.mxu0 %vm262_vm1, %v1955_v35  ;;  %1971 = vmatmul.mubr.msk.bf16.vlgmr.msra.gmra.mxu1 %vm262_vm1, %v1955_v35 }
  0x65   :  { %1117 = vmatpush1.bf16.msra.mxu0 %v2242_v16  ;;  %1158 = vmatpush1.bf16.msra.mxu1 %v2245_v17 }
  0x66   :  { %1118 = vmatprep.subr.bf16.mxu0 %v2223_v11  ;;  %1159 = vmatprep.subr.bf16.mxu1 %v2225_v12 }
  0x67   :  { %1138 = vmatprep.mubr.bf16.mxu0 %v2177_v3  ;;  %1179 = vmatprep.mubr.bf16.mxu1 %v2177_v3 }
  0x69   :  { %1119 = vmatpush1.bf16.msra.mxu0 %v2252_v19  ;;  %1160 = vmatpush1.bf16.msra.mxu1 %v2254_v20 }
  0x6a   :  { %1120 = vmatprep.subr.bf16.mxu0 %v2258_v21  ;;  %1161 = vmatprep.subr.bf16.mxu1 %v2260_v22 }
  0x6d   :  { %1121 = vmatpush1.bf16.msra.mxu0 %v2270_v25  ;;  %1162 = vmatpush1.bf16.msra.mxu1 %v2272_v26 }
  0x6e   :  { %1985 = vmatprep.subr.msk.bf16.mxu0 %vm266_vm0, %v2274_v27  ;;  %1987 = vmatprep.subr.msk.bf16.mxu1 %vm266_vm0, %v2278_v28 }
  0x70   :  { %1982 = vmatmul.mubr.msk.bf16.vlgmr.msra.gmra.mxu0 %vm262_vm1, %v1980_v15  ;;  %1984 = vmatmul.mubr.msk.bf16.vlgmr.msra.gmra.mxu1 %vm262_vm1, %v1980_v15 }
  0x71   :  { %1199 = vmatpush1.bf16.msra.mxu0 %v2304_v36  ;;  %1240 = vmatpush1.bf16.msra.mxu1 %v2307_v37 }
  0x72   :  { %1200 = vmatprep.subr.bf16.mxu0 %v2309_v38  ;;  %1241 = vmatprep.subr.bf16.mxu1 %v2311_v39 }
  0x73   :  { %1220 = vmatprep.mubr.bf16.mxu0 %v2177_v3  ;;  %1261 = vmatprep.mubr.bf16.mxu1 %v2177_v3 }
  0x75   :  { %1201 = vmatpush1.bf16.msra.mxu0 %v2331_v44  ;;  %1242 = vmatpush1.bf16.msra.mxu1 %v2333_v45 }
  0x76   :  { %1202 = vmatprep.subr.bf16.mxu0 %v2340_v47  ;;  %1243 = vmatprep.subr.bf16.mxu1 %v2342_v48 }
  0x79   :  { %1203 = vmatpush1.bf16.msra.mxu0 %v2354_v51  ;;  %1244 = vmatpush1.bf16.msra.mxu1 %v2356_v52 }
  0x7a   :  { %1989 = vmatprep.subr.msk.bf16.mxu0 %vm266_vm0, %v2358_v53  ;;  %1991 = vmatprep.subr.msk.bf16.mxu1 %vm266_vm0, %v2365_v55 }
  0x7c   :  { %1986 = vmatmul.mubr.msk.bf16.vlgmr.msra.gmra.mxu0 %vm262_vm1, %v1980_v15  ;;  %1988 = vmatmul.mubr.msk.bf16.vlgmr.msra.gmra.mxu1 %vm262_vm1, %v1980_v15 }
  0x7d   :  { %1281 = vmatpush1.bf16.msra.mxu0 %v2386_v62  ;;  %1322 = vmatpush1.bf16.msra.mxu1 %v2389_v63 }
  0x7e   :  { %1282 = vmatprep.subr.bf16.mxu0 %v2391_v0  ;;  %1323 = vmatprep.subr.bf16.mxu1 %v2393_v1 }
  0x7f   :  { %1302 = vmatprep.mubr.bf16.mxu0 %v2177_v3  ;;  %1343 = vmatprep.mubr.bf16.mxu1 %v2177_v3 }
  0x81   :  { %1283 = vmatpush1.bf16.msra.mxu0 %v2413_v9  ;;  %1324 = vmatpush1.bf16.msra.mxu1 %v2415_v10 }
  0x82   :  { %1284 = vmatprep.subr.bf16.mxu0 %v2419_v13  ;;  %1325 = vmatprep.subr.bf16.mxu1 %v2421_v14 }
  0x85   :  { %1285 = vmatpush1.bf16.msra.mxu0 %v2433_v23  ;;  %1326 = vmatpush1.bf16.msra.mxu1 %v2435_v24 }
  0x86   :  { %1993 = vmatprep.subr.msk.bf16.mxu0 %vm266_vm0, %v2437_v29  ;;  %1995 = vmatprep.subr.msk.bf16.mxu1 %vm266_vm0, %v2441_v30 }
  0x88   :  { %1990 = vmatmul.mubr.msk.bf16.vlgmr.msra.gmra.mxu0 %vm262_vm1, %v1980_v15  ;;  %1992 = vmatmul.mubr.msk.bf16.vlgmr.msra.gmra.mxu1 %vm262_vm1, %v1980_v15 }
  0x89   :  { %1363 = vmatpush1.bf16.msra.mxu0 %v2462_v42  ;;  %1404 = vmatpush1.bf16.msra.mxu1 %v2465_v43 }
  0x8a   :  { %1364 = vmatprep.subr.bf16.mxu0 %v2467_v46  ;;  %1405 = vmatprep.subr.bf16.mxu1 %v2469_v49 }
  0x8b   :  { %1384 = vmatprep.mubr.bf16.mxu0 %v2177_v3  ;;  %1425 = vmatprep.mubr.bf16.mxu1 %v2177_v3 }
  0x8d   :  { %1365 = vmatpush1.bf16.msra.mxu0 %v2489_v58  ;;  %1406 = vmatpush1.bf16.msra.mxu1 %v2491_v59 }
  0x8e   :  { %1366 = vmatprep.subr.bf16.mxu0 %v2495_v60  ;;  %1407 = vmatprep.subr.bf16.mxu1 %v2497_v61 }
  0x91   :  { %1367 = vmatpush1.bf16.msra.mxu0 %v2503_v2  ;;  %1408 = vmatpush1.bf16.msra.mxu1 %v2505_v6 }
  0x92   :  { %2006 = vmatprep.subr.msk.bf16.mxu0 %vm266_vm0, %v2209_v4  ;;  %2008 = vmatprep.subr.msk.bf16.mxu1 %vm266_vm0, %v2211_v5  ;;  %v2005_v4 = vld [vmem:[%s2915_s0 + $0x6] sm:$0x3]  ;;  %v2746_v5 = vpop.permute.xlu0 %59 }
  0x94   :  { %1994 = vmatmul.mubr.msk.bf16.vlgmr.msra.gmra.mxu0 %vm262_vm1, %v1980_v15  ;;  %1996 = vmatmul.mubr.msk.bf16.vlgmr.msra.gmra.mxu1 %vm262_vm1, %v1980_v15 }
  0x95   :  { %1513 = vmatpush1.bf16.msra.mxu0 %v2242_v16  ;;  %1554 = vmatpush1.bf16.msra.mxu1 %v2245_v17 }
  0x96   :  { %1514 = vmatprep.subr.bf16.mxu0 %v2223_v11  ;;  %1555 = vmatprep.subr.bf16.mxu1 %v2225_v12 }
  0x97   :  { %1534 = vmatprep.mubr.bf16.mxu0 %v2177_v3  ;;  %1575 = vmatprep.mubr.bf16.mxu1 %v2177_v3 }
  0x99   :  { %1515 = vmatpush1.bf16.msra.mxu0 %v2252_v19  ;;  %1556 = vmatpush1.bf16.msra.mxu1 %v2254_v20 }
  0x9a   :  { %1516 = vmatprep.subr.bf16.mxu0 %v2258_v21  ;;  %1557 = vmatprep.subr.bf16.mxu1 %v2260_v22 }
  0x9d   :  { %1517 = vmatpush1.bf16.msra.mxu0 %v2270_v25  ;;  %1558 = vmatpush1.bf16.msra.mxu1 %v2272_v26 }
  0x9e   :  { %2010 = vmatprep.subr.msk.bf16.mxu0 %vm266_vm0, %v2274_v27  ;;  %2012 = vmatprep.subr.msk.bf16.mxu1 %vm266_vm0, %v2278_v28 }
  0xa0   :  { %2007 = vmatmul.mubr.msk.bf16.vlgmr.msra.gmra.mxu0 %vm262_vm1, %v2005_v4  ;;  %2009 = vmatmul.mubr.msk.bf16.vlgmr.msra.gmra.mxu1 %vm262_vm1, %v2005_v4 }
  0xa1   :  { %1595 = vmatpush1.bf16.msra.mxu0 %v2304_v36  ;;  %1636 = vmatpush1.bf16.msra.mxu1 %v2307_v37 }
  0xa2   :  { %1596 = vmatprep.subr.bf16.mxu0 %v2309_v38  ;;  %1637 = vmatprep.subr.bf16.mxu1 %v2311_v39 }
  0xa3   :  { %1616 = vmatprep.mubr.bf16.mxu0 %v2177_v3  ;;  %1657 = vmatprep.mubr.bf16.mxu1 %v2177_v3 }
  0xa5   :  { %1597 = vmatpush1.bf16.msra.mxu0 %v2331_v44  ;;  %1638 = vmatpush1.bf16.msra.mxu1 %v2333_v45 }
  0xa6   :  { %1598 = vmatprep.subr.bf16.mxu0 %v2340_v47  ;;  %1639 = vmatprep.subr.bf16.mxu1 %v2342_v48 }
  0xa9   :  { %1599 = vmatpush1.bf16.msra.mxu0 %v2354_v51  ;;  %1640 = vmatpush1.bf16.msra.mxu1 %v2356_v52 }
  0xaa   :  { %2014 = vmatprep.subr.msk.bf16.mxu0 %vm266_vm0, %v2358_v53  ;;  %2016 = vmatprep.subr.msk.bf16.mxu1 %vm266_vm0, %v2365_v55 }
  0xac   :  { %2011 = vmatmul.mubr.msk.bf16.vlgmr.msra.gmra.mxu0 %vm262_vm1, %v2005_v4  ;;  %2013 = vmatmul.mubr.msk.bf16.vlgmr.msra.gmra.mxu1 %vm262_vm1, %v2005_v4 }
  0xad   :  { %1677 = vmatpush1.bf16.msra.mxu0 %v2386_v62  ;;  %1718 = vmatpush1.bf16.msra.mxu1 %v2389_v63 }
  0xae   :  { %1678 = vmatprep.subr.bf16.mxu0 %v2391_v0  ;;  %1719 = vmatprep.subr.bf16.mxu1 %v2393_v1 }
  0xaf   :  { %1698 = vmatprep.mubr.bf16.mxu0 %v2177_v3  ;;  %1739 = vmatprep.mubr.bf16.mxu1 %v2177_v3 }
  0xb1   :  { %1679 = vmatpush1.bf16.msra.mxu0 %v2413_v9  ;;  %1720 = vmatpush1.bf16.msra.mxu1 %v2415_v10 }
  0xb2   :  { %1680 = vmatprep.subr.bf16.mxu0 %v2419_v13  ;;  %1721 = vmatprep.subr.bf16.mxu1 %v2421_v14 }
  0xb5   :  { %1681 = vmatpush1.bf16.msra.mxu0 %v2433_v23  ;;  %1722 = vmatpush1.bf16.msra.mxu1 %v2435_v24 }
  0xb6   :  { %2018 = vmatprep.subr.msk.bf16.mxu0 %vm266_vm0, %v2437_v29  ;;  %2020 = vmatprep.subr.msk.bf16.mxu1 %vm266_vm0, %v2441_v30 }
  0xb8   :  { %2015 = vmatmul.mubr.msk.bf16.vlgmr.msra.gmra.mxu0 %vm262_vm1, %v2005_v4  ;;  %2017 = vmatmul.mubr.msk.bf16.vlgmr.msra.gmra.mxu1 %vm262_vm1, %v2005_v4 }
  0xb9   :  { %1759 = vmatpush1.bf16.msra.mxu0 %v2462_v42  ;;  %1800 = vmatpush1.bf16.msra.mxu1 %v2465_v43 }
  0xba   :  { %1760 = vmatprep.subr.bf16.mxu0 %v2467_v46  ;;  %1801 = vmatprep.subr.bf16.mxu1 %v2469_v49 }
  0xbb   :  { %1780 = vmatprep.mubr.bf16.mxu0 %v2177_v3  ;;  %1821 = vmatprep.mubr.bf16.mxu1 %v2177_v3 }
  0xbd   :  { %1761 = vmatpush1.bf16.msra.mxu0 %v2489_v58  ;;  %1802 = vmatpush1.bf16.msra.mxu1 %v2491_v59 }
  0xbe   :  { %1762 = vmatprep.subr.bf16.mxu0 %v2495_v60  ;;  %1803 = vmatprep.subr.bf16.mxu1 %v2497_v61 }
  0xc1   :  { %1763 = vmatpush1.bf16.msra.mxu0 %v2503_v2  ;;  %1804 = vmatpush1.bf16.msra.mxu1 %v2505_v6 }
  0xc4   :  { %2019 = vmatmul.mubr.msk.bf16.vlgmr.msra.gmra.mxu0 %vm262_vm1, %v2005_v4  ;;  %2021 = vmatmul.mubr.msk.bf16.vlgmr.msra.gmra.mxu1 %vm262_vm1, %v2005_v4 }
  0xd0   :  { %v349_v11 = vpop.f32.mrf.mxu0  ;;  %v390_v3 = vpop.f32.mrf.mxu1 }
  0xd1   :  { %v350_v12 = vadd.f32 %v349_v11, %v2746_v5  ;;  %v391_v16 = vadd.f32 %v390_v3, %v2746_v5 }
  0xd2   :  { %v351_v17 = vpop.f32.mrf.mxu0  ;;  %v392_v19 = vpop.f32.mrf.mxu1 }
  0xd3   :  { %v352_v20 = vadd.f32 %v351_v17, %v2746_v5  ;;  %2049 = vtanh.f32 %v350_v12  ;;  %v393_v21 = vadd.f32 %v392_v19, %v2746_v5 }
  0xd4   :  { %2051 = vtanh.f32 %v391_v16  ;;  %v353_v22 = vpop.f32.mrf.mxu0  ;;  %v394_v25 = vpop.f32.mrf.mxu1 }
  0xd5   :  { %2053 = vtanh.f32 %v352_v20 }
  0xd6   :  { %2055 = vtanh.f32 %v393_v21  ;;  %v354_v26 = vpop.f32.mrf.mxu0  ;;  %v395_v27 = vpop.f32.mrf.mxu1 }
  0xdc   :  { %v431_v28 = vpop.f32.mrf.mxu0  ;;  %v472_v36 = vpop.f32.mrf.mxu1 }
  0xdd   :  { %v432_v37 = vadd.f32 %v431_v28, %v2746_v5  ;;  %v473_v38 = vadd.f32 %v472_v36, %v2746_v5 }
  0xde   :  { %v433_v39 = vpop.f32.mrf.mxu0  ;;  %v474_v44 = vpop.f32.mrf.mxu1 }
  0xdf   :  { %2057 = vtanh.f32 %v432_v37  ;;  %v434_v45 = vadd.f32 %v433_v39, %v2746_v5  ;;  %v475_v47 = vadd.f32 %v474_v44, %v2746_v5 }
  0xe0   :  { %v2050_v48 = vpop.eup %2049  ;;  %2059 = vtanh.f32 %v473_v38  ;;  %v435_v51 = vpop.f32.mrf.mxu0 }
  0xe1   :  { %v476_v52 = vpop.f32.mrf.mxu1  ;;  %v2052_v53 = vpop.eup %2051  ;;  %2061 = vtanh.f32 %v434_v45 }
  0xe2   :  { %v2054_v55 = vpop.eup %2053  ;;  %2063 = vtanh.f32 %v475_v47  ;;  %v436_v62 = vpop.f32.mrf.mxu0 }
  0xe3   :  { %v477_v63 = vpop.f32.mrf.mxu1  ;;  %v2056_v0 = vpop.eup %2055  ;;  %v675_v1 = vcombine.low %v2050_v48, %v2054_v55 }
  0xe4   :  { %v676_v9 = vcombine.low %v2052_v53, %v2056_v0 }
  0xe5   :  { %691 = vst [vmem:[%s2917_s3] sm:$0x77] %v675_v1 }
  0xe6   :  { %692 = vst [vmem:[%s2917_s3 + $0x8] sm:$0x77] %v676_v9 }
  0xe8   :  { %v513_v10 = vpop.f32.mrf.mxu0  ;;  %v554_v13 = vpop.f32.mrf.mxu1 }
  0xe9   :  { %v514_v14 = vadd.f32 %v513_v10, %v2746_v5  ;;  %v555_v18 = vadd.f32 %v554_v13, %v2746_v5 }
  0xea   :  { %v515_v23 = vpop.f32.mrf.mxu0  ;;  %v556_v24 = vpop.f32.mrf.mxu1 }
  0xeb   :  { %2065 = vtanh.f32 %v514_v14  ;;  %v516_v29 = vadd.f32 %v515_v23, %v2746_v5  ;;  %v557_v30 = vadd.f32 %v556_v24, %v2746_v5 }
  0xec   :  { %v2058_v31 = vpop.eup %2057  ;;  %2067 = vtanh.f32 %v555_v18  ;;  %v517_v32 = vpop.f32.mrf.mxu0 }
  0xed   :  { %v558_v33 = vpop.f32.mrf.mxu1  ;;  %v2060_v34 = vpop.eup %2059  ;;  %2069 = vtanh.f32 %v516_v29 }
  0xee   :  { %v2062_v40 = vpop.eup %2061  ;;  %2071 = vtanh.f32 %v557_v30  ;;  %v518_v41 = vpop.f32.mrf.mxu0 }
  0xef   :  { %v559_v42 = vpop.f32.mrf.mxu1  ;;  %v2064_v43 = vpop.eup %2063  ;;  %v677_v46 = vcombine.low %v2058_v31, %v2062_v40 }
  0xf0   :  { %v678_v49 = vcombine.low %v2060_v34, %v2064_v43 }
  0xf1   :  { %693 = vst [vmem:[%s2917_s3 + $0x10] sm:$0x77] %v677_v46 }
  0xf2   :  { %694 = vst [vmem:[%s2917_s3 + $0x18] sm:$0x77] %v678_v49 }
  0xf4   :  { %v595_v50 = vpop.f32.mrf.mxu0  ;;  %v636_v54 = vpop.f32.mrf.mxu1 }
  0xf5   :  { %v596_v56 = vadd.f32 %v595_v50, %v2746_v5  ;;  %v637_v57 = vadd.f32 %v636_v54, %v2746_v5 }
  0xf6   :  { %v597_v58 = vpop.f32.mrf.mxu0  ;;  %v638_v59 = vpop.f32.mrf.mxu1 }
  0xf7   :  { %2073 = vtanh.f32 %v596_v56  ;;  %v598_v60 = vadd.f32 %v597_v58, %v2746_v5  ;;  %v639_v61 = vadd.f32 %v638_v59, %v2746_v5  ;;  %v2782_v5 = vpop.permute.xlu0 %704 }
  0xf8   :  { %v2066_v2 = vpop.eup %2065  ;;  %2075 = vtanh.f32 %v637_v57  ;;  %v599_v6 = vpop.f32.mrf.mxu0 }
  0xf9   :  { %v640_v7 = vpop.f32.mrf.mxu1  ;;  %v2068_v35 = vpop.eup %2067  ;;  %2077 = vtanh.f32 %v598_v60 }
  0xfa   :  { %v2070_v8 = vpop.eup %2069  ;;  %2079 = vtanh.f32 %v639_v61  ;;  %v600_v15 = vpop.f32.mrf.mxu0 }
  0xfb   :  { %v641_v4 = vpop.f32.mrf.mxu1  ;;  %v2072_v11 = vpop.eup %2071  ;;  %v679_v3 = vcombine.low %v2066_v2, %v2070_v8 }
  0xfc   :  { %v680_v12 = vcombine.low %v2068_v35, %v2072_v11 }
  0xfd   :  { %695 = vst [vmem:[%s2917_s3 + $0x20] sm:$0x77] %v679_v3 }
  0xfe   :  { %696 = vst [vmem:[%s2917_s3 + $0x28] sm:$0x77] %v680_v12 }
 0x100   :  { %v744_v16 = vpop.f32.mrf.mxu0  ;;  %v785_v17 = vpop.f32.mrf.mxu1 }
 0x101   :  { %v745_v19 = vadd.f32 %v744_v16, %v2782_v5  ;;  %v786_v20 = vadd.f32 %v785_v17, %v2782_v5 }
 0x102   :  { %v746_v21 = vpop.f32.mrf.mxu0  ;;  %v787_v22 = vpop.f32.mrf.mxu1 }
 0x103   :  { %v747_v25 = vadd.f32 %v746_v21, %v2782_v5  ;;  %2081 = vtanh.f32 %v745_v19  ;;  %v788_v26 = vadd.f32 %v787_v22, %v2782_v5 }
 0x104   :  { %v2074_v27 = vpop.eup %2073  ;;  %2083 = vtanh.f32 %v786_v20  ;;  %v748_v28 = vpop.f32.mrf.mxu0 }
 0x105   :  { %v789_v36 = vpop.f32.mrf.mxu1  ;;  %v2076_v37 = vpop.eup %2075  ;;  %2085 = vtanh.f32 %v747_v25 }
 0x106   :  { %v2078_v38 = vpop.eup %2077  ;;  %2087 = vtanh.f32 %v788_v26  ;;  %v749_v39 = vpop.f32.mrf.mxu0 }
 0x107   :  { %v790_v44 = vpop.f32.mrf.mxu1  ;;  %v2080_v45 = vpop.eup %2079  ;;  %v681_v47 = vcombine.low %v2074_v27, %v2078_v38 }
 0x108   :  { %v682_v48 = vcombine.low %v2076_v37, %v2080_v45 }
 0x109   :  { %697 = vst [vmem:[%s2917_s3 + $0x30] sm:$0x77] %v681_v47 }
 0x10a   :  { %698 = vst [vmem:[%s2917_s3 + $0x38] sm:$0x77] %v682_v48 }
 0x10c   :  { %v826_v51 = vpop.f32.mrf.mxu0  ;;  %v867_v52 = vpop.f32.mrf.mxu1 }
 0x10d   :  { %v827_v53 = vadd.f32 %v826_v51, %v2782_v5  ;;  %v868_v55 = vadd.f32 %v867_v52, %v2782_v5 }
 0x10e   :  { %v828_v62 = vpop.f32.mrf.mxu0  ;;  %v869_v63 = vpop.f32.mrf.mxu1 }
 0x10f   :  { %2089 = vtanh.f32 %v827_v53  ;;  %v829_v0 = vadd.f32 %v828_v62, %v2782_v5  ;;  %v870_v1 = vadd.f32 %v869_v63, %v2782_v5 }
 0x110   :  { %v2082_v9 = vpop.eup %2081  ;;  %2091 = vtanh.f32 %v868_v55  ;;  %v830_v10 = vpop.f32.mrf.mxu0 }
 0x111   :  { %v871_v13 = vpop.f32.mrf.mxu1  ;;  %v2084_v14 = vpop.eup %2083  ;;  %2093 = vtanh.f32 %v829_v0 }
 0x112   :  { %v2086_v18 = vpop.eup %2085  ;;  %2095 = vtanh.f32 %v870_v1  ;;  %v831_v23 = vpop.f32.mrf.mxu0 }
 0x113   :  { %v872_v24 = vpop.f32.mrf.mxu1  ;;  %v2088_v29 = vpop.eup %2087  ;;  %v1070_v30 = vcombine.low %v2082_v9, %v2086_v18 }
 0x114   :  { %v1071_v31 = vcombine.low %v2084_v14, %v2088_v29 }
 0x115   :  { %1972 = vst [vmem:[%s2917_s3 + $0x40] sm:$0x77] %v1070_v30 }
 0x116   :  { %1973 = vst [vmem:[%s2917_s3 + $0x48] sm:$0x77] %v1071_v31 }
 0x118   :  { %v908_v32 = vpop.f32.mrf.mxu0  ;;  %v949_v33 = vpop.f32.mrf.mxu1 }
 0x119   :  { %v909_v34 = vadd.f32 %v908_v32, %v2782_v5  ;;  %v950_v40 = vadd.f32 %v949_v33, %v2782_v5 }
 0x11a   :  { %v910_v41 = vpop.f32.mrf.mxu0  ;;  %v951_v42 = vpop.f32.mrf.mxu1 }
 0x11b   :  { %2097 = vtanh.f32 %v909_v34  ;;  %v911_v43 = vadd.f32 %v910_v41, %v2782_v5  ;;  %v952_v46 = vadd.f32 %v951_v42, %v2782_v5 }
 0x11c   :  { %v2090_v49 = vpop.eup %2089  ;;  %2099 = vtanh.f32 %v950_v40  ;;  %v912_v50 = vpop.f32.mrf.mxu0 }
 0x11d   :  { %v953_v54 = vpop.f32.mrf.mxu1  ;;  %v2092_v56 = vpop.eup %2091  ;;  %2101 = vtanh.f32 %v911_v43 }
 0x11e   :  { %v2094_v57 = vpop.eup %2093  ;;  %2103 = vtanh.f32 %v952_v46  ;;  %v913_v58 = vpop.f32.mrf.mxu0 }
 0x11f   :  { %v954_v59 = vpop.f32.mrf.mxu1  ;;  %v2096_v60 = vpop.eup %2095  ;;  %v1072_v61 = vcombine.low %v2090_v49, %v2094_v57 }
 0x120   :  { %v1073_v2 = vcombine.low %v2092_v56, %v2096_v60 }
 0x121   :  { %1974 = vst [vmem:[%s2917_s3 + $0x50] sm:$0x77] %v1072_v61 }
 0x122   :  { %1975 = vst [vmem:[%s2917_s3 + $0x58] sm:$0x77] %v1073_v2 }
 0x124   :  { %v990_v6 = vpop.f32.mrf.mxu0  ;;  %v1031_v7 = vpop.f32.mrf.mxu1 }
 0x125   :  { %v991_v35 = vadd.f32 %v990_v6, %v2782_v5  ;;  %v1032_v8 = vadd.f32 %v1031_v7, %v2782_v5 }
 0x126   :  { %v992_v15 = vpop.f32.mrf.mxu0  ;;  %v1033_v4 = vpop.f32.mrf.mxu1 }
 0x127   :  { %2105 = vtanh.f32 %v991_v35  ;;  %v993_v11 = vadd.f32 %v992_v15, %v2782_v5  ;;  %v1034_v3 = vadd.f32 %v1033_v4, %v2782_v5  ;;  %v2824_v5 = vpop.permute.xlu1 %1100 }
 0x128   :  { %v2098_v12 = vpop.eup %2097  ;;  %2107 = vtanh.f32 %v1032_v8  ;;  %v994_v16 = vpop.f32.mrf.mxu0 }
 0x129   :  { %v1035_v17 = vpop.f32.mrf.mxu1  ;;  %v2100_v19 = vpop.eup %2099  ;;  %2109 = vtanh.f32 %v993_v11 }
 0x12a   :  { %v2102_v20 = vpop.eup %2101  ;;  %2111 = vtanh.f32 %v1034_v3  ;;  %v995_v21 = vpop.f32.mrf.mxu0 }
 0x12b   :  { %v1036_v22 = vpop.f32.mrf.mxu1  ;;  %v2104_v25 = vpop.eup %2103  ;;  %v1074_v26 = vcombine.low %v2098_v12, %v2102_v20 }
 0x12c   :  { %v1075_v27 = vcombine.low %v2100_v19, %v2104_v25 }
 0x12d   :  { %1976 = vst [vmem:[%s2917_s3 + $0x60] sm:$0x77] %v1074_v26 }
 0x12e   :  { %1977 = vst [vmem:[%s2917_s3 + $0x68] sm:$0x77] %v1075_v27 }
 0x130   :  { %v1140_v28 = vpop.f32.mrf.mxu0  ;;  %v1181_v36 = vpop.f32.mrf.mxu1 }
 0x131   :  { %v1141_v37 = vadd.f32 %v1140_v28, %v2824_v5  ;;  %v1182_v38 = vadd.f32 %v1181_v36, %v2824_v5 }
 0x132   :  { %v1142_v39 = vpop.f32.mrf.mxu0  ;;  %v1183_v44 = vpop.f32.mrf.mxu1 }
 0x133   :  { %v1143_v45 = vadd.f32 %v1142_v39, %v2824_v5  ;;  %2113 = vtanh.f32 %v1141_v37  ;;  %v1184_v47 = vadd.f32 %v1183_v44, %v2824_v5 }
 0x134   :  { %v2106_v48 = vpop.eup %2105  ;;  %2115 = vtanh.f32 %v1182_v38  ;;  %v1144_v51 = vpop.f32.mrf.mxu0 }
 0x135   :  { %v1185_v52 = vpop.f32.mrf.mxu1  ;;  %v2108_v53 = vpop.eup %2107  ;;  %2117 = vtanh.f32 %v1143_v45 }
 0x136   :  { %v2110_v55 = vpop.eup %2109  ;;  %2119 = vtanh.f32 %v1184_v47  ;;  %v1145_v62 = vpop.f32.mrf.mxu0 }
 0x137   :  { %v1186_v63 = vpop.f32.mrf.mxu1  ;;  %v2112_v0 = vpop.eup %2111  ;;  %v1076_v1 = vcombine.low %v2106_v48, %v2110_v55 }
 0x138   :  { %v1077_v9 = vcombine.low %v2108_v53, %v2112_v0 }
 0x139   :  { %1978 = vst [vmem:[%s2917_s3 + $0x70] sm:$0x77] %v1076_v1 }
 0x13a   :  { %1979 = vst [vmem:[%s2917_s3 + $0x78] sm:$0x77] %v1077_v9 }
 0x13c   :  { %v1222_v10 = vpop.f32.mrf.mxu0  ;;  %v1263_v13 = vpop.f32.mrf.mxu1 }
 0x13d   :  { %v1223_v14 = vadd.f32 %v1222_v10, %v2824_v5  ;;  %v1264_v18 = vadd.f32 %v1263_v13, %v2824_v5 }
 0x13e   :  { %v1224_v23 = vpop.f32.mrf.mxu0  ;;  %v1265_v24 = vpop.f32.mrf.mxu1 }
 0x13f   :  { %2121 = vtanh.f32 %v1223_v14  ;;  %v1225_v29 = vadd.f32 %v1224_v23, %v2824_v5  ;;  %v1266_v30 = vadd.f32 %v1265_v24, %v2824_v5 }
 0x140   :  { %v2114_v31 = vpop.eup %2113  ;;  %2123 = vtanh.f32 %v1264_v18  ;;  %v1226_v32 = vpop.f32.mrf.mxu0 }
 0x141   :  { %v1267_v33 = vpop.f32.mrf.mxu1  ;;  %v2116_v34 = vpop.eup %2115  ;;  %2125 = vtanh.f32 %v1225_v29 }
 0x142   :  { %v2118_v40 = vpop.eup %2117  ;;  %2127 = vtanh.f32 %v1266_v30  ;;  %v1227_v41 = vpop.f32.mrf.mxu0 }
 0x143   :  { %v1268_v42 = vpop.f32.mrf.mxu1  ;;  %v2120_v43 = vpop.eup %2119  ;;  %v1466_v46 = vcombine.low %v2114_v31, %v2118_v40 }
 0x144   :  { %v1467_v49 = vcombine.low %v2116_v34, %v2120_v43 }
 0x145   :  { %1997 = vst [vmem:[%s2917_s3 + $0x80] sm:$0x77] %v1466_v46 }
 0x146   :  { %1998 = vst [vmem:[%s2917_s3 + $0x88] sm:$0x77] %v1467_v49 }
 0x148   :  { %v1304_v50 = vpop.f32.mrf.mxu0  ;;  %v1345_v54 = vpop.f32.mrf.mxu1 }
 0x149   :  { %v1305_v56 = vadd.f32 %v1304_v50, %v2824_v5  ;;  %v1346_v57 = vadd.f32 %v1345_v54, %v2824_v5 }
 0x14a   :  { %v1306_v58 = vpop.f32.mrf.mxu0  ;;  %v1347_v59 = vpop.f32.mrf.mxu1 }
 0x14b   :  { %2129 = vtanh.f32 %v1305_v56  ;;  %v1307_v60 = vadd.f32 %v1306_v58, %v2824_v5  ;;  %v1348_v61 = vadd.f32 %v1347_v59, %v2824_v5 }
 0x14c   :  { %v2122_v2 = vpop.eup %2121  ;;  %2131 = vtanh.f32 %v1346_v57  ;;  %v1308_v6 = vpop.f32.mrf.mxu0 }
 0x14d   :  { %v1349_v7 = vpop.f32.mrf.mxu1  ;;  %v2124_v35 = vpop.eup %2123  ;;  %2133 = vtanh.f32 %v1307_v60 }
 0x14e   :  { %v2126_v8 = vpop.eup %2125  ;;  %2135 = vtanh.f32 %v1348_v61  ;;  %v1309_v15 = vpop.f32.mrf.mxu0 }
 0x14f   :  { %v1350_v4 = vpop.f32.mrf.mxu1  ;;  %v2128_v11 = vpop.eup %2127  ;;  %v1468_v3 = vcombine.low %v2122_v2, %v2126_v8 }
 0x150   :  { %v1469_v12 = vcombine.low %v2124_v35, %v2128_v11 }
 0x151   :  { %1999 = vst [vmem:[%s2917_s3 + $0x90] sm:$0x77] %v1468_v3 }
 0x152   :  { %2000 = vst [vmem:[%s2917_s3 + $0x98] sm:$0x77] %v1469_v12 }
 0x154   :  { %v1386_v16 = vpop.f32.mrf.mxu0  ;;  %v1427_v17 = vpop.f32.mrf.mxu1 }
 0x155   :  { %v1387_v19 = vadd.f32 %v1386_v16, %v2824_v5  ;;  %v1428_v20 = vadd.f32 %v1427_v17, %v2824_v5 }
 0x156   :  { %v1388_v21 = vpop.f32.mrf.mxu0  ;;  %v1429_v22 = vpop.f32.mrf.mxu1 }
 0x157   :  { %2137 = vtanh.f32 %v1387_v19  ;;  %v1389_v25 = vadd.f32 %v1388_v21, %v2824_v5  ;;  %v1430_v26 = vadd.f32 %v1429_v22, %v2824_v5  ;;  %v2866_v5 = vpop.permute.xlu1 %1496 }
 0x158   :  { %v2130_v27 = vpop.eup %2129  ;;  %2139 = vtanh.f32 %v1428_v20  ;;  %v1390_v28 = vpop.f32.mrf.mxu0 }
 0x159   :  { %v1431_v36 = vpop.f32.mrf.mxu1  ;;  %v2132_v37 = vpop.eup %2131  ;;  %2141 = vtanh.f32 %v1389_v25 }
 0x15a   :  { %v2134_v38 = vpop.eup %2133  ;;  %2143 = vtanh.f32 %v1430_v26  ;;  %v1391_v39 = vpop.f32.mrf.mxu0 }
 0x15b   :  { %v1432_v44 = vpop.f32.mrf.mxu1  ;;  %v2136_v45 = vpop.eup %2135  ;;  %v1470_v47 = vcombine.low %v2130_v27, %v2134_v38 }
 0x15c   :  { %v1471_v48 = vcombine.low %v2132_v37, %v2136_v45 }
 0x15d   :  { %2001 = vst [vmem:[%s2917_s3 + $0xa0] sm:$0x77] %v1470_v47 }
 0x15e   :  { %2002 = vst [vmem:[%s2917_s3 + $0xa8] sm:$0x77] %v1471_v48 }
 0x160   :  { %v1536_v51 = vpop.f32.mrf.mxu0  ;;  %v1577_v52 = vpop.f32.mrf.mxu1 }
 0x161   :  { %v1537_v53 = vadd.f32 %v1536_v51, %v2866_v5  ;;  %v1578_v55 = vadd.f32 %v1577_v52, %v2866_v5 }
 0x162   :  { %v1538_v62 = vpop.f32.mrf.mxu0  ;;  %v1579_v63 = vpop.f32.mrf.mxu1 }
 0x163   :  { %v1539_v0 = vadd.f32 %v1538_v62, %v2866_v5  ;;  %2145 = vtanh.f32 %v1537_v53  ;;  %v1580_v1 = vadd.f32 %v1579_v63, %v2866_v5 }
 0x164   :  { %v2138_v9 = vpop.eup %2137  ;;  %2147 = vtanh.f32 %v1578_v55  ;;  %v1540_v10 = vpop.f32.mrf.mxu0 }
 0x165   :  { %v1581_v13 = vpop.f32.mrf.mxu1  ;;  %v2140_v14 = vpop.eup %2139  ;;  %2149 = vtanh.f32 %v1539_v0 }
 0x166   :  { %v2142_v18 = vpop.eup %2141  ;;  %2151 = vtanh.f32 %v1580_v1  ;;  %v1541_v23 = vpop.f32.mrf.mxu0 }
 0x167   :  { %v1582_v24 = vpop.f32.mrf.mxu1  ;;  %v2144_v29 = vpop.eup %2143  ;;  %v1472_v30 = vcombine.low %v2138_v9, %v2142_v18 }
 0x168   :  { %v1473_v31 = vcombine.low %v2140_v14, %v2144_v29 }
 0x169   :  { %2003 = vst [vmem:[%s2917_s3 + $0xb0] sm:$0x77] %v1472_v30 }
 0x16a   :  { %2004 = vst [vmem:[%s2917_s3 + $0xb8] sm:$0x77] %v1473_v31 }
 0x16c   :  { %v1618_v32 = vpop.f32.mrf.mxu0  ;;  %v1659_v33 = vpop.f32.mrf.mxu1 }
 0x16d   :  { %v1619_v34 = vadd.f32 %v1618_v32, %v2866_v5  ;;  %v1660_v40 = vadd.f32 %v1659_v33, %v2866_v5 }
 0x16e   :  { %v1620_v41 = vpop.f32.mrf.mxu0  ;;  %v1661_v42 = vpop.f32.mrf.mxu1 }
 0x16f   :  { %2153 = vtanh.f32 %v1619_v34  ;;  %v1621_v43 = vadd.f32 %v1620_v41, %v2866_v5  ;;  %v1662_v46 = vadd.f32 %v1661_v42, %v2866_v5 }
 0x170   :  { %v2146_v49 = vpop.eup %2145  ;;  %2155 = vtanh.f32 %v1660_v40  ;;  %v1622_v50 = vpop.f32.mrf.mxu0 }
 0x171   :  { %v1663_v54 = vpop.f32.mrf.mxu1  ;;  %v2148_v56 = vpop.eup %2147  ;;  %2157 = vtanh.f32 %v1621_v43 }
 0x172   :  { %v2150_v57 = vpop.eup %2149  ;;  %2159 = vtanh.f32 %v1662_v46  ;;  %v1623_v58 = vpop.f32.mrf.mxu0 }
 0x173   :  { %v1664_v59 = vpop.f32.mrf.mxu1  ;;  %v2152_v60 = vpop.eup %2151  ;;  %v1862_v61 = vcombine.low %v2146_v49, %v2150_v57 }
 0x174   :  { %v1863_v2 = vcombine.low %v2148_v56, %v2152_v60 }
 0x175   :  { %2022 = vst [vmem:[%s2917_s3 + $0xc0] sm:$0x77] %v1862_v61 }
 0x176   :  { %2023 = vst [vmem:[%s2917_s3 + $0xc8] sm:$0x77] %v1863_v2 }
 0x178   :  { %v1700_v6 = vpop.f32.mrf.mxu0  ;;  %v1741_v7 = vpop.f32.mrf.mxu1 }
 0x179   :  { %v1701_v35 = vadd.f32 %v1700_v6, %v2866_v5  ;;  %v1742_v8 = vadd.f32 %v1741_v7, %v2866_v5 }
 0x17a   :  { %v1702_v15 = vpop.f32.mrf.mxu0  ;;  %v1743_v4 = vpop.f32.mrf.mxu1 }
 0x17b   :  { %2161 = vtanh.f32 %v1701_v35  ;;  %v1703_v11 = vadd.f32 %v1702_v15, %v2866_v5  ;;  %v1744_v3 = vadd.f32 %v1743_v4, %v2866_v5 }
 0x17c   :  { %v2154_v12 = vpop.eup %2153  ;;  %2163 = vtanh.f32 %v1742_v8  ;;  %v1704_v16 = vpop.f32.mrf.mxu0 }
 0x17d   :  { %v1745_v17 = vpop.f32.mrf.mxu1  ;;  %v2156_v19 = vpop.eup %2155  ;;  %2165 = vtanh.f32 %v1703_v11 }
 0x17e   :  { %v2158_v20 = vpop.eup %2157  ;;  %2167 = vtanh.f32 %v1744_v3  ;;  %v1705_v21 = vpop.f32.mrf.mxu0 }
 0x17f   :  { %v1746_v22 = vpop.f32.mrf.mxu1  ;;  %v2160_v25 = vpop.eup %2159  ;;  %v1864_v26 = vcombine.low %v2154_v12, %v2158_v20 }
 0x180   :  { %v1865_v27 = vcombine.low %v2156_v19, %v2160_v25 }
 0x181   :  { %2024 = vst [vmem:[%s2917_s3 + $0xd0] sm:$0x77] %v1864_v26 }
 0x182   :  { %2025 = vst [vmem:[%s2917_s3 + $0xd8] sm:$0x77] %v1865_v27 }
 0x184   :  { %v1782_v28 = vpop.f32.mrf.mxu0  ;;  %v1823_v36 = vpop.f32.mrf.mxu1 }
 0x185   :  { %v1783_v37 = vadd.f32 %v1782_v28, %v2866_v5  ;;  %v1824_v38 = vadd.f32 %v1823_v36, %v2866_v5 }
 0x186   :  { %v1784_v39 = vpop.f32.mrf.mxu0  ;;  %v1825_v44 = vpop.f32.mrf.mxu1 }
 0x187   :  { %2169 = vtanh.f32 %v1783_v37  ;;  %v1785_v45 = vadd.f32 %v1784_v39, %v2866_v5  ;;  %v1826_v47 = vadd.f32 %v1825_v44, %v2866_v5 }
 0x188   :  { %v2162_v48 = vpop.eup %2161  ;;  %2171 = vtanh.f32 %v1824_v38  ;;  %v1786_v51 = vpop.f32.mrf.mxu0 }
 0x189   :  { %v1827_v52 = vpop.f32.mrf.mxu1  ;;  %v2164_v53 = vpop.eup %2163  ;;  %2173 = vtanh.f32 %v1785_v45 }
 0x18a   :  { %v2166_v55 = vpop.eup %2165  ;;  %2175 = vtanh.f32 %v1826_v47  ;;  %v1787_v62 = vpop.f32.mrf.mxu0 }
 0x18b   :  { %v1828_v63 = vpop.f32.mrf.mxu1  ;;  %v2168_v0 = vpop.eup %2167  ;;  %v1866_v1 = vcombine.low %v2162_v48, %v2166_v55 }
 0x18c   :  { %v1867_v9 = vcombine.low %v2164_v53, %v2168_v0 }
 0x18d   :  { %2026 = vst [vmem:[%s2917_s3 + $0xe0] sm:$0x77] %v1866_v1 }
 0x18e   :  { %2027 = vst [vmem:[%s2917_s3 + $0xe8] sm:$0x77] %v1867_v9 }
 0x194   :  { %v2170_v5 = vpop.eup %2169 }
 0x195   :  { %v2172_v10 = vpop.eup %2171 }
 0x196   :  { %v2174_v13 = vpop.eup %2173 }
 0x197   :  { %v2176_v14 = vpop.eup %2175  ;;  %v1868_v18 = vcombine.low %v2170_v5, %v2174_v13 }
 0x198   :  { %v1869_v23 = vcombine.low %v2172_v10, %v2176_v14 }
 0x199   :  { %2028 = vst [vmem:[%s2917_s3 + $0xf0] sm:$0x77] %v1868_v18 }
 0x19a   :  { %2029 = vst [vmem:[%s2917_s3 + $0xf8] sm:$0x77] %v1869_v23 }

</bundles_post_ra>
